<compile_context>
chip_gen: v6e
topology: v6e:2x2x1
jax: 0.10.0
libtpu: 0.0.40
codegen_flags: <defaults>
</compile_context>

<pallas_src>
import jax
import jax.numpy as jnp
from jax.experimental import pallas as pl
from jax.experimental.pallas import tpu as pltpu

LEAK = 0.2
BN_EPS = 0.8
LATENT = 100
LATENT_PAD = 128          # 100 -> 128 (lane-aligned contraction dim)
IMG_PIX = 28 * 28         # 784
OUT_PAD = 896             # 784 -> 7*128 (lane-dense output)

# Packed layout of the small per-feature vectors (all offsets are multiples of
# 128, so in-kernel slices stay lane-aligned).
VEC_SIZES = [
    ("b1", 128),
    ("b2", 256), ("g2", 256), ("be2", 256),
    ("b3", 512), ("g3", 512), ("be3", 512),
    ("b4", 1024), ("g4", 1024), ("be4", 1024),
    ("b5", OUT_PAD),
]
VEC_OFFSETS = {}
_off = 0
for _name, _size in VEC_SIZES:
    VEC_OFFSETS[_name] = (_off, _size)
    _off += _size
VEC_LEN = _off            # 6400 = 50 * 128


def _leaky(x):
    return jnp.where(x > 0, x, LEAK * x)


def generator_kernel(z_ref, w1_ref, w2_ref, vec_ref,
                     w3_hbm, w4_hbm, w5_hbm,
                     out_ref,
                     w3_vmem, w4_vmem, w5_vmem, sem):
    """Entire generator MLP fused in one kernel.

    Small operands (z, w1, w2, packed bias/BN slab) arrive via auto-DMA'd VMEM
    specs; w3 / w4 / w5 stay in HBM and are manually prefetched, overlapped
    with earlier-layer compute.  w5 is copied in two halves so w4 (needed
    first) is not starved for HBM bandwidth.
    """
    cp3 = pltpu.make_async_copy(w3_hbm, w3_vmem, sem.at[0])
    cp4 = pltpu.make_async_copy(w4_hbm, w4_vmem, sem.at[1])
    H5 = 512  # w5 row-split point (1024 rows total)
    cp5a = pltpu.make_async_copy(w5_hbm.at[pl.ds(0, H5)],
                                 w5_vmem.at[pl.ds(0, H5)], sem.at[2])
    cp5b = pltpu.make_async_copy(w5_hbm.at[pl.ds(H5, H5)],
                                 w5_vmem.at[pl.ds(H5, H5)], sem.at[3])
    cp3.start()
    cp4.start()
    cp5a.start()          # second half of w5 starts only after w4 has landed

    def vec_slice(name):
        off, size = VEC_OFFSETS[name]
        return vec_ref[:, off:off + size]          # static, 128-aligned slice

    def linear(x_f32, w_bf16, bias_f32):
        # bf16 x bf16 on the MXU, f32 accumulation, f32 bias add.
        y = jnp.dot(x_f32.astype(jnp.bfloat16), w_bf16,
                    preferred_element_type=jnp.float32)
        return y + bias_f32

    def batchnorm(x, gamma, beta):
        # training-mode BN, biased batch variance, one-pass moments
        # (eps = 0.8 safely masks any cancellation in E[x^2] - mu^2).
        mu = jnp.mean(x, axis=0, keepdims=True)
        ex2 = jnp.mean(x * x, axis=0, keepdims=True)
        var = ex2 - mu * mu
        xhat = (x - mu) * jax.lax.rsqrt(var + BN_EPS)
        return xhat * gamma + beta

    h = _leaky(linear(z_ref[...], w1_ref[...], vec_slice("b1")))          # (B,128)
    h = _leaky(batchnorm(linear(h, w2_ref[...], vec_slice("b2")),
                         vec_slice("g2"), vec_slice("be2")))              # (B,256)
    cp3.wait()
    h = _leaky(batchnorm(linear(h, w3_vmem[...], vec_slice("b3")),
                         vec_slice("g3"), vec_slice("be3")))              # (B,512)
    cp4.wait()
    cp5b.start()
    h = _leaky(batchnorm(linear(h, w4_vmem[...], vec_slice("b4")),
                         vec_slice("g4"), vec_slice("be4")))              # (B,1024)
    cp5a.wait()
    cp5b.wait()
    out_ref[...] = jnp.tanh(linear(h, w5_vmem[...], vec_slice("b5")))     # (B,896)


def init_params(key):
    """Deterministic init mimicking PyTorch defaults (uniform +-1/sqrt(fan_in))."""
    dims = [(LATENT, 128), (128, 256), (256, 512), (512, 1024), (1024, IMG_PIX)]
    params = {}
    for idx, (fan_in, fan_out) in enumerate(dims, start=1):
        key, kw, kb = jax.random.split(key, 3)
        bound = 1.0 / float(fan_in) ** 0.5
        params[f"w{idx}"] = jax.random.uniform(
            kw, (fan_in, fan_out), jnp.float32, -bound, bound)
        params[f"b{idx}"] = jax.random.uniform(
            kb, (1, fan_out), jnp.float32, -bound, bound)
    for idx in (2, 3, 4):
        fan_out = dims[idx - 1][1]
        params[f"g{idx}"] = jnp.ones((1, fan_out), jnp.float32)
        params[f"be{idx}"] = jnp.zeros((1, fan_out), jnp.float32)
    return params


def prepare_params(params):
    """One-time padding, bf16 conversion, and small-vector packing."""
    kp = {}
    # w1: pad contraction 100 -> 128 with zero rows (result unchanged).
    kp["w1"] = jnp.pad(params["w1"],
                       ((0, LATENT_PAD - LATENT), (0, 0))).astype(jnp.bfloat16)
    kp["w2"] = params["w2"].astype(jnp.bfloat16)
    kp["w3"] = params["w3"].astype(jnp.bfloat16)
    kp["w4"] = params["w4"].astype(jnp.bfloat16)
    # w5/b5: pad output 784 -> 896 with zero columns (padded outputs are
    # tanh(0)=0 and sliced off in the wrapper).
    kp["w5"] = jnp.pad(params["w5"],
                       ((0, 0), (0, OUT_PAD - IMG_PIX))).astype(jnp.bfloat16)
    b5_pad = jnp.pad(params["b5"], ((0, 0), (0, OUT_PAD - IMG_PIX)))
    pieces = {
        "b1": params["b1"],
        "b2": params["b2"], "g2": params["g2"], "be2": params["be2"],
        "b3": params["b3"], "g3": params["g3"], "be3": params["be3"],
        "b4": params["b4"], "g4": params["g4"], "be4": params["be4"],
        "b5": b5_pad,
    }
    kp["vec"] = jnp.concatenate([pieces[n] for n, _ in VEC_SIZES], axis=1)
    assert kp["vec"].shape == (1, VEC_LEN)
    return kp


def generator_forward(z, kparams):
    B = z.shape[0]
    z_pad = jnp.pad(z, ((0, 0), (0, LATENT_PAD - LATENT)))

    args = [
        z_pad,
        kparams["w1"], kparams["w2"], kparams["vec"],   # auto-DMA'd to VMEM
        kparams["w3"], kparams["w4"], kparams["w5"],    # stay in HBM, manual DMA
    ]
    flat = pl.pallas_call(
        generator_kernel,
        out_shape=jax.ShapeDtypeStruct((B, OUT_PAD), jnp.float32),
        in_specs=(
            [pl.BlockSpec(memory_space=pltpu.MemorySpace.VMEM)] * 4
            + [pl.BlockSpec(memory_space=pl.ANY)] * 3
        ),
        out_specs=pl.BlockSpec(memory_space=pltpu.MemorySpace.VMEM),
        scratch_shapes=[
            pltpu.VMEM((256, 512), jnp.bfloat16),      # w3 landing buffer
            pltpu.VMEM((512, 1024), jnp.bfloat16),     # w4 landing buffer
            pltpu.VMEM((1024, OUT_PAD), jnp.bfloat16), # w5 landing buffer
            pltpu.SemaphoreType.DMA((4,)),             # w3, w4, w5a, w5b
        ],
        compiler_params=pltpu.CompilerParams(vmem_limit_bytes=16 << 20),
    )(*args)
    # drop lane padding, then img.view(B, 1, 28, 28)
    return flat[:, :IMG_PIX].reshape(B, 1, 28, 28)


def reference_forward(z, params):
    """Pure-JAX f32 reference of the PyTorch module (training-mode BN)."""
    def bn(x, g, b):
        mu = jnp.mean(x, axis=0, keepdims=True)
        var = jnp.mean((x - mu) ** 2, axis=0, keepdims=True)
        return (x - mu) / jnp.sqrt(var + BN_EPS) * g + b

    h = _leaky(z @ params["w1"] + params["b1"])
    h = _leaky(bn(h @ params["w2"] + params["b2"], params["g2"], params["be2"]))
    h = _leaky(bn(h @ params["w3"] + params["b3"], params["g3"], params["be3"]))
    h = _leaky(bn(h @ params["w4"] + params["b4"], params["g4"], params["be4"]))
    h = jnp.tanh(h @ params["w5"] + params["b5"])
    return h.reshape(z.shape[0], 1, 28, 28)


if __name__ == "__main__":
    key = jax.random.PRNGKey(0)
    kp_key, kz_key = jax.random.split(key)
    params = init_params(kp_key)
    kparams = prepare_params(params)

    # latent z: (batch, 100); batch=8 keeps the BN reduction meaningful and
    # sublane-aligned.
    z = jax.random.normal(kz_key, (8, LATENT), jnp.float32)

    img = jax.block_until_ready(generator_forward(z, kparams))
    assert img.shape == (8, 1, 28, 28), img.shape
    assert img.dtype == jnp.float32
    assert bool(jnp.all(jnp.isfinite(img)))

    # parity vs. f32 reference (bf16 weights -> loose absolute tolerance)
    ref = reference_forward(z, params)
    max_err = float(jnp.max(jnp.abs(img - ref)))
    assert max_err < 8e-2, f"max abs err {max_err}"

    print("KERNEL_OK")
</pallas_src>

<mosaic_0001>
module attributes {stable_mosaic.version = 11 : i64} {
  func.func @generator_kernel(%arg0: memref<8x128xf32, #tpu.memory_space<vmem>>, %arg1: memref<128x128xbf16, #tpu.memory_space<vmem>>, %arg2: memref<128x256xbf16, #tpu.memory_space<vmem>>, %arg3: memref<1x6400xf32, #tpu.memory_space<vmem>>, %arg4: memref<256x512xbf16, #tpu.memory_space<any>>, %arg5: memref<512x1024xbf16, #tpu.memory_space<any>>, %arg6: memref<1024x896xbf16, #tpu.memory_space<any>>, %arg7: memref<8x896xf32, #tpu.memory_space<vmem>>, %arg8: memref<256x512xbf16, #tpu.memory_space<vmem>>, %arg9: memref<512x1024xbf16, #tpu.memory_space<vmem>>, %arg10: memref<1024x896xbf16, #tpu.memory_space<vmem>>, %arg11: memref<4x!tpu.dma_semaphore, #tpu.memory_space<semaphore_mem>>) attributes {dimension_semantics = [], scalar_prefetch = 0 : i64, scratch_operands = 4 : i64, tpu.core_type = #tpu.core_type<tc>} {
    %c0_i32 = arith.constant 0 : i32
    %0 = tpu.memref_slice %arg11[%c0_i32] : memref<4x!tpu.dma_semaphore, #tpu.memory_space<semaphore_mem>> -> memref<1x!tpu.dma_semaphore, #tpu.memory_space<semaphore_mem>>
    %1 = tpu.memref_squeeze %0 : memref<1x!tpu.dma_semaphore, #tpu.memory_space<semaphore_mem>> -> memref<!tpu.dma_semaphore, #tpu.memory_space<semaphore_mem>>
    tpu.enqueue_dma source(%arg4 : memref<256x512xbf16, #tpu.memory_space<any>>) target(%arg8 : memref<256x512xbf16, #tpu.memory_space<vmem>>) target_semaphore(%1 : memref<!tpu.dma_semaphore, #tpu.memory_space<semaphore_mem>>)
    %c1_i32 = arith.constant 1 : i32
    %2 = tpu.memref_slice %arg11[%c1_i32] : memref<4x!tpu.dma_semaphore, #tpu.memory_space<semaphore_mem>> -> memref<1x!tpu.dma_semaphore, #tpu.memory_space<semaphore_mem>>
    %3 = tpu.memref_squeeze %2 : memref<1x!tpu.dma_semaphore, #tpu.memory_space<semaphore_mem>> -> memref<!tpu.dma_semaphore, #tpu.memory_space<semaphore_mem>>
    tpu.enqueue_dma source(%arg5 : memref<512x1024xbf16, #tpu.memory_space<any>>) target(%arg9 : memref<512x1024xbf16, #tpu.memory_space<vmem>>) target_semaphore(%3 : memref<!tpu.dma_semaphore, #tpu.memory_space<semaphore_mem>>)
    %c2_i32 = arith.constant 2 : i32
    %c0_i32_0 = arith.constant 0 : i32
    %c0_i32_1 = arith.constant 0 : i32
    %4 = tpu.memref_slice %arg6[%c0_i32_0, %c0_i32_1] : memref<1024x896xbf16, #tpu.memory_space<any>> -> memref<512x896xbf16, #tpu.memory_space<any>>
    %c0_i32_2 = arith.constant 0 : i32
    %c0_i32_3 = arith.constant 0 : i32
    %5 = tpu.memref_slice %arg10[%c0_i32_2, %c0_i32_3] : memref<1024x896xbf16, #tpu.memory_space<vmem>> -> memref<512x896xbf16, #tpu.memory_space<vmem>>
    %6 = tpu.memref_slice %arg11[%c2_i32] : memref<4x!tpu.dma_semaphore, #tpu.memory_space<semaphore_mem>> -> memref<1x!tpu.dma_semaphore, #tpu.memory_space<semaphore_mem>>
    %7 = tpu.memref_squeeze %6 : memref<1x!tpu.dma_semaphore, #tpu.memory_space<semaphore_mem>> -> memref<!tpu.dma_semaphore, #tpu.memory_space<semaphore_mem>>
    tpu.enqueue_dma source(%4 : memref<512x896xbf16, #tpu.memory_space<any>>) target(%5 : memref<512x896xbf16, #tpu.memory_space<vmem>>) target_semaphore(%7 : memref<!tpu.dma_semaphore, #tpu.memory_space<semaphore_mem>>)
    %c0 = arith.constant 0 : index
    %c0_4 = arith.constant 0 : index
    %8 = vector.load %arg0[%c0, %c0_4] : memref<8x128xf32, #tpu.memory_space<vmem>>, vector<8x128xf32>
    %c0_5 = arith.constant 0 : index
    %c0_6 = arith.constant 0 : index
    %9 = vector.load %arg1[%c0_5, %c0_6] : memref<128x128xbf16, #tpu.memory_space<vmem>>, vector<128x128xbf16>
    %c0_7 = arith.constant 0 : index
    %c0_8 = arith.constant 0 : index
    %10 = vector.load %arg3[%c0_7, %c0_8] : memref<1x6400xf32, #tpu.memory_space<vmem>>, vector<1x128xf32>
    %11 = arith.truncf %8 : vector<8x128xf32> to vector<8x128xbf16>
    %cst = arith.constant dense<0.000000e+00> : vector<8x128xf32>
    %12 = tpu.matmul %11, %9, %cst {dimension_numbers = #tpu.dot_dimension_numbers<[1], [0], [0], [1], [0, 0, 1, 1], [], []>} : vector<8x128xbf16>, vector<128x128xbf16>, vector<8x128xf32> -> vector<8x128xf32>
    %13 = vector.broadcast %10 : vector<1x128xf32> to vector<8x128xf32>
    %14 = arith.addf %12, %13 : vector<8x128xf32>
    %cst_9 = arith.constant 0.000000e+00 : f32
    %15 = vector.broadcast %cst_9 : f32 to vector<8x128xf32>
    %16 = arith.cmpf ogt, %14, %15 : vector<8x128xf32>
    %cst_10 = arith.constant 2.000000e-01 : f32
    %17 = vector.broadcast %cst_10 : f32 to vector<8x128xf32>
    %18 = arith.mulf %17, %14 : vector<8x128xf32>
    %19 = arith.select %16, %14, %18 : vector<8x128xi1>, vector<8x128xf32>
    %c0_11 = arith.constant 0 : index
    %c0_12 = arith.constant 0 : index
    %20 = vector.load %arg2[%c0_11, %c0_12] : memref<128x256xbf16, #tpu.memory_space<vmem>>, vector<128x256xbf16>
    %c0_13 = arith.constant 0 : index
    %c128 = arith.constant 128 : index
    %21 = vector.load %arg3[%c0_13, %c128] : memref<1x6400xf32, #tpu.memory_space<vmem>>, vector<1x256xf32>
    %22 = arith.truncf %19 : vector<8x128xf32> to vector<8x128xbf16>
    %cst_14 = arith.constant dense<0.000000e+00> : vector<8x256xf32>
    %23 = tpu.matmul %22, %20, %cst_14 {dimension_numbers = #tpu.dot_dimension_numbers<[1], [0], [0], [1], [0, 0, 1, 1], [], []>} : vector<8x128xbf16>, vector<128x256xbf16>, vector<8x256xf32> -> vector<8x256xf32>
    %24 = vector.broadcast %21 : vector<1x256xf32> to vector<8x256xf32>
    %25 = arith.addf %23, %24 : vector<8x256xf32>
    %c0_15 = arith.constant 0 : index
    %c384 = arith.constant 384 : index
    %26 = vector.load %arg3[%c0_15, %c384] : memref<1x6400xf32, #tpu.memory_space<vmem>>, vector<1x256xf32>
    %c0_16 = arith.constant 0 : index
    %c640 = arith.constant 640 : index
    %27 = vector.load %arg3[%c0_16, %c640] : memref<1x6400xf32, #tpu.memory_space<vmem>>, vector<1x256xf32>
    %cst_17 = arith.constant dense<0.000000e+00> : vector<256xf32>
    %28 = vector.multi_reduction <add>, %25, %cst_17 [0] : vector<8x256xf32> to vector<256xf32>
    %29 = vector.shape_cast %28 : vector<256xf32> to vector<1x256xf32>
    %cst_18 = arith.constant 8.000000e+00 : f32
    %30 = vector.broadcast %cst_18 : f32 to vector<1x256xf32>
    %31 = arith.divf %29, %30 : vector<1x256xf32>
    %32 = arith.mulf %25, %25 : vector<8x256xf32>
    %cst_19 = arith.constant dense<0.000000e+00> : vector<256xf32>
    %33 = vector.multi_reduction <add>, %32, %cst_19 [0] : vector<8x256xf32> to vector<256xf32>
    %34 = vector.shape_cast %33 : vector<256xf32> to vector<1x256xf32>
    %cst_20 = arith.constant 8.000000e+00 : f32
    %35 = vector.broadcast %cst_20 : f32 to vector<1x256xf32>
    %36 = arith.divf %34, %35 : vector<1x256xf32>
    %37 = arith.mulf %31, %31 : vector<1x256xf32>
    %38 = arith.subf %36, %37 : vector<1x256xf32>
    %39 = vector.broadcast %31 : vector<1x256xf32> to vector<8x256xf32>
    %40 = arith.subf %25, %39 : vector<8x256xf32>
    %cst_21 = arith.constant 8.000000e-01 : f32
    %41 = vector.broadcast %cst_21 : f32 to vector<1x256xf32>
    %42 = arith.addf %38, %41 : vector<1x256xf32>
    %43 = math.rsqrt %42 : vector<1x256xf32>
    %44 = vector.broadcast %43 : vector<1x256xf32> to vector<8x256xf32>
    %45 = arith.mulf %40, %44 : vector<8x256xf32>
    %46 = vector.broadcast %26 : vector<1x256xf32> to vector<8x256xf32>
    %47 = arith.mulf %45, %46 : vector<8x256xf32>
    %48 = vector.broadcast %27 : vector<1x256xf32> to vector<8x256xf32>
    %49 = arith.addf %47, %48 : vector<8x256xf32>
    %cst_22 = arith.constant 0.000000e+00 : f32
    %50 = vector.broadcast %cst_22 : f32 to vector<8x256xf32>
    %51 = arith.cmpf ogt, %49, %50 : vector<8x256xf32>
    %cst_23 = arith.constant 2.000000e-01 : f32
    %52 = vector.broadcast %cst_23 : f32 to vector<8x256xf32>
    %53 = arith.mulf %52, %49 : vector<8x256xf32>
    %54 = arith.select %51, %49, %53 : vector<8x256xi1>, vector<8x256xf32>
    %c0_i32_24 = arith.constant 0 : i32
    %55 = tpu.memref_slice %arg11[%c0_i32_24] : memref<4x!tpu.dma_semaphore, #tpu.memory_space<semaphore_mem>> -> memref<1x!tpu.dma_semaphore, #tpu.memory_space<semaphore_mem>>
    %56 = tpu.memref_squeeze %55 : memref<1x!tpu.dma_semaphore, #tpu.memory_space<semaphore_mem>> -> memref<!tpu.dma_semaphore, #tpu.memory_space<semaphore_mem>>
    tpu.wait_dma2 semaphore(%56 : memref<!tpu.dma_semaphore, #tpu.memory_space<semaphore_mem>>) src(%arg4 : memref<256x512xbf16, #tpu.memory_space<any>>) dst(%arg8 : memref<256x512xbf16, #tpu.memory_space<vmem>>)
    %c0_25 = arith.constant 0 : index
    %c0_26 = arith.constant 0 : index
    %57 = vector.load %arg8[%c0_25, %c0_26] : memref<256x512xbf16, #tpu.memory_space<vmem>>, vector<256x512xbf16>
    %c0_27 = arith.constant 0 : index
    %c896 = arith.constant 896 : index
    %58 = vector.load %arg3[%c0_27, %c896] : memref<1x6400xf32, #tpu.memory_space<vmem>>, vector<1x512xf32>
    %59 = arith.truncf %54 : vector<8x256xf32> to vector<8x256xbf16>
    %cst_28 = arith.constant dense<0.000000e+00> : vector<8x512xf32>
    %60 = tpu.matmul %59, %57, %cst_28 {dimension_numbers = #tpu.dot_dimension_numbers<[1], [0], [0], [1], [0, 0, 1, 1], [], []>} : vector<8x256xbf16>, vector<256x512xbf16>, vector<8x512xf32> -> vector<8x512xf32>
    %61 = vector.broadcast %58 : vector<1x512xf32> to vector<8x512xf32>
    %62 = arith.addf %60, %61 : vector<8x512xf32>
    %c0_29 = arith.constant 0 : index
    %c1408 = arith.constant 1408 : index
    %63 = vector.load %arg3[%c0_29, %c1408] : memref<1x6400xf32, #tpu.memory_space<vmem>>, vector<1x512xf32>
    %c0_30 = arith.constant 0 : index
    %c1920 = arith.constant 1920 : index
    %64 = vector.load %arg3[%c0_30, %c1920] : memref<1x6400xf32, #tpu.memory_space<vmem>>, vector<1x512xf32>
    %cst_31 = arith.constant dense<0.000000e+00> : vector<512xf32>
    %65 = vector.multi_reduction <add>, %62, %cst_31 [0] : vector<8x512xf32> to vector<512xf32>
    %66 = vector.shape_cast %65 : vector<512xf32> to vector<1x512xf32>
    %cst_32 = arith.constant 8.000000e+00 : f32
    %67 = vector.broadcast %cst_32 : f32 to vector<1x512xf32>
    %68 = arith.divf %66, %67 : vector<1x512xf32>
    %69 = arith.mulf %62, %62 : vector<8x512xf32>
    %cst_33 = arith.constant dense<0.000000e+00> : vector<512xf32>
    %70 = vector.multi_reduction <add>, %69, %cst_33 [0] : vector<8x512xf32> to vector<512xf32>
    %71 = vector.shape_cast %70 : vector<512xf32> to vector<1x512xf32>
    %cst_34 = arith.constant 8.000000e+00 : f32
    %72 = vector.broadcast %cst_34 : f32 to vector<1x512xf32>
    %73 = arith.divf %71, %72 : vector<1x512xf32>
    %74 = arith.mulf %68, %68 : vector<1x512xf32>
    %75 = arith.subf %73, %74 : vector<1x512xf32>
    %76 = vector.broadcast %68 : vector<1x512xf32> to vector<8x512xf32>
    %77 = arith.subf %62, %76 : vector<8x512xf32>
    %cst_35 = arith.constant 8.000000e-01 : f32
    %78 = vector.broadcast %cst_35 : f32 to vector<1x512xf32>
    %79 = arith.addf %75, %78 : vector<1x512xf32>
    %80 = math.rsqrt %79 : vector<1x512xf32>
    %81 = vector.broadcast %80 : vector<1x512xf32> to vector<8x512xf32>
    %82 = arith.mulf %77, %81 : vector<8x512xf32>
    %83 = vector.broadcast %63 : vector<1x512xf32> to vector<8x512xf32>
    %84 = arith.mulf %82, %83 : vector<8x512xf32>
    %85 = vector.broadcast %64 : vector<1x512xf32> to vector<8x512xf32>
    %86 = arith.addf %84, %85 : vector<8x512xf32>
    %cst_36 = arith.constant 0.000000e+00 : f32
    %87 = vector.broadcast %cst_36 : f32 to vector<8x512xf32>
    %88 = arith.cmpf ogt, %86, %87 : vector<8x512xf32>
    %cst_37 = arith.constant 2.000000e-01 : f32
    %89 = vector.broadcast %cst_37 : f32 to vector<8x512xf32>
    %90 = arith.mulf %89, %86 : vector<8x512xf32>
    %91 = arith.select %88, %86, %90 : vector<8x512xi1>, vector<8x512xf32>
    %c1_i32_38 = arith.constant 1 : i32
    %92 = tpu.memref_slice %arg11[%c1_i32_38] : memref<4x!tpu.dma_semaphore, #tpu.memory_space<semaphore_mem>> -> memref<1x!tpu.dma_semaphore, #tpu.memory_space<semaphore_mem>>
    %93 = tpu.memref_squeeze %92 : memref<1x!tpu.dma_semaphore, #tpu.memory_space<semaphore_mem>> -> memref<!tpu.dma_semaphore, #tpu.memory_space<semaphore_mem>>
    tpu.wait_dma2 semaphore(%93 : memref<!tpu.dma_semaphore, #tpu.memory_space<semaphore_mem>>) src(%arg5 : memref<512x1024xbf16, #tpu.memory_space<any>>) dst(%arg9 : memref<512x1024xbf16, #tpu.memory_space<vmem>>)
    %c3_i32 = arith.constant 3 : i32
    %c512_i32 = arith.constant 512 : i32
    %c0_i32_39 = arith.constant 0 : i32
    %94 = tpu.memref_slice %arg6[%c512_i32, %c0_i32_39] : memref<1024x896xbf16, #tpu.memory_space<any>> -> memref<512x896xbf16, #tpu.memory_space<any>>
    %c512_i32_40 = arith.constant 512 : i32
    %c0_i32_41 = arith.constant 0 : i32
    %95 = tpu.memref_slice %arg10[%c512_i32_40, %c0_i32_41] : memref<1024x896xbf16, #tpu.memory_space<vmem>> -> memref<512x896xbf16, #tpu.memory_space<vmem>>
    %96 = tpu.memref_slice %arg11[%c3_i32] : memref<4x!tpu.dma_semaphore, #tpu.memory_space<semaphore_mem>> -> memref<1x!tpu.dma_semaphore, #tpu.memory_space<semaphore_mem>>
    %97 = tpu.memref_squeeze %96 : memref<1x!tpu.dma_semaphore, #tpu.memory_space<semaphore_mem>> -> memref<!tpu.dma_semaphore, #tpu.memory_space<semaphore_mem>>
    tpu.enqueue_dma source(%94 : memref<512x896xbf16, #tpu.memory_space<any>>) target(%95 : memref<512x896xbf16, #tpu.memory_space<vmem>>) target_semaphore(%97 : memref<!tpu.dma_semaphore, #tpu.memory_space<semaphore_mem>>)
    %c0_42 = arith.constant 0 : index
    %c0_43 = arith.constant 0 : index
    %98 = vector.load %arg9[%c0_42, %c0_43] : memref<512x1024xbf16, #tpu.memory_space<vmem>>, vector<512x1024xbf16>
    %c0_44 = arith.constant 0 : index
    %c2432 = arith.constant 2432 : index
    %99 = vector.load %arg3[%c0_44, %c2432] : memref<1x6400xf32, #tpu.memory_space<vmem>>, vector<1x1024xf32>
    %100 = arith.truncf %91 : vector<8x512xf32> to vector<8x512xbf16>
    %cst_45 = arith.constant dense<0.000000e+00> : vector<8x1024xf32>
    %101 = tpu.matmul %100, %98, %cst_45 {dimension_numbers = #tpu.dot_dimension_numbers<[1], [0], [0], [1], [0, 0, 1, 1], [], []>} : vector<8x512xbf16>, vector<512x1024xbf16>, vector<8x1024xf32> -> vector<8x1024xf32>
    %102 = vector.broadcast %99 : vector<1x1024xf32> to vector<8x1024xf32>
    %103 = arith.addf %101, %102 : vector<8x1024xf32>
    %c0_46 = arith.constant 0 : index
    %c3456 = arith.constant 3456 : index
    %104 = vector.load %arg3[%c0_46, %c3456] : memref<1x6400xf32, #tpu.memory_space<vmem>>, vector<1x1024xf32>
    %c0_47 = arith.constant 0 : index
    %c4480 = arith.constant 4480 : index
    %105 = vector.load %arg3[%c0_47, %c4480] : memref<1x6400xf32, #tpu.memory_space<vmem>>, vector<1x1024xf32>
    %cst_48 = arith.constant dense<0.000000e+00> : vector<1024xf32>
    %106 = vector.multi_reduction <add>, %103, %cst_48 [0] : vector<8x1024xf32> to vector<1024xf32>
    %107 = vector.shape_cast %106 : vector<1024xf32> to vector<1x1024xf32>
    %cst_49 = arith.constant 8.000000e+00 : f32
    %108 = vector.broadcast %cst_49 : f32 to vector<1x1024xf32>
    %109 = arith.divf %107, %108 : vector<1x1024xf32>
    %110 = arith.mulf %103, %103 : vector<8x1024xf32>
    %cst_50 = arith.constant dense<0.000000e+00> : vector<1024xf32>
    %111 = vector.multi_reduction <add>, %110, %cst_50 [0] : vector<8x1024xf32> to vector<1024xf32>
    %112 = vector.shape_cast %111 : vector<1024xf32> to vector<1x1024xf32>
    %cst_51 = arith.constant 8.000000e+00 : f32
    %113 = vector.broadcast %cst_51 : f32 to vector<1x1024xf32>
    %114 = arith.divf %112, %113 : vector<1x1024xf32>
    %115 = arith.mulf %109, %109 : vector<1x1024xf32>
    %116 = arith.subf %114, %115 : vector<1x1024xf32>
    %117 = vector.broadcast %109 : vector<1x1024xf32> to vector<8x1024xf32>
    %118 = arith.subf %103, %117 : vector<8x1024xf32>
    %cst_52 = arith.constant 8.000000e-01 : f32
    %119 = vector.broadcast %cst_52 : f32 to vector<1x1024xf32>
    %120 = arith.addf %116, %119 : vector<1x1024xf32>
    %121 = math.rsqrt %120 : vector<1x1024xf32>
    %122 = vector.broadcast %121 : vector<1x1024xf32> to vector<8x1024xf32>
    %123 = arith.mulf %118, %122 : vector<8x1024xf32>
    %124 = vector.broadcast %104 : vector<1x1024xf32> to vector<8x1024xf32>
    %125 = arith.mulf %123, %124 : vector<8x1024xf32>
    %126 = vector.broadcast %105 : vector<1x1024xf32> to vector<8x1024xf32>
    %127 = arith.addf %125, %126 : vector<8x1024xf32>
    %cst_53 = arith.constant 0.000000e+00 : f32
    %128 = vector.broadcast %cst_53 : f32 to vector<8x1024xf32>
    %129 = arith.cmpf ogt, %127, %128 : vector<8x1024xf32>
    %cst_54 = arith.constant 2.000000e-01 : f32
    %130 = vector.broadcast %cst_54 : f32 to vector<8x1024xf32>
    %131 = arith.mulf %130, %127 : vector<8x1024xf32>
    %132 = arith.select %129, %127, %131 : vector<8x1024xi1>, vector<8x1024xf32>
    %c2_i32_55 = arith.constant 2 : i32
    %c0_i32_56 = arith.constant 0 : i32
    %c0_i32_57 = arith.constant 0 : i32
    %133 = tpu.memref_slice %arg6[%c0_i32_56, %c0_i32_57] : memref<1024x896xbf16, #tpu.memory_space<any>> -> memref<512x896xbf16, #tpu.memory_space<any>>
    %c0_i32_58 = arith.constant 0 : i32
    %c0_i32_59 = arith.constant 0 : i32
    %134 = tpu.memref_slice %arg10[%c0_i32_58, %c0_i32_59] : memref<1024x896xbf16, #tpu.memory_space<vmem>> -> memref<512x896xbf16, #tpu.memory_space<vmem>>
    %135 = tpu.memref_slice %arg11[%c2_i32_55] : memref<4x!tpu.dma_semaphore, #tpu.memory_space<semaphore_mem>> -> memref<1x!tpu.dma_semaphore, #tpu.memory_space<semaphore_mem>>
    %136 = tpu.memref_squeeze %135 : memref<1x!tpu.dma_semaphore, #tpu.memory_space<semaphore_mem>> -> memref<!tpu.dma_semaphore, #tpu.memory_space<semaphore_mem>>
    tpu.wait_dma2 semaphore(%136 : memref<!tpu.dma_semaphore, #tpu.memory_space<semaphore_mem>>) src(%133 : memref<512x896xbf16, #tpu.memory_space<any>>) dst(%134 : memref<512x896xbf16, #tpu.memory_space<vmem>>)
    %c3_i32_60 = arith.constant 3 : i32
    %c512_i32_61 = arith.constant 512 : i32
    %c0_i32_62 = arith.constant 0 : i32
    %137 = tpu.memref_slice %arg6[%c512_i32_61, %c0_i32_62] : memref<1024x896xbf16, #tpu.memory_space<any>> -> memref<512x896xbf16, #tpu.memory_space<any>>
    %c512_i32_63 = arith.constant 512 : i32
    %c0_i32_64 = arith.constant 0 : i32
    %138 = tpu.memref_slice %arg10[%c512_i32_63, %c0_i32_64] : memref<1024x896xbf16, #tpu.memory_space<vmem>> -> memref<512x896xbf16, #tpu.memory_space<vmem>>
    %139 = tpu.memref_slice %arg11[%c3_i32_60] : memref<4x!tpu.dma_semaphore, #tpu.memory_space<semaphore_mem>> -> memref<1x!tpu.dma_semaphore, #tpu.memory_space<semaphore_mem>>
    %140 = tpu.memref_squeeze %139 : memref<1x!tpu.dma_semaphore, #tpu.memory_space<semaphore_mem>> -> memref<!tpu.dma_semaphore, #tpu.memory_space<semaphore_mem>>
    tpu.wait_dma2 semaphore(%140 : memref<!tpu.dma_semaphore, #tpu.memory_space<semaphore_mem>>) src(%137 : memref<512x896xbf16, #tpu.memory_space<any>>) dst(%138 : memref<512x896xbf16, #tpu.memory_space<vmem>>)
    %c0_65 = arith.constant 0 : index
    %c0_66 = arith.constant 0 : index
    %141 = vector.load %arg10[%c0_65, %c0_66] : memref<1024x896xbf16, #tpu.memory_space<vmem>>, vector<1024x896xbf16>
    %c0_67 = arith.constant 0 : index
    %c5504 = arith.constant 5504 : index
    %142 = vector.load %arg3[%c0_67, %c5504] : memref<1x6400xf32, #tpu.memory_space<vmem>>, vector<1x896xf32>
    %143 = arith.truncf %132 : vector<8x1024xf32> to vector<8x1024xbf16>
    %cst_68 = arith.constant dense<0.000000e+00> : vector<8x896xf32>
    %144 = tpu.matmul %143, %141, %cst_68 {dimension_numbers = #tpu.dot_dimension_numbers<[1], [0], [0], [1], [0, 0, 1, 1], [], []>} : vector<8x1024xbf16>, vector<1024x896xbf16>, vector<8x896xf32> -> vector<8x896xf32>
    %145 = vector.broadcast %142 : vector<1x896xf32> to vector<8x896xf32>
    %146 = arith.addf %144, %145 : vector<8x896xf32>
    %147 = math.tanh %146 : vector<8x896xf32>
    %c0_69 = arith.constant 0 : index
    %c0_70 = arith.constant 0 : index
    %148 = vector.load %arg7[%c0_69, %c0_70] : memref<8x896xf32, #tpu.memory_space<vmem>>, vector<8x896xf32>
    tpu.vector_store %arg7[%c0_69, %c0_70], %147 {strides = array<i32>} : memref<8x896xf32, #tpu.memory_space<vmem>>, vector<8x896xf32>,
    return
  }
}

</mosaic_0001>

<bundles_post_ra>
// kernel: tpu_custom_call.1
= control target key start
LH: loop header
LB: loop body
LE: loop exit
PB: predicated region body
PF: predicated region fallthrough
CT: control target
= control target key end

     0   :  { %12 = vsyncpa [#allocation7], 0  ;;  %s9206_s0 = inlined_call_operand.hbm [shape: f32[8,128], index: 0, kind: input, shape index: {}]   ;;  %s9207_s1 = inlined_call_operand.hbm [shape: bf16[128,128], index: 1, kind: input, shape index: {}]   ;;  %s9208_s2 = inlined_call_operand.hbm [shape: bf16[128,256], index: 2, kind: input, shape index: {}]   ;;  %s9209_s3 = inlined_call_operand.hbm [shape: f32[1,6400], index: 3, kind: input, shape index: {}]   ;;  %s9210_s4 = inlined_call_operand.hbm [shape: bf16[256,512], index: 4, kind: input, shape index: {}]   ;;  %s9211_s5 = inlined_call_operand.hbm [shape: bf16[512,1024], index: 5, kind: input, shape index: {}]   ;;  %s9212_s6 = inlined_call_operand.hbm [shape: bf16[1024,896], index: 6, kind: input, shape index: {}]   ;;  %s9213_s7 = inlined_call_operand.hbm [shape: f32[8,896], index: 7, kind: output, shape index: {}]  }
   0x1   :  { %13 = vsyncpa [#allocation10], 0 }
   0x2   :  { %14 = vsyncpa [#allocation13], 0 }
   0x3   :  { %15 = vsyncpa [#allocation8], 0  ;;  %s8828_s24 = smov [#allocation9]  }
   0x4   :  { %s31_s25 = sshll.u32 %s8828_s24, 4  ;;  %s32_s25 = int_to_ptr.vmem [resolvable:$true] %s31_s25 }
   0x5   :  { %s8637_s26 = scalar_lea.vmem %s32_s25, 1024  ;;  %p8642_p1 = scmp.lt.s32.totalorder %s32_s25, %s32_s25 }
   0x6   :  { %p8638_p0 = scmp.ne.s32.totalorder %s32_s25, %s8637_s26  ;;  %p8643_p2 = scmp.lt.s32.totalorder %s8637_s26, %s8637_s26 }
   0x8   :  { %p8644_p3 = por %p8643_p2, %p8642_p1 }
   0xa   :  { %p8645_p4 = pnand %p8644_p3, %p8638_p0 }
   0xc   :  { %8648 = shalt.err (!%p8645_p4)
}
   0xd   :  { %s8829_s27 = smov 64   ;;  %s8830_s28 = smov 4  }
   0xe   :  { %37 = dma.hbm_to_vmem [thread:$0]  %s9207_s1, 1024, %s32_s25, [#allocation10], %s8829_s27, %s8829_s27, %s8830_s28  }
   0xf   :  { %s8831_s8 = smov [#allocation6]   ;;  %s8832_s10 = smov [#allocation11]  }
  0x10   :  { %s22_s9 = sshll.u32 %s8831_s8, 4  ;;  %s43_s11 = sshll.u32 %s8832_s10, 4  ;;  %s23_s9 = int_to_ptr.vmem [resolvable:$true] %s22_s9  ;;  %s44_s11 = int_to_ptr.vmem [resolvable:$true] %s43_s11 }
  0x11   :  { %s8657_s12 = scalar_lea.vmem %s23_s9, 128  ;;  %p8662_p6 = scmp.lt.s32.totalorder %s23_s9, %s23_s9 }
  0x12   :  { %p8658_p5 = scmp.ne.s32.totalorder %s23_s9, %s8657_s12  ;;  %p8663_p7 = scmp.lt.s32.totalorder %s8657_s12, %s8657_s12 }
  0x14   :  { %p8664_p8 = por %p8663_p7, %p8662_p6 }
  0x16   :  { %p8665_p9 = pnand %p8664_p8, %p8658_p5 }
  0x18   :  { %8668 = shalt.err (!%p8665_p9)
}
  0x19   :  { %25 = dma.hbm_to_vmem [thread:$0]  %s9206_s0, 128, %s23_s9, [#allocation7]  }
  0x1a   :  { %s8677_s15 = scalar_lea.vmem %s44_s11, 2048  ;;  %p8682_p11 = scmp.lt.s32.totalorder %s44_s11, %s44_s11 }
  0x1b   :  { %p8678_p10 = scmp.ne.s32.totalorder %s44_s11, %s8677_s15  ;;  %p8683_p12 = scmp.lt.s32.totalorder %s8677_s15, %s8677_s15 }
  0x1d   :  { %p8684_p13 = por %p8683_p12, %p8682_p11 }
  0x1f   :  { %p8685_p0 = pnand %p8684_p13, %p8678_p10 }
  0x21   :  { %8688 = shalt.err (!%p8685_p0)
}
  0x22   :  { %s8833_s1 = smov 128   ;;  %s8834_s16 = smov 8  }
  0x23   :  { %49 = dma.hbm_to_vmem [thread:$0]  %s9208_s2, 2048, %s44_s11, [#allocation10], %s8833_s1, %s8833_s1, %s8834_s16  }
  0x24   :  { %s8835_s19 = smov [#allocation12]  }
  0x25   :  { %s56_s20 = sshll.u32 %s8835_s19, 4  ;;  %s57_s20 = int_to_ptr.vmem [resolvable:$true] %s56_s20 }
  0x26   :  { %s8697_s21 = scalar_lea.vmem %s57_s20, 800  ;;  %p8702_p2 = scmp.lt.s32.totalorder %s57_s20, %s57_s20 }
  0x27   :  { %p8698_p1 = scmp.ne.s32.totalorder %s57_s20, %s8697_s21  ;;  %p8703_p3 = scmp.lt.s32.totalorder %s8697_s21, %s8697_s21 }
  0x29   :  { %p8704_p4 = por %p8703_p3, %p8702_p2 }
  0x2b   :  { %p8705_p5 = pnand %p8704_p4, %p8698_p1 }
  0x2d   :  { %8708 = shalt.err (!%p8705_p5)
}
  0x2e   :  { %59 = dma.hbm_to_vmem [thread:$0]  %s9209_s3, 800, %s57_s20, [#allocation13]  }
  0x2f   :  { %8812 = dma.done.wait [#allocation7], 128  }
  0x30   :  { %8813 = vsyncadd [#allocation7], 4294967168 }
  0x31   :  { %8814 = dma.done.wait [#allocation10], 3072  }
  0x32   :  { %8815 = vsyncadd [#allocation10], 4294964224 }
  0x33   :  { %8816 = dma.done.wait [#allocation13], 800  }
  0x34   :  { %8817 = vsyncadd [#allocation13], 4294966496  ;;  %v8836_v0 = vmov 0.0   ;;  %vm8837_vm0 = vmmov 0   ;;  %v7819_v1 = vld [vmem:[#allocation9 + $0x38] sm:$0xff]   ;;  %v7820_v2 = vld [vmem:[#allocation9 + $0x30] sm:$0xff]  }
  0x35   :  { %7783 = vmatprep.subr.bf16.mxu0 %v8836_v0  ;;  %7799 = vmatprep.mubr.msk.bf16.mxu0 %vm8837_vm0, %v8836_v0  ;;  %v7821_v3 = vld [vmem:[#allocation9 + $0x28] sm:$0xff]   ;;  %v7827_v4 = vld [vmem:[#allocation11 + $0x74] ss:$8 sps:$4 sm:$0xff]   ;;  %v7829_v5 = vld [vmem:[#allocation11 + $0x70] ss:$8 sps:$4 sm:$0xff]   ;;  %v8838_v27 = vmov 0  }
  0x36   :  { %7784 = vmatpush3.bf16.msra.mxu0 %v7819_v1  ;;  %v7822_v6 = vld [vmem:[#allocation9 + $0x20] sm:$0xff]   ;;  %333 = vmatprep.subr.bf16.mxu1 %v7827_v4  ;;  %v7833_v9 = vld [vmem:[#allocation11 + $0x54] ss:$8 sps:$4 sm:$0xff]   ;;  %v7835_v11 = vld [vmem:[#allocation11 + $0x50] ss:$8 sps:$4 sm:$0xff]   ;;  %s8839_s2 = smov [#allocation2]  }
  0x37   :  { %7785 = vmatprep.subr.bf16.mxu0 %v8836_v0  ;;  %v7830_v7 = vld [vmem:[#allocation11 + $0x64] ss:$8 sps:$4 sm:$0xff]   ;;  %334 = vmatpush1.bf16.msra.mxu1 %v7829_v5  ;;  %v7832_v8 = vld [vmem:[#allocation11 + $0x60] ss:$8 sps:$4 sm:$0xff]   ;;  %v7823_v10 = vld [vmem:[#allocation9 + $0x18] sm:$0xff]   ;;  %s80_s3 = sshll.u32 %s8839_s2, 4  ;;  %s81_s3 = int_to_ptr.vmem [resolvable:$true] %s80_s3 }
  0x38   :  { %335 = vmatprep.subr.bf16.mxu1 %v7830_v7  ;;  %v7836_v12 = vld [vmem:[#allocation11 + $0x44] ss:$8 sps:$4 sm:$0xff]   ;;  %v7824_v13 = vld [vmem:[#allocation9 + $0x10] sm:$0xff]   ;;  %v7838_v14 = vld [vmem:[#allocation11 + $0x40] ss:$8 sps:$4 sm:$0xff]   ;;  %365 = vmatprep.mubr.bf16.mxu1 %v8838_v27  ;;  %s8840_s23 = smov [#allocation3]   ;;  %p8722_p7 = scmp.lt.s32.totalorder %s81_s3, %s81_s3 }
  0x39   :  { %v7839_v15 = vld [vmem:[#allocation11 + $0x34] ss:$8 sps:$4 sm:$0xff]   ;;  %v7825_v16 = vld [vmem:[#allocation9 + $0x8] sm:$0xff]   ;;  %v7841_v17 = vld [vmem:[#allocation11 + $0x30] ss:$8 sps:$4 sm:$0xff]   ;;  %s92_s24 = sshll.u32 %s8840_s23, 4  ;;  %s93_s24 = int_to_ptr.vmem [resolvable:$true] %s92_s24 }
  0x3a   :  { %7786 = vmatpush3.bf16.msra.mxu0 %v7820_v2  ;;  %v7842_v18 = vld [vmem:[#allocation11 + $0x24] ss:$8 sps:$4 sm:$0xff]   ;;  %v108_v20 = vld [vmem:[#allocation6] sm:$0xff]  ;;  %v7844_v21 = vld [vmem:[#allocation11 + $0x20] ss:$8 sps:$4 sm:$0xff]   ;;  %s8717_s25 = scalar_lea.vmem %s81_s3, 8192 }
  0x3b   :  { %7787 = vmatprep.subr.bf16.mxu0 %v8836_v0  ;;  %336 = vmatpush1.bf16.msra.mxu1 %v7832_v8  ;;  %v7826_v19 = vld [vmem:[#allocation9] sm:$0xff]   ;;  %v126_v22 = vpack.c.bf16 %v108_v20, %v108_v20  ;;  %v7845_v23 = vld [vmem:[#allocation11 + $0x14] ss:$8 sps:$4 sm:$0xff]   ;;  %v7847_v24 = vld [vmem:[#allocation11 + $0x10] ss:$8 sps:$4 sm:$0xff]   ;;  %p8718_p6 = scmp.ne.s32.totalorder %s81_s3, %s8717_s25  ;;  %p8723_p8 = scmp.lt.s32.totalorder %s8717_s25, %s8717_s25 }
  0x3c   :  { %337 = vmatprep.subr.bf16.mxu1 %v7833_v9  ;;  %v7848_v25 = vld [vmem:[#allocation11 + $0x4] ss:$8 sps:$4 sm:$0xff]   ;;  %v7850_v26 = vld [vmem:[#allocation11] ss:$8 sps:$4 sm:$0xff]  }
  0x3d   :  { %v6889_v28 = vld [vmem:[#allocation12] ss:$0 sm:$0xff]  ;;  %p8724_p9 = por %p8723_p8, %p8722_p7 }
  0x3e   :  { %7788 = vmatpush3.bf16.msra.mxu0 %v7821_v3 }
  0x3f   :  { %7789 = vmatprep.subr.bf16.mxu0 %v8836_v0  ;;  %338 = vmatpush1.bf16.msra.mxu1 %v7835_v11  ;;  %p8725_p10 = pnand %p8724_p9, %p8718_p6 }
  0x40   :  { %339 = vmatprep.subr.bf16.mxu1 %v7836_v12 }
  0x42   :  { %7790 = vmatpush3.bf16.msra.mxu0 %v7822_v6 }
  0x43   :  { %7791 = vmatprep.subr.bf16.mxu0 %v8836_v0  ;;  %340 = vmatpush1.bf16.msra.mxu1 %v7838_v14 }
  0x44   :  { %341 = vmatprep.subr.bf16.mxu1 %v7839_v15 }
  0x46   :  { %7792 = vmatpush3.bf16.msra.mxu0 %v7823_v10 }
  0x47   :  { %7793 = vmatprep.subr.bf16.mxu0 %v8836_v0  ;;  %342 = vmatpush1.bf16.msra.mxu1 %v7841_v17 }
  0x48   :  { %343 = vmatprep.subr.bf16.mxu1 %v7842_v18 }
  0x4a   :  { %7794 = vmatpush3.bf16.msra.mxu0 %v7824_v13 }
  0x4b   :  { %7795 = vmatprep.subr.bf16.mxu0 %v8836_v0  ;;  %344 = vmatpush1.bf16.msra.mxu1 %v7844_v21 }
  0x4c   :  { %345 = vmatprep.subr.bf16.mxu1 %v7845_v23 }
  0x4e   :  { %7796 = vmatpush3.bf16.msra.mxu0 %v7825_v16 }
  0x4f   :  { %7797 = vmatprep.subr.bf16.mxu0 %v8836_v0  ;;  %346 = vmatpush1.bf16.msra.mxu1 %v7847_v24 }
  0x50   :  { %347 = vmatprep.subr.bf16.mxu1 %v7848_v25 }
  0x52   :  { %7798 = vmatpush3.bf16.msra.mxu0 %v7826_v19 }
  0x53   :  { %348 = vmatpush1.bf16.msra.mxu1 %v7850_v26 }
  0x55   :  { %7800 = vmatmul.mubr.bf16.vlgmr.msra.gmra.mxu0 %v126_v22 }
 0x115   :  { %v215_v29 = vpop.f32.mrf.mxu0 }
 0x116   :  { %v216_v30 = vadd.f32 %v6889_v28, %v215_v29 }
 0x117   :  { %v7801_v31 = vpop.f32.mrf.mxu0 }
 0x118   :  { %vm221_vm1 = vcmp.gt.f32.partialorder %v216_v30, 0.0  ;;  %v222_v32 = vmul.f32 0.2, %v216_v30 }
 0x119   :  { %v218_v33 = vpop.f32.mrf.mxu0 }
 0x11a   :  { %v223_v34 = vsel %vm221_vm1, %v216_v30, %v222_v32 }
 0x11b   :  { %v7802_v35 = vpop.f32.mrf.mxu0  ;;  %v241_v36 = vpack.c.bf16 %v223_v34, %v223_v34 }
 0x11d   :  { %366 = vmatmul.mubr.bf16.vlgmr.msra.gmra.mxu1 %v241_v36 }
 0x11e   :  { %8728 = shalt.err (!%p8725_p10)  }
 0x11f   :  { %83 = dma.hbm_to_vmem [thread:$0]  %s9210_s4, 8192, %s81_s3, [#allocation5] }
 0x120   :  { %s8737_s28 = scalar_lea.vmem %s93_s24, 32768  ;;  %p8742_p12 = scmp.lt.s32.totalorder %s93_s24, %s93_s24 }
 0x121   :  { %p8738_p11 = scmp.ne.s32.totalorder %s93_s24, %s8737_s28  ;;  %p8743_p13 = scmp.lt.s32.totalorder %s8737_s28, %s8737_s28 }
 0x123   :  { %p8744_p0 = por %p8743_p13, %p8742_p12 }
 0x125   :  { %p8745_p1 = pnand %p8744_p0, %p8738_p11 }
 0x127   :  { %8748 = shalt.err (!%p8745_p1)  }
 0x128   :  { %95 = dma.hbm_to_vmem [thread:$0]  %s9211_s5, 32768, %s93_s24, [#allocation5 + $0x1] }
 0x129   :  { %s8841_s8 = smov [#allocation4]  }
 0x12a   :  { %s104_s9 = sshll.u32 %s8841_s8, 4  ;;  %s8902_s9 = int_to_ptr.vmem [resolvable:$true] %s104_s9 }
 0x12b   :  { %s8757_s4 = scalar_lea.vmem %s8902_s9, 28672  ;;  %s8761_s10 = scalar_lea.vmem %s8902_s9, 57344 }
 0x12c   :  { %p8758_p2 = scmp.ne.s32.totalorder %s8902_s9, %s8757_s4  ;;  %p8762_p3 = scmp.lt.s32.totalorder %s8902_s9, %s8902_s9 }
 0x12d   :  { %p8763_p4 = scmp.lt.s32.totalorder %s8761_s10, %s8757_s4 }
 0x12f   :  { %p8764_p5 = por %p8763_p4, %p8762_p3 }
 0x131   :  { %p8765_p6 = pnand %p8764_p5, %p8758_p2 }
 0x133   :  { %8768 = shalt.err (!%p8765_p6)  }
 0x134   :  { %107 = dma.hbm_to_vmem [thread:$0]  %s9212_s6, 28672, %s8902_s9, [#allocation5 + $0x2]  ;;  %v243_v37 = vlaneseq  ;;  %v240_v40 = vld [vmem:[#allocation12 + $0x1] sm:$0x3]  ;;  %v374_v22 = vld [vmem:[#allocation12 + $0x3] sm:$0x3] }
 0x135   :  { %v375_v23 = vld [vmem:[#allocation12 + $0x5] sm:$0x3] }
 0x136   :  { %v8915_v38 = vshrl.u32 %v243_v37, 7 }
 0x138   :  { %v8918_v39 = vsub.s32 0, %v8915_v38  ;;  %v8921_v41 = vsub.s32 1, %v8915_v38 }
 0x13a   :  { %v246_v42 = vrot.slane %v240_v40, %v8918_v39  ;;  %v250_v43 = vrot.slane %v240_v40, %v8921_v41  ;;  %v423_v25 = vrot.slane %v374_v22, %v8918_v39  ;;  %v436_v28 = vrot.slane %v375_v23, %v8918_v39 }
 0x13b   :  { %v427_v30 = vrot.slane %v374_v22, %v8921_v41  ;;  %v440_v34 = vrot.slane %v375_v23, %v8921_v41 }
 0x1dd   :  { %v367_v44 = vpop.f32.mrf.mxu1 }
 0x1de   :  { %v368_v45 = vadd.f32 %v367_v44, %v246_v42 }
 0x1df   :  { %v369_v46 = vpop.f32.mrf.mxu1 }
 0x1e0   :  { %v376_v47 = vrot.slane %v368_v45, 4  ;;  %v391_v48 = vmul.f32 %v368_v45, %v368_v45  ;;  %v370_v49 = vadd.f32 %v369_v46, %v250_v43 }
 0x1e1   :  { %v371_v50 = vpop.f32.mrf.mxu1 }
 0x1e2   :  { %v377_v51 = vadd.f32 %v376_v47, %v368_v45  ;;  %v393_v52 = vrot.slane %v391_v48, 4  ;;  %v382_v53 = vrot.slane %v370_v49, 4  ;;  %v392_v54 = vmul.f32 %v370_v49, %v370_v49 }
 0x1e3   :  { %v372_v55 = vpop.f32.mrf.mxu1 }
 0x1e4   :  { %v378_v56 = vrot.slane %v377_v51, 2  ;;  %v394_v57 = vadd.f32 %v393_v52, %v391_v48  ;;  %v383_v58 = vadd.f32 %v382_v53, %v370_v49  ;;  %v399_v59 = vrot.slane %v392_v54, 4 }
 0x1e6   :  { %v379_v60 = vadd.f32 %v378_v56, %v377_v51  ;;  %v395_v61 = vrot.slane %v394_v57, 2  ;;  %v384_v62 = vrot.slane %v383_v58, 2  ;;  %v400_v63 = vadd.f32 %v399_v59, %v392_v54 }
 0x1e8   :  { %v380_v0 = vrot.slane %v379_v60, 1  ;;  %v396_v1 = vadd.f32 %v395_v61, %v394_v57  ;;  %v385_v2 = vadd.f32 %v384_v62, %v383_v58  ;;  %v401_v3 = vrot.slane %v400_v63, 2 }
 0x1ea   :  { %v381_v4 = vadd.f32 %v380_v0, %v379_v60  ;;  %v397_v5 = vrot.slane %v396_v1, 1  ;;  %v386_v6 = vrot.slane %v385_v2, 1  ;;  %v402_v7 = vadd.f32 %v401_v3, %v400_v63 }
 0x1ec   :  { %v389_v8 = vmul.f32 0.125, %v381_v4  ;;  %v398_v9 = vadd.f32 %v397_v5, %v396_v1  ;;  %v387_v10 = vadd.f32 %v386_v6, %v385_v2  ;;  %v403_v11 = vrot.slane %v402_v7, 1 }
 0x1ee   :  { %v405_v12 = vmul.f32 0.125, %v398_v9  ;;  %v407_v13 = vmul.f32 %v389_v8, %v389_v8  ;;  %v390_v14 = vmul.f32 0.125, %v387_v10  ;;  %v404_v15 = vadd.f32 %v403_v11, %v402_v7 }
 0x1ef   :  { %v411_v24 = vsub.f32 %v368_v45, %v389_v8 }
 0x1f0   :  { %v409_v16 = vsub.f32 %v405_v12, %v407_v13  ;;  %v408_v17 = vmul.f32 %v390_v14, %v390_v14  ;;  %v406_v18 = vmul.f32 0.125, %v404_v15  ;;  %v412_v29 = vsub.f32 %v370_v49, %v390_v14 }
 0x1f2   :  { %v413_v19 = vadd.f32 0.8, %v409_v16  ;;  %v410_v20 = vsub.f32 %v406_v18, %v408_v17 }
 0x1f4   :  { %7851 = vrsqrt.f32 %v413_v19  ;;  %v414_v21 = vadd.f32 0.8, %v410_v20 }
 0x1f6   :  { %7853 = vrsqrt.f32 %v414_v21 }
 0x201   :  { %v7852_v26 = vpop.eup %7851 }
 0x202   :  { %v417_v27 = vmul.f32 %v7852_v26, %v411_v24 }
 0x203   :  { %v7854_v31 = vpop.eup %7853 }
 0x204   :  { %v430_v32 = vmul.f32 %v423_v25, %v417_v27  ;;  %v418_v33 = vmul.f32 %v7854_v31, %v412_v29 }
 0x206   :  { %v443_v35 = vadd.f32 %v436_v28, %v430_v32  ;;  %v431_v36 = vmul.f32 %v427_v30, %v418_v33 }
 0x208   :  { %vm445_vm2 = vcmp.gt.f32.partialorder %v443_v35, 0.0  ;;  %v447_v37 = vmul.f32 0.2, %v443_v35  ;;  %v444_v40 = vadd.f32 %v440_v34, %v431_v36 }
 0x20a   :  { %v8929_v42 = vsel %vm445_vm2, %v443_v35, %v447_v37  ;;  %vm446_vm3 = vcmp.gt.f32.partialorder %v444_v40, 0.0  ;;  %v448_v43 = vmul.f32 0.2, %v444_v40 }
 0x20c   :  { %v450_v44 = vsel %vm446_vm3, %v444_v40, %v448_v43 }
 0x20d   :  { %8818 = dma.done.wait [#allocation5], 8192 }
 0x20e   :  { %8819 = vsyncadd [#allocation5], 4294959104  ;;  %v521_v45 = vpack.c.bf16 %v450_v44, %v450_v44  ;;  %v7855_v46 = vld [vmem:[#allocation2 + $0xe4] ss:$16 sps:$4 sm:$0xff]   ;;  %v7857_v47 = vld [vmem:[#allocation2 + $0xec] ss:$16 sps:$4 sm:$0xff]  }
 0x20f   :  { %863 = vmatprep.subr.bf16.mxu0 %v7855_v46  ;;  %v7859_v48 = vld [vmem:[#allocation2 + $0xe0] ss:$16 sps:$4 sm:$0xff]   ;;  %v7860_v49 = vld [vmem:[#allocation2 + $0xe8] ss:$16 sps:$4 sm:$0xff]   ;;  %904 = vmatprep.subr.bf16.mxu1 %v7857_v47  ;;  %v7861_v50 = vld [vmem:[#allocation2 + $0xc4] ss:$16 sps:$4 sm:$0xff]  }
 0x210   :  { %895 = vmatprep.mubr.bf16.mxu0 %v521_v45  ;;  %936 = vmatprep.mubr.bf16.mxu1 %v521_v45  ;;  %v7863_v51 = vld [vmem:[#allocation2 + $0xcc] ss:$16 sps:$4 sm:$0xff]   ;;  %v7865_v52 = vld [vmem:[#allocation2 + $0xc0] ss:$16 sps:$4 sm:$0xff]   ;;  %v7866_v53 = vld [vmem:[#allocation2 + $0xc8] ss:$16 sps:$4 sm:$0xff]  }
 0x211   :  { %864 = vmatpush1.bf16.msra.mxu0 %v7859_v48  ;;  %905 = vmatpush1.bf16.msra.mxu1 %v7860_v49  ;;  %v7867_v54 = vld [vmem:[#allocation2 + $0xa4] ss:$16 sps:$4 sm:$0xff]   ;;  %v7869_v55 = vld [vmem:[#allocation2 + $0xac] ss:$16 sps:$4 sm:$0xff]   ;;  %v7871_v56 = vld [vmem:[#allocation2 + $0xa0] ss:$16 sps:$4 sm:$0xff]  }
 0x212   :  { %865 = vmatprep.subr.bf16.mxu0 %v7861_v50  ;;  %906 = vmatprep.subr.bf16.mxu1 %v7863_v51  ;;  %v7872_v57 = vld [vmem:[#allocation2 + $0xa8] ss:$16 sps:$4 sm:$0xff]   ;;  %v7873_v58 = vld [vmem:[#allocation2 + $0x84] ss:$16 sps:$4 sm:$0xff]   ;;  %v7875_v59 = vld [vmem:[#allocation2 + $0x8c] ss:$16 sps:$4 sm:$0xff]   ;;  %v520_v50 = vpack.c.bf16 %v8929_v42, %v8929_v42 }
 0x213   :  { %v7877_v60 = vld [vmem:[#allocation2 + $0x80] ss:$16 sps:$4 sm:$0xff]   ;;  %v7878_v61 = vld [vmem:[#allocation2 + $0x88] ss:$16 sps:$4 sm:$0xff]   ;;  %v7879_v62 = vld [vmem:[#allocation2 + $0x64] ss:$16 sps:$4 sm:$0xff]  }
 0x214   :  { %v7881_v63 = vld [vmem:[#allocation2 + $0x6c] ss:$16 sps:$4 sm:$0xff]   ;;  %v7883_v0 = vld [vmem:[#allocation2 + $0x60] ss:$16 sps:$4 sm:$0xff]   ;;  %v7884_v1 = vld [vmem:[#allocation2 + $0x68] ss:$16 sps:$4 sm:$0xff]  }
 0x215   :  { %866 = vmatpush1.bf16.msra.mxu0 %v7865_v52  ;;  %907 = vmatpush1.bf16.msra.mxu1 %v7866_v53  ;;  %v7885_v2 = vld [vmem:[#allocation2 + $0x44] ss:$16 sps:$4 sm:$0xff]   ;;  %v7887_v3 = vld [vmem:[#allocation2 + $0x4c] ss:$16 sps:$4 sm:$0xff]   ;;  %v7889_v4 = vld [vmem:[#allocation2 + $0x40] ss:$16 sps:$4 sm:$0xff]  }
 0x216   :  { %867 = vmatprep.subr.bf16.mxu0 %v7867_v54  ;;  %908 = vmatprep.subr.bf16.mxu1 %v7869_v55  ;;  %v7890_v5 = vld [vmem:[#allocation2 + $0x48] ss:$16 sps:$4 sm:$0xff]   ;;  %v7891_v6 = vld [vmem:[#allocation2 + $0x24] ss:$16 sps:$4 sm:$0xff]   ;;  %v7893_v7 = vld [vmem:[#allocation2 + $0x2c] ss:$16 sps:$4 sm:$0xff]  }
 0x217   :  { %v7895_v8 = vld [vmem:[#allocation2 + $0x20] ss:$16 sps:$4 sm:$0xff]   ;;  %v7896_v9 = vld [vmem:[#allocation2 + $0x28] ss:$16 sps:$4 sm:$0xff]   ;;  %v7897_v10 = vld [vmem:[#allocation2 + $0x4] ss:$16 sps:$4 sm:$0xff]  }
 0x218   :  { %v7899_v11 = vld [vmem:[#allocation2 + $0xc] ss:$16 sps:$4 sm:$0xff]   ;;  %v7901_v12 = vld [vmem:[#allocation2] ss:$16 sps:$4 sm:$0xff]   ;;  %v7902_v13 = vld [vmem:[#allocation2 + $0x8] ss:$16 sps:$4 sm:$0xff]  }
 0x219   :  { %868 = vmatpush1.bf16.msra.mxu0 %v7871_v56  ;;  %909 = vmatpush1.bf16.msra.mxu1 %v7872_v57  ;;  %v7903_v14 = vld [vmem:[#allocation2 + $0x1e4] ss:$16 sps:$4 sm:$0xff]   ;;  %v7905_v15 = vld [vmem:[#allocation2 + $0x1ec] ss:$16 sps:$4 sm:$0xff]   ;;  %v7907_v16 = vld [vmem:[#allocation2 + $0x1e0] ss:$16 sps:$4 sm:$0xff]  }
 0x21a   :  { %869 = vmatprep.subr.bf16.mxu0 %v7873_v58  ;;  %910 = vmatprep.subr.bf16.mxu1 %v7875_v59  ;;  %v7908_v17 = vld [vmem:[#allocation2 + $0x1e8] ss:$16 sps:$4 sm:$0xff]   ;;  %v7909_v18 = vld [vmem:[#allocation2 + $0x1c4] ss:$16 sps:$4 sm:$0xff]   ;;  %v7911_v19 = vld [vmem:[#allocation2 + $0x1cc] ss:$16 sps:$4 sm:$0xff]  }
 0x21b   :  { %v7913_v20 = vld [vmem:[#allocation2 + $0x1c0] ss:$16 sps:$4 sm:$0xff]   ;;  %v7914_v21 = vld [vmem:[#allocation2 + $0x1c8] ss:$16 sps:$4 sm:$0xff]   ;;  %v7915_v22 = vld [vmem:[#allocation2 + $0x1a4] ss:$16 sps:$4 sm:$0xff]  }
 0x21c   :  { %v7917_v23 = vld [vmem:[#allocation2 + $0x1ac] ss:$16 sps:$4 sm:$0xff]   ;;  %v7919_v24 = vld [vmem:[#allocation2 + $0x1a0] ss:$16 sps:$4 sm:$0xff]   ;;  %v7920_v25 = vld [vmem:[#allocation2 + $0x1a8] ss:$16 sps:$4 sm:$0xff]  }
 0x21d   :  { %870 = vmatpush1.bf16.msra.mxu0 %v7877_v60  ;;  %911 = vmatpush1.bf16.msra.mxu1 %v7878_v61  ;;  %v7921_v26 = vld [vmem:[#allocation2 + $0x184] ss:$16 sps:$4 sm:$0xff]   ;;  %v7923_v27 = vld [vmem:[#allocation2 + $0x18c] ss:$16 sps:$4 sm:$0xff]   ;;  %v7925_v28 = vld [vmem:[#allocation2 + $0x180] ss:$16 sps:$4 sm:$0xff]  }
 0x21e   :  { %871 = vmatprep.subr.bf16.mxu0 %v7879_v62  ;;  %912 = vmatprep.subr.bf16.mxu1 %v7881_v63  ;;  %v7926_v29 = vld [vmem:[#allocation2 + $0x188] ss:$16 sps:$4 sm:$0xff]   ;;  %v7927_v30 = vld [vmem:[#allocation2 + $0x164] ss:$16 sps:$4 sm:$0xff]   ;;  %v7929_v31 = vld [vmem:[#allocation2 + $0x16c] ss:$16 sps:$4 sm:$0xff]  }
 0x21f   :  { %v7931_v32 = vld [vmem:[#allocation2 + $0x160] ss:$16 sps:$4 sm:$0xff]   ;;  %v7932_v33 = vld [vmem:[#allocation2 + $0x168] ss:$16 sps:$4 sm:$0xff]   ;;  %v7933_v34 = vld [vmem:[#allocation2 + $0x144] ss:$16 sps:$4 sm:$0xff]  }
 0x220   :  { %v7935_v35 = vld [vmem:[#allocation2 + $0x14c] ss:$16 sps:$4 sm:$0xff]   ;;  %v7937_v36 = vld [vmem:[#allocation2 + $0x140] ss:$16 sps:$4 sm:$0xff]   ;;  %v7938_v37 = vld [vmem:[#allocation2 + $0x148] ss:$16 sps:$4 sm:$0xff]  }
 0x221   :  { %872 = vmatpush1.bf16.msra.mxu0 %v7883_v0  ;;  %913 = vmatpush1.bf16.msra.mxu1 %v7884_v1  ;;  %v7939_v40 = vld [vmem:[#allocation2 + $0x124] ss:$16 sps:$4 sm:$0xff]   ;;  %v7941_v43 = vld [vmem:[#allocation2 + $0x12c] ss:$16 sps:$4 sm:$0xff]   ;;  %v7943_v44 = vld [vmem:[#allocation2 + $0x120] ss:$16 sps:$4 sm:$0xff]  }
 0x222   :  { %873 = vmatprep.subr.bf16.mxu0 %v7885_v2  ;;  %914 = vmatprep.subr.bf16.mxu1 %v7887_v3  ;;  %v7944_v45 = vld [vmem:[#allocation2 + $0x128] ss:$16 sps:$4 sm:$0xff]   ;;  %v7945_v46 = vld [vmem:[#allocation2 + $0x104] ss:$16 sps:$4 sm:$0xff]   ;;  %v7947_v47 = vld [vmem:[#allocation2 + $0x10c] ss:$16 sps:$4 sm:$0xff]  }
 0x223   :  { %v7949_v48 = vld [vmem:[#allocation2 + $0x100] ss:$16 sps:$4 sm:$0xff]   ;;  %v7950_v49 = vld [vmem:[#allocation2 + $0x108] ss:$16 sps:$4 sm:$0xff]   ;;  %v8934_v51 = vsub.s32 2, %v8915_v38  ;;  %v8937_v53 = vsub.s32 3, %v8915_v38 }
 0x224   :  { %v519_v52 = vld [vmem:[#allocation12 + $0x7] sm:$0xf] }
 0x225   :  { %874 = vmatpush1.bf16.msra.mxu0 %v7889_v4  ;;  %915 = vmatpush1.bf16.msra.mxu1 %v7890_v5  ;;  %v526_v54 = vrot.slane %v519_v52, %v8918_v39  ;;  %v534_v55 = vrot.slane %v519_v52, %v8934_v51  ;;  %v530_v58 = vrot.slane %v519_v52, %v8921_v41 }
 0x226   :  { %875 = vmatprep.subr.bf16.mxu0 %v7891_v6  ;;  %916 = vmatprep.subr.bf16.mxu1 %v7893_v7  ;;  %v538_v42 = vrot.slane %v519_v52, %v8937_v53 }
 0x229   :  { %876 = vmatpush1.bf16.msra.mxu0 %v7895_v8  ;;  %917 = vmatpush1.bf16.msra.mxu1 %v7896_v9 }
 0x22a   :  { %877 = vmatprep.subr.bf16.mxu0 %v7897_v10  ;;  %918 = vmatprep.subr.bf16.mxu1 %v7899_v11 }
 0x22d   :  { %878 = vmatpush1.bf16.msra.mxu0 %v7901_v12  ;;  %919 = vmatpush1.bf16.msra.mxu1 %v7902_v13 }
 0x22e   :  { %879 = vmatprep.subr.bf16.mxu0 %v7903_v14  ;;  %920 = vmatprep.subr.bf16.mxu1 %v7905_v15 }
 0x231   :  { %880 = vmatpush2.bf16.msra.mxu0 %v7907_v16  ;;  %921 = vmatpush2.bf16.msra.mxu1 %v7908_v17 }
 0x232   :  { %881 = vmatprep.subr.bf16.mxu0 %v7909_v18  ;;  %922 = vmatprep.subr.bf16.mxu1 %v7911_v19 }
 0x235   :  { %882 = vmatpush2.bf16.msra.mxu0 %v7913_v20  ;;  %923 = vmatpush2.bf16.msra.mxu1 %v7914_v21 }
 0x236   :  { %883 = vmatprep.subr.bf16.mxu0 %v7915_v22  ;;  %924 = vmatprep.subr.bf16.mxu1 %v7917_v23 }
 0x239   :  { %884 = vmatpush2.bf16.msra.mxu0 %v7919_v24  ;;  %925 = vmatpush2.bf16.msra.mxu1 %v7920_v25 }
 0x23a   :  { %885 = vmatprep.subr.bf16.mxu0 %v7921_v26  ;;  %926 = vmatprep.subr.bf16.mxu1 %v7923_v27 }
 0x23d   :  { %886 = vmatpush2.bf16.msra.mxu0 %v7925_v28  ;;  %927 = vmatpush2.bf16.msra.mxu1 %v7926_v29 }
 0x23e   :  { %887 = vmatprep.subr.bf16.mxu0 %v7927_v30  ;;  %928 = vmatprep.subr.bf16.mxu1 %v7929_v31 }
 0x241   :  { %888 = vmatpush2.bf16.msra.mxu0 %v7931_v32  ;;  %929 = vmatpush2.bf16.msra.mxu1 %v7932_v33 }
 0x242   :  { %889 = vmatprep.subr.bf16.mxu0 %v7933_v34  ;;  %930 = vmatprep.subr.bf16.mxu1 %v7935_v35 }
 0x245   :  { %890 = vmatpush2.bf16.msra.mxu0 %v7937_v36  ;;  %931 = vmatpush2.bf16.msra.mxu1 %v7938_v37 }
 0x246   :  { %891 = vmatprep.subr.bf16.mxu0 %v7939_v40  ;;  %932 = vmatprep.subr.bf16.mxu1 %v7941_v43 }
 0x249   :  { %892 = vmatpush2.bf16.msra.mxu0 %v7943_v44  ;;  %933 = vmatpush2.bf16.msra.mxu1 %v7944_v45 }
 0x24a   :  { %893 = vmatprep.subr.bf16.mxu0 %v7945_v46  ;;  %934 = vmatprep.subr.bf16.mxu1 %v7947_v47 }
 0x24d   :  { %894 = vmatpush2.bf16.msra.mxu0 %v7949_v48  ;;  %935 = vmatpush2.bf16.msra.mxu1 %v7950_v49 }
 0x250   :  { %896 = vmatmul.mubr.bf16.vlgmr.msra.gmra.mxu0 %v520_v50  ;;  %937 = vmatmul.mubr.bf16.vlgmr.msra.gmra.mxu1 %v520_v50 }
 0x310   :  { %v897_v56 = vpop.f32.mrf.mxu0  ;;  %v938_v57 = vpop.f32.mrf.mxu1 }
 0x311   :  { %v8943_v59 = vadd.f32 %v897_v56, %v526_v54  ;;  %v8945_v60 = vadd.f32 %v938_v57, %v534_v55 }
 0x312   :  { %v899_v61 = vpop.f32.mrf.mxu0  ;;  %v940_v62 = vpop.f32.mrf.mxu1 }
 0x313   :  { %v947_v63 = vrot.slane %v8943_v59, 4  ;;  %v975_v0 = vmul.f32 %v8943_v59, %v8943_v59  ;;  %v959_v1 = vrot.slane %v8945_v60, 4  ;;  %v977_v2 = vmul.f32 %v8945_v60, %v8945_v60 }
 0x314   :  { %v8953_v3 = vadd.f32 %v899_v61, %v530_v58  ;;  %v8955_v4 = vadd.f32 %v940_v62, %v538_v42  ;;  %v901_v5 = vpop.f32.mrf.mxu0  ;;  %v942_v6 = vpop.f32.mrf.mxu1 }
 0x315   :  { %v948_v7 = vadd.f32 %v947_v63, %v8943_v59  ;;  %v979_v8 = vrot.slane %v975_v0, 4  ;;  %v960_v9 = vadd.f32 %v959_v1, %v8945_v60  ;;  %v991_v10 = vrot.slane %v977_v2, 4 }
 0x316   :  { %v953_v11 = vrot.slane %v8953_v3, 4  ;;  %v976_v12 = vmul.f32 %v8953_v3, %v8953_v3  ;;  %v965_v13 = vrot.slane %v8955_v4, 4  ;;  %v978_v14 = vmul.f32 %v8955_v4, %v8955_v4  ;;  %v902_v15 = vpop.f32.mrf.mxu0  ;;  %v943_v16 = vpop.f32.mrf.mxu1 }
 0x317   :  { %v949_v17 = vrot.slane %v948_v7, 2  ;;  %v980_v18 = vadd.f32 %v979_v8, %v975_v0  ;;  %v961_v19 = vrot.slane %v960_v9, 2  ;;  %v992_v20 = vadd.f32 %v991_v10, %v977_v2 }
 0x318   :  { %v954_v21 = vadd.f32 %v953_v11, %v8953_v3  ;;  %v985_v22 = vrot.slane %v976_v12, 4  ;;  %v966_v23 = vadd.f32 %v965_v13, %v8955_v4  ;;  %v997_v24 = vrot.slane %v978_v14, 4 }
 0x319   :  { %v950_v25 = vadd.f32 %v949_v17, %v948_v7  ;;  %v981_v26 = vrot.slane %v980_v18, 2  ;;  %v962_v27 = vadd.f32 %v961_v19, %v960_v9  ;;  %v993_v28 = vrot.slane %v992_v20, 2 }
 0x31a   :  { %v955_v29 = vrot.slane %v954_v21, 2  ;;  %v986_v30 = vadd.f32 %v985_v22, %v976_v12  ;;  %v967_v31 = vrot.slane %v966_v23, 2  ;;  %v998_v32 = vadd.f32 %v997_v24, %v978_v14  ;;  %v945_v22 = vld [vmem:[#allocation12 + $0xb] sm:$0xf] }
 0x31b   :  { %v951_v33 = vrot.slane %v950_v25, 1  ;;  %v982_v34 = vadd.f32 %v981_v26, %v980_v18  ;;  %v963_v35 = vrot.slane %v962_v27, 1  ;;  %v994_v36 = vadd.f32 %v993_v28, %v992_v20 }
 0x31c   :  { %v956_v37 = vadd.f32 %v955_v29, %v954_v21  ;;  %v987_v40 = vrot.slane %v986_v30, 2  ;;  %v968_v43 = vadd.f32 %v967_v31, %v966_v23  ;;  %v999_v44 = vrot.slane %v998_v32, 2  ;;  %v946_v23 = vld [vmem:[#allocation12 + $0xf] sm:$0xf] }
 0x31d   :  { %v952_v45 = vadd.f32 %v951_v33, %v950_v25  ;;  %v983_v46 = vrot.slane %v982_v34, 1  ;;  %v964_v47 = vadd.f32 %v963_v35, %v962_v27  ;;  %v995_v48 = vrot.slane %v994_v36, 1 }
 0x31e   :  { %v957_v49 = vrot.slane %v956_v37, 1  ;;  %v988_v50 = vadd.f32 %v987_v40, %v986_v30  ;;  %v969_v52 = vrot.slane %v968_v43, 1  ;;  %v1000_v54 = vadd.f32 %v999_v44, %v998_v32 }
 0x31f   :  { %v971_v55 = vmul.f32 0.125, %v952_v45  ;;  %v984_v56 = vadd.f32 %v983_v46, %v982_v34  ;;  %v973_v57 = vmul.f32 0.125, %v964_v47  ;;  %v996_v58 = vadd.f32 %v995_v48, %v994_v36 }
 0x320   :  { %v958_v42 = vadd.f32 %v957_v49, %v956_v37  ;;  %v989_v61 = vrot.slane %v988_v50, 1  ;;  %v970_v62 = vadd.f32 %v969_v52, %v968_v43  ;;  %v1001_v63 = vrot.slane %v1000_v54, 1 }
 0x321   :  { %v1003_v0 = vmul.f32 0.125, %v984_v56  ;;  %v1007_v1 = vmul.f32 %v971_v55, %v971_v55  ;;  %v1005_v2 = vmul.f32 0.125, %v996_v58  ;;  %v1009_v5 = vmul.f32 %v973_v57, %v973_v57 }
 0x322   :  { %v972_v6 = vmul.f32 0.125, %v958_v42  ;;  %v990_v7 = vadd.f32 %v989_v61, %v988_v50  ;;  %v974_v9 = vmul.f32 0.125, %v970_v62  ;;  %v1002_v10 = vadd.f32 %v1001_v63, %v1000_v54 }
 0x323   :  { %v1011_v8 = vsub.f32 %v1003_v0, %v1007_v1  ;;  %v1013_v11 = vsub.f32 %v1005_v2, %v1009_v5  ;;  %v1015_v24 = vsub.f32 %v8943_v59, %v971_v55  ;;  %v1035_v25 = vrot.slane %v945_v22, %v8918_v39 }
 0x324   :  { %v1004_v12 = vmul.f32 0.125, %v990_v7  ;;  %v1008_v13 = vmul.f32 %v972_v6, %v972_v6  ;;  %v1006_v15 = vmul.f32 0.125, %v1002_v10  ;;  %v1010_v16 = vmul.f32 %v974_v9, %v974_v9 }
 0x325   :  { %v1019_v14 = vadd.f32 0.8, %v1011_v8  ;;  %v1021_v17 = vadd.f32 0.8, %v1013_v11  ;;  %v1017_v27 = vsub.f32 %v8945_v60, %v973_v57  ;;  %v1043_v28 = vrot.slane %v945_v22, %v8934_v51 }
 0x326   :  { %v1012_v18 = vsub.f32 %v1004_v12, %v1008_v13  ;;  %v1014_v19 = vsub.f32 %v1006_v15, %v1010_v16  ;;  %v1060_v31 = vrot.slane %v946_v23, %v8918_v39  ;;  %v1068_v33 = vrot.slane %v946_v23, %v8934_v51 }
 0x327   :  { %7951 = vrsqrt.f32 %v1019_v14  ;;  %v1016_v34 = vsub.f32 %v8953_v3, %v972_v6  ;;  %v1039_v35 = vrot.slane %v945_v22, %v8921_v41  ;;  %v1018_v37 = vsub.f32 %v8955_v4, %v974_v9 }
 0x328   :  { %7953 = vrsqrt.f32 %v1021_v17  ;;  %v1020_v20 = vadd.f32 0.8, %v1012_v18  ;;  %v1022_v21 = vadd.f32 0.8, %v1014_v19  ;;  %v1047_v40 = vrot.slane %v945_v22, %v8937_v53 }
 0x329   :  { %v1064_v45 = vrot.slane %v946_v23, %v8921_v41  ;;  %v1072_v48 = vrot.slane %v946_v23, %v8937_v53 }
 0x32a   :  { %7955 = vrsqrt.f32 %v1020_v20 }
 0x32b   :  { %7957 = vrsqrt.f32 %v1022_v21 }
 0x334   :  { %v7952_v26 = vpop.eup %7951 }
 0x335   :  { %v7954_v29 = vpop.eup %7953  ;;  %v1027_v30 = vmul.f32 %v7952_v26, %v1015_v24 }
 0x336   :  { %v1029_v32 = vmul.f32 %v7954_v29, %v1017_v27 }
 0x337   :  { %v7956_v36 = vpop.eup %7955  ;;  %v1052_v59 = vmul.f32 %v1035_v25, %v1027_v30 }
 0x338   :  { %v7958_v60 = vpop.eup %7957  ;;  %v1054_v43 = vmul.f32 %v1043_v28, %v1029_v32  ;;  %v1028_v44 = vmul.f32 %v7956_v36, %v1016_v34 }
 0x339   :  { %v1077_v46 = vadd.f32 %v1060_v31, %v1052_v59  ;;  %v1030_v47 = vmul.f32 %v7958_v60, %v1018_v37 }
 0x33a   :  { %v1079_v49 = vadd.f32 %v1068_v33, %v1054_v43  ;;  %v1053_v50 = vmul.f32 %v1039_v35, %v1028_v44 }
 0x33b   :  { %vm1081_vm4 = vcmp.gt.f32.partialorder %v1077_v46, 0.0  ;;  %v1085_v3 = vmul.f32 0.2, %v1077_v46  ;;  %v1055_v52 = vmul.f32 %v1047_v40, %v1030_v47 }
 0x33c   :  { %vm1083_vm5 = vcmp.gt.f32.partialorder %v1079_v49, 0.0  ;;  %v1087_v54 = vmul.f32 0.2, %v1079_v49  ;;  %v1078_v55 = vadd.f32 %v1064_v45, %v1053_v50 }
 0x33d   :  { %v8979_v4 = vsel %vm1081_vm4, %v1077_v46, %v1085_v3  ;;  %v1080_v56 = vadd.f32 %v1072_v48, %v1055_v52 }
 0x33e   :  { %v8981_v57 = vsel %vm1083_vm5, %v1079_v49, %v1087_v54  ;;  %vm1082_vm6 = vcmp.gt.f32.partialorder %v1078_v55, 0.0  ;;  %v1086_v58 = vmul.f32 0.2, %v1078_v55 }
 0x33f   :  { %vm1084_vm7 = vcmp.gt.f32.partialorder %v1080_v56, 0.0  ;;  %v1088_v42 = vmul.f32 0.2, %v1080_v56 }
 0x340   :  { %v1090_v61 = vsel %vm1082_vm6, %v1078_v55, %v1086_v58 }
 0x341   :  { %v1092_v62 = vsel %vm1084_vm7, %v1080_v56, %v1088_v42 }
 0x342   :  { %8820 = dma.done.wait [#allocation5 + $0x1], 32768 }
 0x343   :  { %8821 = vsyncadd [#allocation5 + $0x1], 4294934528  ;;  %v8983_v63 = vpack.c.bf16 %v1090_v61, %v1090_v61  ;;  %v8985_v0 = vpack.c.bf16 %v1092_v62, %v1092_v62  ;;  %v1167_v1 = vld [vmem:[#allocation3 + $0x1c0] sm:$0xff]  ;;  %s8842_s12 = smov [#allocation4 + $0x700]   ;;  %s1097_s1 = scalar_lea.hbm %s9212_s6, 28672 }
 0x344   :  { %v1171_v2 = vld [vmem:[#allocation3 + $0x1e0] sm:$0xff]  ;;  %s1107_s13 = sshll.u32 %s8842_s12, 4  ;;  %s1108_s13 = int_to_ptr.vmem [resolvable:$true] %s1107_s13 }
 0x345   :  { %2725 = vmatprep.mubr.bf16.mxu0 %v8983_v63  ;;  %2766 = vmatprep.mubr.bf16.mxu1 %v8985_v0  ;;  %v1295_v5 = vld [vmem:[#allocation3 + $0x5c0] sm:$0xff]  ;;  %v7035_v6 = vcombine.high %v1167_v1, %v1171_v2  ;;  %v7034_v8 = vcombine.low %v1167_v1, %v1171_v2  ;;  %s8779_s16 = scalar_lea.vmem %s1108_s13, 28672  ;;  %p8784_p8 = scmp.lt.s32.totalorder %s1108_s13, %s8902_s9 }
 0x346   :  { %v1299_v7 = vld [vmem:[#allocation3 + $0x5e0] sm:$0xff]  ;;  %p8780_p7 = scmp.ne.s32.totalorder %s1108_s13, %s8779_s16  ;;  %p8785_p9 = scmp.lt.s32.totalorder %s8761_s10, %s8779_s16 }
 0x347   :  { %v1159_v9 = vld [vmem:[#allocation3 + $0x180] sm:$0xff]  ;;  %v7163_v11 = vcombine.high %v1295_v5, %v1299_v7  ;;  %v7162_v12 = vcombine.low %v1295_v5, %v1299_v7  ;;  %2693 = vmatprep.subr.bf16.mxu0 %v7035_v6 }
 0x348   :  { %v1163_v10 = vld [vmem:[#allocation3 + $0x1a0] sm:$0xff]  ;;  %2694 = vmatpush1.bf16.msra.mxu0 %v7034_v8  ;;  %p8786_p10 = por %p8785_p9, %p8784_p8 }
 0x349   :  { %v7027_v13 = vcombine.high %v1159_v9, %v1163_v10  ;;  %v1287_v14 = vld [vmem:[#allocation3 + $0x580] sm:$0xff]  ;;  %2734 = vmatprep.subr.bf16.mxu1 %v7163_v11  ;;  %v7026_v21 = vcombine.low %v1159_v9, %v1163_v10 }
 0x34a   :  { %v1291_v15 = vld [vmem:[#allocation3 + $0x5a0] sm:$0xff]  ;;  %2735 = vmatpush1.bf16.msra.mxu1 %v7162_v12  ;;  %p8787_p11 = pnand %p8786_p10, %p8780_p7 }
 0x34b   :  { %v1151_v16 = vld [vmem:[#allocation3 + $0x140] sm:$0xff]  ;;  %v7155_v17 = vcombine.high %v1287_v14, %v1291_v15  ;;  %2695 = vmatprep.subr.bf16.mxu0 %v7027_v13  ;;  %v7154_v22 = vcombine.low %v1287_v14, %v1291_v15 }
 0x34c   :  { %v1155_v18 = vld [vmem:[#allocation3 + $0x160] sm:$0xff]  ;;  %2696 = vmatpush1.bf16.msra.mxu0 %v7026_v21 }
 0x34d   :  { %v1279_v19 = vld [vmem:[#allocation3 + $0x540] sm:$0xff]  ;;  %v7019_v23 = vcombine.high %v1151_v16, %v1155_v18  ;;  %2736 = vmatprep.subr.bf16.mxu1 %v7155_v17  ;;  %v7018_v29 = vcombine.low %v1151_v16, %v1155_v18 }
 0x34e   :  { %v1283_v20 = vld [vmem:[#allocation3 + $0x560] sm:$0xff]  ;;  %2737 = vmatpush1.bf16.msra.mxu1 %v7154_v22 }
 0x34f   :  { %v7147_v24 = vcombine.high %v1279_v19, %v1283_v20  ;;  %v1143_v25 = vld [vmem:[#allocation3 + $0x100] sm:$0xff]  ;;  %2697 = vmatprep.subr.bf16.mxu0 %v7019_v23  ;;  %v7146_v30 = vcombine.low %v1279_v19, %v1283_v20 }
 0x350   :  { %v1147_v26 = vld [vmem:[#allocation3 + $0x120] sm:$0xff]  ;;  %2698 = vmatpush1.bf16.msra.mxu0 %v7018_v29 }
 0x351   :  { %v1271_v27 = vld [vmem:[#allocation3 + $0x500] sm:$0xff]  ;;  %v7011_v31 = vcombine.high %v1143_v25, %v1147_v26  ;;  %2738 = vmatprep.subr.bf16.mxu1 %v7147_v24  ;;  %v7010_v59 = vcombine.low %v1143_v25, %v1147_v26 }
 0x352   :  { %v1275_v28 = vld [vmem:[#allocation3 + $0x520] sm:$0xff]  ;;  %2739 = vmatpush1.bf16.msra.mxu1 %v7146_v30 }
 0x353   :  { %v7139_v32 = vcombine.high %v1271_v27, %v1275_v28  ;;  %v1135_v33 = vld [vmem:[#allocation3 + $0xc0] sm:$0xff]  ;;  %2699 = vmatprep.subr.bf16.mxu0 %v7011_v31  ;;  %v7138_v37 = vcombine.low %v1271_v27, %v1275_v28 }
 0x354   :  { %v1139_v34 = vld [vmem:[#allocation3 + $0xe0] sm:$0xff]  ;;  %2700 = vmatpush1.bf16.msra.mxu0 %v7010_v59 }
 0x355   :  { %v1263_v35 = vld [vmem:[#allocation3 + $0x4c0] sm:$0xff]  ;;  %v7003_v40 = vcombine.high %v1135_v33, %v1139_v34  ;;  %2740 = vmatprep.subr.bf16.mxu1 %v7139_v32  ;;  %v7002_v47 = vcombine.low %v1135_v33, %v1139_v34 }
 0x356   :  { %v1267_v36 = vld [vmem:[#allocation3 + $0x4e0] sm:$0xff]  ;;  %2741 = vmatpush1.bf16.msra.mxu1 %v7138_v37 }
 0x357   :  { %v7131_v60 = vcombine.high %v1263_v35, %v1267_v36  ;;  %v1127_v43 = vld [vmem:[#allocation3 + $0x80] sm:$0xff]  ;;  %2701 = vmatprep.subr.bf16.mxu0 %v7003_v40  ;;  %v7130_v48 = vcombine.low %v1263_v35, %v1267_v36 }
 0x358   :  { %v1131_v44 = vld [vmem:[#allocation3 + $0xa0] sm:$0xff]  ;;  %2702 = vmatpush1.bf16.msra.mxu0 %v7002_v47 }
 0x359   :  { %v1255_v45 = vld [vmem:[#allocation3 + $0x480] sm:$0xff]  ;;  %v6995_v49 = vcombine.high %v1127_v43, %v1131_v44  ;;  %2742 = vmatprep.subr.bf16.mxu1 %v7131_v60  ;;  %v6994_v56 = vcombine.low %v1127_v43, %v1131_v44 }
 0x35a   :  { %v1259_v46 = vld [vmem:[#allocation3 + $0x4a0] sm:$0xff]  ;;  %2743 = vmatpush1.bf16.msra.mxu1 %v7130_v48 }
 0x35b   :  { %v7123_v50 = vcombine.high %v1255_v45, %v1259_v46  ;;  %v1119_v3 = vld [vmem:[#allocation3 + $0x40] sm:$0xff]  ;;  %2703 = vmatprep.subr.bf16.mxu0 %v6995_v49  ;;  %v7122_v58 = vcombine.low %v1255_v45, %v1259_v46 }
 0x35c   :  { %v1123_v52 = vld [vmem:[#allocation3 + $0x60] sm:$0xff]  ;;  %2704 = vmatpush1.bf16.msra.mxu0 %v6994_v56 }
 0x35d   :  { %v1247_v54 = vld [vmem:[#allocation3 + $0x440] sm:$0xff]  ;;  %v6987_v42 = vcombine.high %v1119_v3, %v1123_v52  ;;  %2744 = vmatprep.subr.bf16.mxu1 %v7123_v50  ;;  %v6986_v6 = vcombine.low %v1119_v3, %v1123_v52 }
 0x35e   :  { %v1251_v55 = vld [vmem:[#allocation3 + $0x460] sm:$0xff]  ;;  %2745 = vmatpush1.bf16.msra.mxu1 %v7122_v58 }
 0x35f   :  { %v7115_v61 = vcombine.high %v1247_v54, %v1251_v55  ;;  %v1111_v62 = vld [vmem:[#allocation3] sm:$0xff]  ;;  %2705 = vmatprep.subr.bf16.mxu0 %v6987_v42  ;;  %v7114_v7 = vcombine.low %v1247_v54, %v1251_v55 }
 0x360   :  { %v1115_v1 = vld [vmem:[#allocation3 + $0x20] sm:$0xff]  ;;  %2706 = vmatpush1.bf16.msra.mxu0 %v6986_v6 }
 0x361   :  { %v1239_v2 = vld [vmem:[#allocation3 + $0x400] sm:$0xff]  ;;  %v6979_v8 = vcombine.high %v1111_v62, %v1115_v1  ;;  %2746 = vmatprep.subr.bf16.mxu1 %v7115_v61  ;;  %v6978_v14 = vcombine.low %v1111_v62, %v1115_v1 }
 0x362   :  { %v1243_v5 = vld [vmem:[#allocation3 + $0x420] sm:$0xff]  ;;  %2747 = vmatpush1.bf16.msra.mxu1 %v7114_v7 }
 0x363   :  { %v7107_v9 = vcombine.high %v1239_v2, %v1243_v5  ;;  %v1231_v10 = vld [vmem:[#allocation3 + $0x3c0] sm:$0xff]  ;;  %2707 = vmatprep.subr.bf16.mxu0 %v6979_v8  ;;  %v7106_v15 = vcombine.low %v1239_v2, %v1243_v5 }
 0x364   :  { %v1235_v11 = vld [vmem:[#allocation3 + $0x3e0] sm:$0xff]  ;;  %2708 = vmatpush1.bf16.msra.mxu0 %v6978_v14 }
 0x365   :  { %v1359_v12 = vld [vmem:[#allocation3 + $0x7c0] sm:$0xff]  ;;  %v7099_v16 = vcombine.high %v1231_v10, %v1235_v11  ;;  %2748 = vmatprep.subr.bf16.mxu1 %v7107_v9  ;;  %v7098_v22 = vcombine.low %v1231_v10, %v1235_v11 }
 0x366   :  { %v1363_v13 = vld [vmem:[#allocation3 + $0x7e0] sm:$0xff]  ;;  %2749 = vmatpush1.bf16.msra.mxu1 %v7106_v15 }
 0x367   :  { %v7227_v17 = vcombine.high %v1359_v12, %v1363_v13  ;;  %v1223_v18 = vld [vmem:[#allocation3 + $0x380] sm:$0xff]  ;;  %2709 = vmatprep.subr.bf16.mxu0 %v7099_v16  ;;  %v7226_v23 = vcombine.low %v1359_v12, %v1363_v13 }
 0x368   :  { %v1227_v19 = vld [vmem:[#allocation3 + $0x3a0] sm:$0xff]  ;;  %2710 = vmatpush2.bf16.msra.mxu0 %v7098_v22  ;;  %v1300_v22 = vld [vmem:[#allocation3 + $0x5e8] sm:$0xff] }
 0x369   :  { %v1351_v20 = vld [vmem:[#allocation3 + $0x780] sm:$0xff]  ;;  %v7091_v24 = vcombine.high %v1223_v18, %v1227_v19  ;;  %2750 = vmatprep.subr.bf16.mxu1 %v7227_v17  ;;  %v7090_v30 = vcombine.low %v1223_v18, %v1227_v19  ;;  %v1168_v19 = vld [vmem:[#allocation3 + $0x1c8] sm:$0xff] }
 0x36a   :  { %v1355_v21 = vld [vmem:[#allocation3 + $0x7a0] sm:$0xff]  ;;  %2751 = vmatpush2.bf16.msra.mxu1 %v7226_v23 }
 0x36b   :  { %v7219_v25 = vcombine.high %v1351_v20, %v1355_v21  ;;  %v1215_v26 = vld [vmem:[#allocation3 + $0x340] sm:$0xff]  ;;  %2711 = vmatprep.subr.bf16.mxu0 %v7091_v24  ;;  %v7218_v31 = vcombine.low %v1351_v20, %v1355_v21  ;;  %v1172_v20 = vld [vmem:[#allocation3 + $0x1e8] sm:$0xff] }
 0x36c   :  { %v1219_v27 = vld [vmem:[#allocation3 + $0x360] sm:$0xff]  ;;  %2712 = vmatpush2.bf16.msra.mxu0 %v7090_v30  ;;  %v1296_v21 = vld [vmem:[#allocation3 + $0x5c8] sm:$0xff] }
 0x36d   :  { %v1343_v28 = vld [vmem:[#allocation3 + $0x740] sm:$0xff]  ;;  %v7083_v32 = vcombine.high %v1215_v26, %v1219_v27  ;;  %2752 = vmatprep.subr.bf16.mxu1 %v7219_v25  ;;  %v7082_v37 = vcombine.low %v1215_v26, %v1219_v27  ;;  %v7037_v25 = vcombine.high %v1168_v19, %v1172_v20  ;;  %v7165_v26 = vcombine.high %v1296_v21, %v1300_v22  ;;  %v1160_v27 = vld [vmem:[#allocation3 + $0x188] sm:$0xff] }
 0x36e   :  { %v1347_v29 = vld [vmem:[#allocation3 + $0x760] sm:$0xff]  ;;  %2753 = vmatpush2.bf16.msra.mxu1 %v7218_v31  ;;  %v1288_v30 = vld [vmem:[#allocation3 + $0x588] sm:$0xff] }
 0x36f   :  { %v7211_v33 = vcombine.high %v1343_v28, %v1347_v29  ;;  %v1207_v34 = vld [vmem:[#allocation3 + $0x300] sm:$0xff]  ;;  %2713 = vmatprep.subr.bf16.mxu0 %v7083_v32  ;;  %v7210_v40 = vcombine.low %v1343_v28, %v1347_v29  ;;  %v1164_v28 = vld [vmem:[#allocation3 + $0x1a8] sm:$0xff]  ;;  %v8991_v29 = vpack.c.bf16 %v8979_v4, %v8979_v4  ;;  %v8995_v32 = vpack.c.bf16 %v8981_v57, %v8981_v57 }
 0x370   :  { %v1211_v35 = vld [vmem:[#allocation3 + $0x320] sm:$0xff]  ;;  %2714 = vmatpush2.bf16.msra.mxu0 %v7082_v37  ;;  %v1292_v31 = vld [vmem:[#allocation3 + $0x5a8] sm:$0xff] }
 0x371   :  { %v1335_v36 = vld [vmem:[#allocation3 + $0x700] sm:$0xff]  ;;  %v7075_v60 = vcombine.high %v1207_v34, %v1211_v35  ;;  %2754 = vmatprep.subr.bf16.mxu1 %v7211_v33  ;;  %v7074_v48 = vcombine.low %v1207_v34, %v1211_v35  ;;  %v7036_v33 = vcombine.low %v1168_v19, %v1172_v20  ;;  %v7164_v34 = vcombine.low %v1296_v21, %v1300_v22  ;;  %v1156_v37 = vld [vmem:[#allocation3 + $0x168] sm:$0xff] }
 0x372   :  { %v1339_v59 = vld [vmem:[#allocation3 + $0x720] sm:$0xff]  ;;  %2755 = vmatpush2.bf16.msra.mxu1 %v7210_v40  ;;  %v7029_v35 = vcombine.high %v1160_v27, %v1164_v28  ;;  %v1280_v4 = vld [vmem:[#allocation3 + $0x548] sm:$0xff]  ;;  %v7156_v57 = vcombine.low %v1288_v30, %v1292_v31 }
 0x373   :  { %v7203_v43 = vcombine.high %v1335_v36, %v1339_v59  ;;  %v1199_v44 = vld [vmem:[#allocation3 + $0x2c0] sm:$0xff]  ;;  %2715 = vmatprep.subr.bf16.mxu0 %v7075_v60  ;;  %v7202_v49 = vcombine.low %v1335_v36, %v1339_v59  ;;  %v7157_v36 = vcombine.high %v1288_v30, %v1292_v31  ;;  %v1152_v59 = vld [vmem:[#allocation3 + $0x148] sm:$0xff]  ;;  %v7028_v60 = vcombine.low %v1160_v27, %v1164_v28 }
 0x374   :  { %v1203_v45 = vld [vmem:[#allocation3 + $0x2e0] sm:$0xff]  ;;  %2716 = vmatpush2.bf16.msra.mxu0 %v7074_v48  ;;  %v1284_v40 = vld [vmem:[#allocation3 + $0x568] sm:$0xff] }
 0x375   :  { %v1327_v46 = vld [vmem:[#allocation3 + $0x6c0] sm:$0xff]  ;;  %v7067_v50 = vcombine.high %v1199_v44, %v1203_v45  ;;  %2756 = vmatprep.subr.bf16.mxu1 %v7203_v43  ;;  %v7066_v58 = vcombine.low %v1199_v44, %v1203_v45  ;;  %v7021_v43 = vcombine.high %v1152_v59, %v1156_v37  ;;  %v7149_v44 = vcombine.high %v1280_v4, %v1284_v40  ;;  %v1144_v45 = vld [vmem:[#allocation3 + $0x108] sm:$0xff] }
 0x376   :  { %v1331_v47 = vld [vmem:[#allocation3 + $0x6e0] sm:$0xff]  ;;  %2757 = vmatpush2.bf16.msra.mxu1 %v7202_v49  ;;  %v1276_v48 = vld [vmem:[#allocation3 + $0x528] sm:$0xff]  ;;  %v7020_v49 = vcombine.low %v1152_v59, %v1156_v37 }
 0x377   :  { %v7195_v3 = vcombine.high %v1327_v46, %v1331_v47  ;;  %v1191_v52 = vld [vmem:[#allocation3 + $0x280] sm:$0xff]  ;;  %2717 = vmatprep.subr.bf16.mxu0 %v7067_v50  ;;  %v7194_v42 = vcombine.low %v1327_v46, %v1331_v47  ;;  %v1148_v46 = vld [vmem:[#allocation3 + $0x128] sm:$0xff]  ;;  %v7148_v50 = vcombine.low %v1280_v4, %v1284_v40 }
 0x378   :  { %v1195_v54 = vld [vmem:[#allocation3 + $0x2a0] sm:$0xff]  ;;  %2718 = vmatpush2.bf16.msra.mxu0 %v7066_v58  ;;  %v1272_v47 = vld [vmem:[#allocation3 + $0x508] sm:$0xff] }
 0x379   :  { %v1319_v55 = vld [vmem:[#allocation3 + $0x680] sm:$0xff]  ;;  %v7059_v61 = vcombine.high %v1191_v52, %v1195_v54  ;;  %2758 = vmatprep.subr.bf16.mxu1 %v7195_v3  ;;  %v7058_v7 = vcombine.low %v1191_v52, %v1195_v54  ;;  %v7013_v3 = vcombine.high %v1144_v45, %v1148_v46  ;;  %v7141_v52 = vcombine.high %v1272_v47, %v1276_v48  ;;  %v1136_v54 = vld [vmem:[#allocation3 + $0xc8] sm:$0xff] }
 0x37a   :  { %v1323_v56 = vld [vmem:[#allocation3 + $0x6a0] sm:$0xff]  ;;  %2759 = vmatpush2.bf16.msra.mxu1 %v7194_v42  ;;  %v1268_v58 = vld [vmem:[#allocation3 + $0x4e8] sm:$0xff]  ;;  %v7012_v42 = vcombine.low %v1144_v45, %v1148_v46 }
 0x37b   :  { %v7187_v62 = vcombine.high %v1319_v55, %v1323_v56  ;;  %v1183_v1 = vld [vmem:[#allocation3 + $0x240] sm:$0xff]  ;;  %2719 = vmatprep.subr.bf16.mxu0 %v7059_v61  ;;  %v7186_v8 = vcombine.low %v1319_v55, %v1323_v56  ;;  %v1140_v55 = vld [vmem:[#allocation3 + $0xe8] sm:$0xff]  ;;  %v7140_v61 = vcombine.low %v1272_v47, %v1276_v48 }
 0x37c   :  { %v1187_v2 = vld [vmem:[#allocation3 + $0x260] sm:$0xff]  ;;  %2720 = vmatpush2.bf16.msra.mxu0 %v7058_v7  ;;  %v1264_v56 = vld [vmem:[#allocation3 + $0x4c8] sm:$0xff] }
 0x37d   :  { %v1311_v5 = vld [vmem:[#allocation3 + $0x640] sm:$0xff]  ;;  %v7051_v9 = vcombine.high %v1183_v1, %v1187_v2  ;;  %2760 = vmatprep.subr.bf16.mxu1 %v7187_v62  ;;  %v7050_v15 = vcombine.low %v1183_v1, %v1187_v2  ;;  %v7005_v62 = vcombine.high %v1136_v54, %v1140_v55  ;;  %v7133_v1 = vcombine.high %v1264_v56, %v1268_v58  ;;  %v1128_v2 = vld [vmem:[#allocation3 + $0x88] sm:$0xff] }
 0x37e   :  { %v1315_v6 = vld [vmem:[#allocation3 + $0x660] sm:$0xff]  ;;  %2761 = vmatpush2.bf16.msra.mxu1 %v7186_v8  ;;  %v1260_v7 = vld [vmem:[#allocation3 + $0x4a8] sm:$0xff]  ;;  %v7004_v8 = vcombine.low %v1136_v54, %v1140_v55 }
 0x37f   :  { %v7179_v10 = vcombine.high %v1311_v5, %v1315_v6  ;;  %v1175_v11 = vld [vmem:[#allocation3 + $0x200] sm:$0xff]  ;;  %2721 = vmatprep.subr.bf16.mxu0 %v7051_v9  ;;  %v7178_v16 = vcombine.low %v1311_v5, %v1315_v6  ;;  %v1132_v5 = vld [vmem:[#allocation3 + $0xa8] sm:$0xff]  ;;  %v7132_v9 = vcombine.low %v1264_v56, %v1268_v58 }
 0x380   :  { %v1179_v12 = vld [vmem:[#allocation3 + $0x220] sm:$0xff]  ;;  %2722 = vmatpush2.bf16.msra.mxu0 %v7050_v15  ;;  %v1256_v6 = vld [vmem:[#allocation3 + $0x488] sm:$0xff] }
 0x381   :  { %v1303_v13 = vld [vmem:[#allocation3 + $0x600] sm:$0xff]  ;;  %v7043_v17 = vcombine.high %v1175_v11, %v1179_v12  ;;  %2762 = vmatprep.subr.bf16.mxu1 %v7179_v10  ;;  %v7042_v23 = vcombine.low %v1175_v11, %v1179_v12  ;;  %v6997_v10 = vcombine.high %v1128_v2, %v1132_v5  ;;  %v7125_v11 = vcombine.high %v1256_v6, %v1260_v7  ;;  %v1120_v12 = vld [vmem:[#allocation3 + $0x48] sm:$0xff] }
 0x382   :  { %v1307_v14 = vld [vmem:[#allocation3 + $0x620] sm:$0xff]  ;;  %2763 = vmatpush2.bf16.msra.mxu1 %v7178_v16  ;;  %v1252_v15 = vld [vmem:[#allocation3 + $0x468] sm:$0xff]  ;;  %v6996_v16 = vcombine.low %v1128_v2, %v1132_v5 }
 0x383   :  { %v7171_v18 = vcombine.high %v1303_v13, %v1307_v14  ;;  %2723 = vmatprep.subr.bf16.mxu0 %v7043_v17  ;;  %v7170_v24 = vcombine.low %v1303_v13, %v1307_v14  ;;  %v1124_v13 = vld [vmem:[#allocation3 + $0x68] sm:$0xff]  ;;  %v7124_v17 = vcombine.low %v1256_v6, %v1260_v7 }
 0x384   :  { %2724 = vmatpush2.bf16.msra.mxu0 %v7042_v23  ;;  %v1248_v14 = vld [vmem:[#allocation3 + $0x448] sm:$0xff] }
 0x385   :  { %2764 = vmatprep.subr.bf16.mxu1 %v7171_v18  ;;  %2775 = vmatprep.subr.bf16.mxu0 %v7037_v25  ;;  %v6989_v18 = vcombine.high %v1120_v12, %v1124_v13  ;;  %v7117_v19 = vcombine.high %v1248_v14, %v1252_v15  ;;  %v1112_v20 = vld [vmem:[#allocation3 + $0x8] sm:$0xff]  ;;  %v7116_v25 = vcombine.low %v1248_v14, %v1252_v15 }
 0x386   :  { %2765 = vmatpush2.bf16.msra.mxu1 %v7170_v24  ;;  %v1116_v21 = vld [vmem:[#allocation3 + $0x28] sm:$0xff]  ;;  %v6988_v24 = vcombine.low %v1120_v12, %v1124_v13 }
 0x387   :  { %2816 = vmatprep.subr.bf16.mxu1 %v7165_v26  ;;  %2726 = vmatmul.mubr.bf16.vlgmr.msra.gmra.mxu0 %v8991_v29  ;;  %v1240_v22 = vld [vmem:[#allocation3 + $0x408] sm:$0xff]  ;;  %v6981_v26 = vcombine.high %v1112_v20, %v1116_v21 }
 0x388   :  { %2776 = vmatpush1.bf16.msra.mxu0 %v7036_v33  ;;  %2807 = vmatprep.mubr.bf16.mxu0 %v8983_v63  ;;  %v1244_v23 = vld [vmem:[#allocation3 + $0x428] sm:$0xff] }
 0x389   :  { %2767 = vmatmul.mubr.bf16.vlgmr.msra.gmra.mxu1 %v8995_v32  ;;  %2777 = vmatprep.subr.bf16.mxu0 %v7029_v35  ;;  %v7109_v27 = vcombine.high %v1240_v22, %v1244_v23  ;;  %v1232_v28 = vld [vmem:[#allocation3 + $0x3c8] sm:$0xff]  ;;  %v7108_v35 = vcombine.low %v1240_v22, %v1244_v23 }
 0x38a   :  { %2817 = vmatpush1.bf16.msra.mxu1 %v7164_v34  ;;  %2848 = vmatprep.mubr.bf16.mxu1 %v8985_v0  ;;  %v1236_v30 = vld [vmem:[#allocation3 + $0x3e8] sm:$0xff]  ;;  %v6980_v34 = vcombine.low %v1112_v20, %v1116_v21 }
 0x38b   :  { %2818 = vmatprep.subr.bf16.mxu1 %v7157_v36  ;;  %v1360_v31 = vld [vmem:[#allocation3 + $0x7c8] sm:$0xff]  ;;  %v7101_v36 = vcombine.high %v1232_v28, %v1236_v30 }
 0x38c   :  { %2778 = vmatpush1.bf16.msra.mxu0 %v7028_v60  ;;  %v1364_v33 = vld [vmem:[#allocation3 + $0x7e8] sm:$0xff] }
 0x38d   :  { %2779 = vmatprep.subr.bf16.mxu0 %v7021_v43  ;;  %v7229_v59 = vcombine.high %v1360_v31, %v1364_v33  ;;  %v1224_v37 = vld [vmem:[#allocation3 + $0x388] sm:$0xff]  ;;  %v7228_v43 = vcombine.low %v1360_v31, %v1364_v33 }
 0x38e   :  { %2819 = vmatpush1.bf16.msra.mxu1 %v7156_v57  ;;  %v1228_v4 = vld [vmem:[#allocation3 + $0x3a8] sm:$0xff]  ;;  %v7100_v57 = vcombine.low %v1232_v28, %v1236_v30 }
 0x38f   :  { %2820 = vmatprep.subr.bf16.mxu1 %v7149_v44  ;;  %v1352_v40 = vld [vmem:[#allocation3 + $0x788] sm:$0xff]  ;;  %v7093_v44 = vcombine.high %v1224_v37, %v1228_v4 }
 0x390   :  { %2780 = vmatpush1.bf16.msra.mxu0 %v7020_v49  ;;  %v1356_v60 = vld [vmem:[#allocation3 + $0x7a8] sm:$0xff] }
 0x391   :  { %2781 = vmatprep.subr.bf16.mxu0 %v7013_v3  ;;  %v7221_v45 = vcombine.high %v1352_v40, %v1356_v60  ;;  %v1216_v46 = vld [vmem:[#allocation3 + $0x348] sm:$0xff]  ;;  %v7220_v3 = vcombine.low %v1352_v40, %v1356_v60  ;;  %v1173_v40 = vld [vmem:[#allocation3 + $0x1f0] sm:$0xff] }
 0x392   :  { %2821 = vmatpush1.bf16.msra.mxu1 %v7148_v50  ;;  %v1220_v47 = vld [vmem:[#allocation3 + $0x368] sm:$0xff]  ;;  %v7092_v50 = vcombine.low %v1224_v37, %v1228_v4  ;;  %v1169_v4 = vld [vmem:[#allocation3 + $0x1d0] sm:$0xff] }
 0x393   :  { %2822 = vmatprep.subr.bf16.mxu1 %v7141_v52  ;;  %v1344_v48 = vld [vmem:[#allocation3 + $0x748] sm:$0xff]  ;;  %v7085_v52 = vcombine.high %v1216_v46, %v1220_v47  ;;  %v1297_v60 = vld [vmem:[#allocation3 + $0x5d0] sm:$0xff] }
 0x394   :  { %2782 = vmatpush1.bf16.msra.mxu0 %v7012_v42  ;;  %v1348_v49 = vld [vmem:[#allocation3 + $0x768] sm:$0xff] }
 0x395   :  { %2783 = vmatprep.subr.bf16.mxu0 %v7005_v62  ;;  %v7213_v54 = vcombine.high %v1344_v48, %v1348_v49  ;;  %v1208_v55 = vld [vmem:[#allocation3 + $0x308] sm:$0xff]  ;;  %v7212_v62 = vcombine.low %v1344_v48, %v1348_v49  ;;  %v1165_v48 = vld [vmem:[#allocation3 + $0x1b0] sm:$0xff] }
 0x396   :  { %2823 = vmatpush1.bf16.msra.mxu1 %v7140_v61  ;;  %v1212_v56 = vld [vmem:[#allocation3 + $0x328] sm:$0xff]  ;;  %v7084_v61 = vcombine.low %v1216_v46, %v1220_v47  ;;  %v1161_v47 = vld [vmem:[#allocation3 + $0x190] sm:$0xff] }
 0x397   :  { %2824 = vmatprep.subr.bf16.mxu1 %v7133_v1  ;;  %v1336_v58 = vld [vmem:[#allocation3 + $0x708] sm:$0xff]  ;;  %v7077_v1 = vcombine.high %v1208_v55, %v1212_v56  ;;  %v1289_v49 = vld [vmem:[#allocation3 + $0x590] sm:$0xff] }
 0x398   :  { %2784 = vmatpush1.bf16.msra.mxu0 %v7004_v8  ;;  %v1340_v42 = vld [vmem:[#allocation3 + $0x728] sm:$0xff] }
 0x399   :  { %2785 = vmatprep.subr.bf16.mxu0 %v6997_v10  ;;  %v7205_v2 = vcombine.high %v1336_v58, %v1340_v42  ;;  %v1200_v5 = vld [vmem:[#allocation3 + $0x2c8] sm:$0xff]  ;;  %v7204_v10 = vcombine.low %v1336_v58, %v1340_v42  ;;  %v1157_v58 = vld [vmem:[#allocation3 + $0x170] sm:$0xff] }
 0x39a   :  { %2825 = vmatpush1.bf16.msra.mxu1 %v7132_v9  ;;  %v1204_v6 = vld [vmem:[#allocation3 + $0x2e8] sm:$0xff]  ;;  %v7076_v9 = vcombine.low %v1208_v55, %v1212_v56  ;;  %v1153_v56 = vld [vmem:[#allocation3 + $0x150] sm:$0xff] }
 0x39b   :  { %2826 = vmatprep.subr.bf16.mxu1 %v7125_v11  ;;  %v1328_v7 = vld [vmem:[#allocation3 + $0x6c8] sm:$0xff]  ;;  %v7069_v11 = vcombine.high %v1200_v5, %v1204_v6  ;;  %v1281_v42 = vld [vmem:[#allocation3 + $0x550] sm:$0xff] }
 0x39c   :  { %2786 = vmatpush1.bf16.msra.mxu0 %v6996_v16  ;;  %v1332_v8 = vld [vmem:[#allocation3 + $0x6e8] sm:$0xff] }
 0x39d   :  { %2787 = vmatprep.subr.bf16.mxu0 %v6989_v18  ;;  %v7197_v12 = vcombine.high %v1328_v7, %v1332_v8  ;;  %v1192_v13 = vld [vmem:[#allocation3 + $0x288] sm:$0xff]  ;;  %v7196_v18 = vcombine.low %v1328_v7, %v1332_v8  ;;  %v1149_v7 = vld [vmem:[#allocation3 + $0x130] sm:$0xff] }
 0x39e   :  { %2827 = vmatpush1.bf16.msra.mxu1 %v7124_v17  ;;  %v1196_v14 = vld [vmem:[#allocation3 + $0x2a8] sm:$0xff]  ;;  %v7068_v17 = vcombine.low %v1200_v5, %v1204_v6  ;;  %v1145_v6 = vld [vmem:[#allocation3 + $0x110] sm:$0xff] }
 0x39f   :  { %2828 = vmatprep.subr.bf16.mxu1 %v7117_v19  ;;  %v1320_v15 = vld [vmem:[#allocation3 + $0x688] sm:$0xff]  ;;  %v7061_v19 = vcombine.high %v1192_v13, %v1196_v14  ;;  %v1273_v8 = vld [vmem:[#allocation3 + $0x510] sm:$0xff] }
 0x3a0   :  { %2788 = vmatpush1.bf16.msra.mxu0 %v6988_v24  ;;  %v1324_v16 = vld [vmem:[#allocation3 + $0x6a8] sm:$0xff] }
 0x3a1   :  { %2789 = vmatprep.subr.bf16.mxu0 %v6981_v26  ;;  %v7189_v20 = vcombine.high %v1320_v15, %v1324_v16  ;;  %v1184_v21 = vld [vmem:[#allocation3 + $0x248] sm:$0xff]  ;;  %v7188_v26 = vcombine.low %v1320_v15, %v1324_v16  ;;  %v1141_v15 = vld [vmem:[#allocation3 + $0xf0] sm:$0xff] }
 0x3a2   :  { %2829 = vmatpush1.bf16.msra.mxu1 %v7116_v25  ;;  %v1188_v22 = vld [vmem:[#allocation3 + $0x268] sm:$0xff]  ;;  %v7060_v25 = vcombine.low %v1192_v13, %v1196_v14  ;;  %v1137_v14 = vld [vmem:[#allocation3 + $0xd0] sm:$0xff] }
 0x3a3   :  { %2830 = vmatprep.subr.bf16.mxu1 %v7109_v27  ;;  %v1312_v23 = vld [vmem:[#allocation3 + $0x648] sm:$0xff]  ;;  %v7053_v27 = vcombine.high %v1184_v21, %v1188_v22  ;;  %v1265_v16 = vld [vmem:[#allocation3 + $0x4d0] sm:$0xff] }
 0x3a4   :  { %2790 = vmatpush1.bf16.msra.mxu0 %v6980_v34  ;;  %v1316_v24 = vld [vmem:[#allocation3 + $0x668] sm:$0xff] }
 0x3a5   :  { %2791 = vmatprep.subr.bf16.mxu0 %v7101_v36  ;;  %v7181_v28 = vcombine.high %v1312_v23, %v1316_v24  ;;  %v1176_v30 = vld [vmem:[#allocation3 + $0x208] sm:$0xff]  ;;  %v7180_v36 = vcombine.low %v1312_v23, %v1316_v24  ;;  %v1133_v23 = vld [vmem:[#allocation3 + $0xb0] sm:$0xff] }
 0x3a6   :  { %2831 = vmatpush1.bf16.msra.mxu1 %v7108_v35  ;;  %v1180_v31 = vld [vmem:[#allocation3 + $0x228] sm:$0xff]  ;;  %v7052_v35 = vcombine.low %v1184_v21, %v1188_v22  ;;  %v1129_v22 = vld [vmem:[#allocation3 + $0x90] sm:$0xff] }
 0x3a7   :  { %2832 = vmatprep.subr.bf16.mxu1 %v7229_v59  ;;  %v1304_v33 = vld [vmem:[#allocation3 + $0x608] sm:$0xff]  ;;  %v7045_v59 = vcombine.high %v1176_v30, %v1180_v31  ;;  %v1257_v24 = vld [vmem:[#allocation3 + $0x490] sm:$0xff] }
 0x3a8   :  { %2792 = vmatpush2.bf16.msra.mxu0 %v7100_v57  ;;  %v1308_v34 = vld [vmem:[#allocation3 + $0x628] sm:$0xff]  ;;  %v1301_v57 = vld [vmem:[#allocation3 + $0x5f0] sm:$0xff] }
 0x3a9   :  { %2793 = vmatprep.subr.bf16.mxu0 %v7093_v44  ;;  %v7173_v37 = vcombine.high %v1304_v33, %v1308_v34  ;;  %v7172_v44 = vcombine.low %v1304_v33, %v1308_v34  ;;  %v7167_v46 = vcombine.high %v1297_v60, %v1301_v57  ;;  %v1125_v33 = vld [vmem:[#allocation3 + $0x70] sm:$0xff] }
 0x3aa   :  { %2833 = vmatpush2.bf16.msra.mxu1 %v7228_v43  ;;  %v7044_v43 = vcombine.low %v1176_v30, %v1180_v31  ;;  %v1121_v31 = vld [vmem:[#allocation3 + $0x50] sm:$0xff] }
 0x3ab   :  { %2834 = vmatprep.subr.bf16.mxu1 %v7221_v45  ;;  %v7039_v45 = vcombine.high %v1169_v4, %v1173_v40  ;;  %v1249_v34 = vld [vmem:[#allocation3 + $0x450] sm:$0xff] }
 0x3ac   :  { %2794 = vmatpush2.bf16.msra.mxu0 %v7092_v50  ;;  %v1293_v50 = vld [vmem:[#allocation3 + $0x5b0] sm:$0xff] }
 0x3ad   :  { %2795 = vmatprep.subr.bf16.mxu0 %v7085_v52  ;;  %v7166_v52 = vcombine.low %v1297_v60, %v1301_v57  ;;  %v7159_v55 = vcombine.high %v1289_v49, %v1293_v50  ;;  %v1117_v60 = vld [vmem:[#allocation3 + $0x30] sm:$0xff] }
 0x3ae   :  { %2835 = vmatpush2.bf16.msra.mxu1 %v7220_v3  ;;  %v7038_v3 = vcombine.low %v1169_v4, %v1173_v40  ;;  %v1113_v40 = vld [vmem:[#allocation3 + $0x10] sm:$0xff] }
 0x3af   :  { %2836 = vmatprep.subr.bf16.mxu1 %v7213_v54  ;;  %v7031_v54 = vcombine.high %v1161_v47, %v1165_v48  ;;  %v1241_v57 = vld [vmem:[#allocation3 + $0x410] sm:$0xff] }
 0x3b0   :  { %2796 = vmatpush2.bf16.msra.mxu0 %v7084_v61  ;;  %v1285_v61 = vld [vmem:[#allocation3 + $0x570] sm:$0xff] }
 0x3b1   :  { %2797 = vmatprep.subr.bf16.mxu0 %v7077_v1  ;;  %v7158_v1 = vcombine.low %v1289_v49, %v1293_v50  ;;  %v7151_v5 = vcombine.high %v1281_v42, %v1285_v61  ;;  %v1237_v49 = vld [vmem:[#allocation3 + $0x3f0] sm:$0xff] }
 0x3b2   :  { %2837 = vmatpush2.bf16.msra.mxu1 %v7212_v62  ;;  %v7030_v62 = vcombine.low %v1161_v47, %v1165_v48  ;;  %v1233_v48 = vld [vmem:[#allocation3 + $0x3d0] sm:$0xff] }
 0x3b3   :  { %2838 = vmatprep.subr.bf16.mxu1 %v7205_v2  ;;  %v7023_v2 = vcombine.high %v1153_v56, %v1157_v58  ;;  %v1361_v50 = vld [vmem:[#allocation3 + $0x7d0] sm:$0xff] }
 0x3b4   :  { %2798 = vmatpush2.bf16.msra.mxu0 %v7076_v9  ;;  %v1277_v9 = vld [vmem:[#allocation3 + $0x530] sm:$0xff] }
 0x3b5   :  { %2799 = vmatprep.subr.bf16.mxu0 %v7069_v11  ;;  %v7150_v11 = vcombine.low %v1281_v42, %v1285_v61  ;;  %v7143_v13 = vcombine.high %v1273_v8, %v1277_v9  ;;  %v1229_v42 = vld [vmem:[#allocation3 + $0x3b0] sm:$0xff] }
 0x3b6   :  { %2839 = vmatpush2.bf16.msra.mxu1 %v7204_v10  ;;  %v7022_v10 = vcombine.low %v1153_v56, %v1157_v58  ;;  %v1225_v58 = vld [vmem:[#allocation3 + $0x390] sm:$0xff] }
 0x3b7   :  { %2840 = vmatprep.subr.bf16.mxu1 %v7197_v12  ;;  %v7015_v12 = vcombine.high %v1145_v6, %v1149_v7  ;;  %v1353_v61 = vld [vmem:[#allocation3 + $0x790] sm:$0xff] }
 0x3b8   :  { %2800 = vmatpush2.bf16.msra.mxu0 %v7068_v17  ;;  %v1269_v17 = vld [vmem:[#allocation3 + $0x4f0] sm:$0xff] }
 0x3b9   :  { %2801 = vmatprep.subr.bf16.mxu0 %v7061_v19  ;;  %v7142_v19 = vcombine.low %v1273_v8, %v1277_v9  ;;  %v7135_v21 = vcombine.high %v1265_v16, %v1269_v17  ;;  %v1221_v8 = vld [vmem:[#allocation3 + $0x370] sm:$0xff] }
 0x3ba   :  { %2841 = vmatpush2.bf16.msra.mxu1 %v7196_v18  ;;  %v7014_v18 = vcombine.low %v1145_v6, %v1149_v7  ;;  %v1217_v7 = vld [vmem:[#allocation3 + $0x350] sm:$0xff] }
 0x3bb   :  { %2842 = vmatprep.subr.bf16.mxu1 %v7189_v20  ;;  %v7007_v20 = vcombine.high %v1137_v14, %v1141_v15  ;;  %v1345_v9 = vld [vmem:[#allocation3 + $0x750] sm:$0xff] }
 0x3bc   :  { %2802 = vmatpush2.bf16.msra.mxu0 %v7060_v25  ;;  %v1261_v25 = vld [vmem:[#allocation3 + $0x4b0] sm:$0xff] }
 0x3bd   :  { %2803 = vmatprep.subr.bf16.mxu0 %v7053_v27  ;;  %v7134_v27 = vcombine.low %v1265_v16, %v1269_v17  ;;  %v7127_v30 = vcombine.high %v1257_v24, %v1261_v25  ;;  %v1213_v16 = vld [vmem:[#allocation3 + $0x330] sm:$0xff] }
 0x3be   :  { %2843 = vmatpush2.bf16.msra.mxu1 %v7188_v26  ;;  %v7006_v26 = vcombine.low %v1137_v14, %v1141_v15  ;;  %v1209_v15 = vld [vmem:[#allocation3 + $0x310] sm:$0xff] }
 0x3bf   :  { %2844 = vmatprep.subr.bf16.mxu1 %v7181_v28  ;;  %v6999_v28 = vcombine.high %v1129_v22, %v1133_v23  ;;  %v1337_v17 = vld [vmem:[#allocation3 + $0x710] sm:$0xff] }
 0x3c0   :  { %2804 = vmatpush2.bf16.msra.mxu0 %v7052_v35  ;;  %v1253_v35 = vld [vmem:[#allocation3 + $0x470] sm:$0xff] }
 0x3c1   :  { %2805 = vmatprep.subr.bf16.mxu0 %v7045_v59  ;;  %v7126_v59 = vcombine.low %v1257_v24, %v1261_v25  ;;  %v7119_v4 = vcombine.high %v1249_v34, %v1253_v35  ;;  %v1205_v24 = vld [vmem:[#allocation3 + $0x2f0] sm:$0xff] }
 0x3c2   :  { %2845 = vmatpush2.bf16.msra.mxu1 %v7180_v36  ;;  %v6998_v36 = vcombine.low %v1129_v22, %v1133_v23  ;;  %v1201_v23 = vld [vmem:[#allocation3 + $0x2d0] sm:$0xff] }
 0x3c3   :  { %2846 = vmatprep.subr.bf16.mxu1 %v7173_v37  ;;  %v6991_v37 = vcombine.high %v1121_v31, %v1125_v33  ;;  %v1329_v25 = vld [vmem:[#allocation3 + $0x6d0] sm:$0xff] }
 0x3c4   :  { %2806 = vmatpush2.bf16.msra.mxu0 %v7044_v43  ;;  %v1245_v43 = vld [vmem:[#allocation3 + $0x430] sm:$0xff] }
 0x3c5   :  { %2857 = vmatprep.subr.bf16.mxu0 %v7039_v45  ;;  %v7118_v45 = vcombine.low %v1249_v34, %v1253_v35  ;;  %v7111_v47 = vcombine.high %v1241_v57, %v1245_v43  ;;  %v1197_v34 = vld [vmem:[#allocation3 + $0x2b0] sm:$0xff] }
 0x3c6   :  { %2847 = vmatpush2.bf16.msra.mxu1 %v7172_v44  ;;  %v6990_v44 = vcombine.low %v1121_v31, %v1125_v33  ;;  %v1193_v33 = vld [vmem:[#allocation3 + $0x290] sm:$0xff] }
 0x3c7   :  { %2898 = vmatprep.subr.bf16.mxu1 %v7167_v46  ;;  %2808 = vmatmul.mubr.bf16.vlgmr.msra.gmra.mxu0 %v8991_v29  ;;  %v6983_v46 = vcombine.high %v1113_v40, %v1117_v60  ;;  %v1321_v35 = vld [vmem:[#allocation3 + $0x690] sm:$0xff] }
 0x3c8   :  { %2858 = vmatpush1.bf16.msra.mxu0 %v7038_v3  ;;  %2889 = vmatprep.mubr.bf16.mxu0 %v8983_v63  ;;  %v1365_v3 = vld [vmem:[#allocation3 + $0x7f0] sm:$0xff] }
 0x3c9   :  { %2849 = vmatmul.mubr.bf16.vlgmr.msra.gmra.mxu1 %v8995_v32  ;;  %2859 = vmatprep.subr.bf16.mxu0 %v7031_v54  ;;  %v7110_v54 = vcombine.low %v1241_v57, %v1245_v43  ;;  %v7231_v56 = vcombine.high %v1361_v50, %v1365_v3  ;;  %v1189_v57 = vld [vmem:[#allocation3 + $0x270] sm:$0xff] }
 0x3ca   :  { %2899 = vmatpush1.bf16.msra.mxu1 %v7166_v52  ;;  %2930 = vmatprep.mubr.bf16.mxu1 %v8985_v0  ;;  %v6982_v52 = vcombine.low %v1113_v40, %v1117_v60  ;;  %v1185_v60 = vld [vmem:[#allocation3 + $0x250] sm:$0xff] }
 0x3cb   :  { %2900 = vmatprep.subr.bf16.mxu1 %v7159_v55  ;;  %v7103_v55 = vcombine.high %v1233_v48, %v1237_v49  ;;  %v1313_v43 = vld [vmem:[#allocation3 + $0x650] sm:$0xff] }
 0x3cc   :  { %2860 = vmatpush1.bf16.msra.mxu0 %v7030_v62  ;;  %v1357_v62 = vld [vmem:[#allocation3 + $0x7b0] sm:$0xff] }
 0x3cd   :  { %2861 = vmatprep.subr.bf16.mxu0 %v7023_v2  ;;  %v7230_v2 = vcombine.low %v1361_v50, %v1365_v3  ;;  %v7223_v6 = vcombine.high %v1353_v61, %v1357_v62  ;;  %v1181_v50 = vld [vmem:[#allocation3 + $0x230] sm:$0xff] }
 0x3ce   :  { %2901 = vmatpush1.bf16.msra.mxu1 %v7158_v1  ;;  %v7102_v1 = vcombine.low %v1233_v48, %v1237_v49  ;;  %v1177_v49 = vld [vmem:[#allocation3 + $0x210] sm:$0xff] }
 0x3cf   :  { %2902 = vmatprep.subr.bf16.mxu1 %v7151_v5  ;;  %v7095_v5 = vcombine.high %v1225_v58, %v1229_v42  ;;  %v1305_v3 = vld [vmem:[#allocation3 + $0x610] sm:$0xff] }
 0x3d0   :  { %2862 = vmatpush1.bf16.msra.mxu0 %v7022_v10  ;;  %v1349_v10 = vld [vmem:[#allocation3 + $0x770] sm:$0xff] }
 0x3d1   :  { %2863 = vmatprep.subr.bf16.mxu0 %v7015_v12  ;;  %v7222_v12 = vcombine.low %v1353_v61, %v1357_v62  ;;  %v7215_v14 = vcombine.high %v1345_v9, %v1349_v10  ;;  %v1174_v61 = vld [vmem:[#allocation3 + $0x1f8] sm:$0xff] }
 0x3d2   :  { %2903 = vmatpush1.bf16.msra.mxu1 %v7150_v11  ;;  %v7094_v11 = vcombine.low %v1225_v58, %v1229_v42  ;;  %v1170_v42 = vld [vmem:[#allocation3 + $0x1d8] sm:$0xff] }
 0x3d3   :  { %2904 = vmatprep.subr.bf16.mxu1 %v7143_v13  ;;  %v7087_v13 = vcombine.high %v1217_v7, %v1221_v8  ;;  %v1298_v62 = vld [vmem:[#allocation3 + $0x5d8] sm:$0xff] }
 0x3d4   :  { %2864 = vmatpush1.bf16.msra.mxu0 %v7014_v18  ;;  %v1341_v18 = vld [vmem:[#allocation3 + $0x730] sm:$0xff] }
 0x3d5   :  { %2865 = vmatprep.subr.bf16.mxu0 %v7007_v20  ;;  %v7214_v20 = vcombine.low %v1345_v9, %v1349_v10  ;;  %v7207_v22 = vcombine.high %v1337_v17, %v1341_v18  ;;  %v1166_v9 = vld [vmem:[#allocation3 + $0x1b8] sm:$0xff] }
 0x3d6   :  { %2905 = vmatpush1.bf16.msra.mxu1 %v7142_v19  ;;  %v7086_v19 = vcombine.low %v1217_v7, %v1221_v8  ;;  %v1162_v8 = vld [vmem:[#allocation3 + $0x198] sm:$0xff] }
 0x3d7   :  { %2906 = vmatprep.subr.bf16.mxu1 %v7135_v21  ;;  %v7079_v21 = vcombine.high %v1209_v15, %v1213_v16  ;;  %v1290_v10 = vld [vmem:[#allocation3 + $0x598] sm:$0xff] }
 0x3d8   :  { %2866 = vmatpush1.bf16.msra.mxu0 %v7006_v26  ;;  %v1333_v26 = vld [vmem:[#allocation3 + $0x6f0] sm:$0xff] }
 0x3d9   :  { %2867 = vmatprep.subr.bf16.mxu0 %v6999_v28  ;;  %v7206_v28 = vcombine.low %v1337_v17, %v1341_v18  ;;  %v7199_v31 = vcombine.high %v1329_v25, %v1333_v26  ;;  %v1158_v17 = vld [vmem:[#allocation3 + $0x178] sm:$0xff] }
 0x3da   :  { %2907 = vmatpush1.bf16.msra.mxu1 %v7134_v27  ;;  %v7078_v27 = vcombine.low %v1209_v15, %v1213_v16  ;;  %v1154_v16 = vld [vmem:[#allocation3 + $0x158] sm:$0xff] }
 0x3db   :  { %2908 = vmatprep.subr.bf16.mxu1 %v7127_v30  ;;  %v7071_v30 = vcombine.high %v1201_v23, %v1205_v24  ;;  %v1282_v18 = vld [vmem:[#allocation3 + $0x558] sm:$0xff] }
 0x3dc   :  { %2868 = vmatpush1.bf16.msra.mxu0 %v6998_v36  ;;  %v1325_v36 = vld [vmem:[#allocation3 + $0x6b0] sm:$0xff] }
 0x3dd   :  { %2869 = vmatprep.subr.bf16.mxu0 %v6991_v37  ;;  %v7198_v37 = vcombine.low %v1329_v25, %v1333_v26  ;;  %v7191_v40 = vcombine.high %v1321_v35, %v1325_v36  ;;  %v1150_v25 = vld [vmem:[#allocation3 + $0x138] sm:$0xff] }
 0x3de   :  { %2909 = vmatpush1.bf16.msra.mxu1 %v7126_v59  ;;  %v7070_v59 = vcombine.low %v1201_v23, %v1205_v24  ;;  %v1146_v24 = vld [vmem:[#allocation3 + $0x118] sm:$0xff] }
 0x3df   :  { %2910 = vmatprep.subr.bf16.mxu1 %v7119_v4  ;;  %v7063_v4 = vcombine.high %v1193_v33, %v1197_v34  ;;  %v1274_v26 = vld [vmem:[#allocation3 + $0x518] sm:$0xff] }
 0x3e0   :  { %2870 = vmatpush1.bf16.msra.mxu0 %v6990_v44  ;;  %v1317_v44 = vld [vmem:[#allocation3 + $0x670] sm:$0xff] }
 0x3e1   :  { %2871 = vmatprep.subr.bf16.mxu0 %v6983_v46  ;;  %v7190_v46 = vcombine.low %v1321_v35, %v1325_v36  ;;  %v7183_v48 = vcombine.high %v1313_v43, %v1317_v44  ;;  %v1142_v35 = vld [vmem:[#allocation3 + $0xf8] sm:$0xff] }
 0x3e2   :  { %2911 = vmatpush1.bf16.msra.mxu1 %v7118_v45  ;;  %v7062_v45 = vcombine.low %v1193_v33, %v1197_v34  ;;  %v1138_v34 = vld [vmem:[#allocation3 + $0xd8] sm:$0xff] }
 0x3e3   :  { %2912 = vmatprep.subr.bf16.mxu1 %v7111_v47  ;;  %v7055_v47 = vcombine.high %v1185_v60, %v1189_v57  ;;  %v1266_v36 = vld [vmem:[#allocation3 + $0x4d8] sm:$0xff] }
 0x3e4   :  { %2872 = vmatpush1.bf16.msra.mxu0 %v6982_v52  ;;  %v1309_v52 = vld [vmem:[#allocation3 + $0x630] sm:$0xff] }
 0x3e5   :  { %2873 = vmatprep.subr.bf16.mxu0 %v7103_v55  ;;  %v7182_v55 = vcombine.low %v1313_v43, %v1317_v44  ;;  %v7175_v58 = vcombine.high %v1305_v3, %v1309_v52  ;;  %v1262_v43 = vld [vmem:[#allocation3 + $0x4b8] sm:$0xff]  ;;  %v7008_v44 = vcombine.low %v1138_v34, %v1142_v35 }
 0x3e6   :  { %2913 = vmatpush1.bf16.msra.mxu1 %v7110_v54  ;;  %v7054_v54 = vcombine.low %v1185_v60, %v1189_v57  ;;  %v1134_v60 = vld [vmem:[#allocation3 + $0xb8] sm:$0xff] }
 0x3e7   :  { %2914 = vmatprep.subr.bf16.mxu1 %v7231_v56  ;;  %v7047_v56 = vcombine.high %v1177_v49, %v1181_v50  ;;  %v1258_v57 = vld [vmem:[#allocation3 + $0x498] sm:$0xff] }
 0x3e8   :  { %2874 = vmatpush2.bf16.msra.mxu0 %v7102_v1  ;;  %v1302_v1 = vld [vmem:[#allocation3 + $0x5f8] sm:$0xff] }
 0x3e9   :  { %2875 = vmatprep.subr.bf16.mxu0 %v7095_v5  ;;  %v7174_v5 = vcombine.low %v1305_v3, %v1309_v52  ;;  %v7169_v7 = vcombine.high %v1298_v62, %v1302_v1  ;;  %v1254_v3 = vld [vmem:[#allocation3 + $0x478] sm:$0xff] }
 0x3ea   :  { %2915 = vmatpush2.bf16.msra.mxu1 %v7230_v2  ;;  %v7046_v2 = vcombine.low %v1177_v49, %v1181_v50  ;;  %v1126_v49 = vld [vmem:[#allocation3 + $0x78] sm:$0xff] }
 0x3eb   :  { %2916 = vmatprep.subr.bf16.mxu1 %v7223_v6  ;;  %v7041_v6 = vcombine.high %v1170_v42, %v1174_v61  ;;  %v1250_v50 = vld [vmem:[#allocation3 + $0x458] sm:$0xff] }
 0x3ec   :  { %2876 = vmatpush2.bf16.msra.mxu0 %v7094_v11  ;;  %v1294_v11 = vld [vmem:[#allocation3 + $0x5b8] sm:$0xff] }
 0x3ed   :  { %2877 = vmatprep.subr.bf16.mxu0 %v7087_v13  ;;  %v7168_v13 = vcombine.low %v1298_v62, %v1302_v1  ;;  %v7161_v15 = vcombine.high %v1290_v10, %v1294_v11  ;;  %v1246_v62 = vld [vmem:[#allocation3 + $0x438] sm:$0xff] }
 0x3ee   :  { %2917 = vmatpush2.bf16.msra.mxu1 %v7222_v12  ;;  %v7040_v12 = vcombine.low %v1170_v42, %v1174_v61  ;;  %v1118_v42 = vld [vmem:[#allocation3 + $0x38] sm:$0xff] }
 0x3ef   :  { %2918 = vmatprep.subr.bf16.mxu1 %v7215_v14  ;;  %v7033_v14 = vcombine.high %v1162_v8, %v1166_v9  ;;  %v1242_v61 = vld [vmem:[#allocation3 + $0x418] sm:$0xff] }
 0x3f0   :  { %2878 = vmatpush2.bf16.msra.mxu0 %v7086_v19  ;;  %v1286_v19 = vld [vmem:[#allocation3 + $0x578] sm:$0xff] }
 0x3f1   :  { %2879 = vmatprep.subr.bf16.mxu0 %v7079_v21  ;;  %v7160_v21 = vcombine.low %v1290_v10, %v1294_v11  ;;  %v7153_v23 = vcombine.high %v1282_v18, %v1286_v19  ;;  %v1366_v10 = vld [vmem:[#allocation3 + $0x7f8] sm:$0xff] }
 0x3f2   :  { %2919 = vmatpush2.bf16.msra.mxu1 %v7214_v20  ;;  %v7032_v20 = vcombine.low %v1162_v8, %v1166_v9  ;;  %v1238_v8 = vld [vmem:[#allocation3 + $0x3f8] sm:$0xff] }
 0x3f3   :  { %2920 = vmatprep.subr.bf16.mxu1 %v7207_v22  ;;  %v7025_v22 = vcombine.high %v1154_v16, %v1158_v17  ;;  %v1362_v9 = vld [vmem:[#allocation3 + $0x7d8] sm:$0xff] }
 0x3f4   :  { %2880 = vmatpush2.bf16.msra.mxu0 %v7078_v27  ;;  %v1278_v27 = vld [vmem:[#allocation3 + $0x538] sm:$0xff] }
 0x3f5   :  { %2881 = vmatprep.subr.bf16.mxu0 %v7071_v30  ;;  %v7152_v30 = vcombine.low %v1282_v18, %v1286_v19  ;;  %v7145_v33 = vcombine.high %v1274_v26, %v1278_v27  ;;  %v1358_v18 = vld [vmem:[#allocation3 + $0x7b8] sm:$0xff] }
 0x3f6   :  { %2921 = vmatpush2.bf16.msra.mxu1 %v7206_v28  ;;  %v7024_v28 = vcombine.low %v1154_v16, %v1158_v17  ;;  %v1230_v16 = vld [vmem:[#allocation3 + $0x3b8] sm:$0xff] }
 0x3f7   :  { %2922 = vmatprep.subr.bf16.mxu1 %v7199_v31  ;;  %v7017_v31 = vcombine.high %v1146_v24, %v1150_v25  ;;  %v1354_v17 = vld [vmem:[#allocation3 + $0x798] sm:$0xff] }
 0x3f8   :  { %2882 = vmatpush2.bf16.msra.mxu0 %v7070_v59  ;;  %v1270_v59 = vld [vmem:[#allocation3 + $0x4f8] sm:$0xff] }
 0x3f9   :  { %2883 = vmatprep.subr.bf16.mxu0 %v7063_v4  ;;  %v7009_v4 = vcombine.high %v1138_v34, %v1142_v35  ;;  %v1214_v34 = vld [vmem:[#allocation3 + $0x338] sm:$0xff] }
 0x3fa   :  { %2923 = vmatpush2.bf16.msra.mxu1 %v7198_v37  ;;  %v7016_v37 = vcombine.low %v1146_v24, %v1150_v25  ;;  %v1222_v24 = vld [vmem:[#allocation3 + $0x378] sm:$0xff] }
 0x3fb   :  { %2924 = vmatprep.subr.bf16.mxu1 %v7191_v40  ;;  %v1130_v40 = vld [vmem:[#allocation3 + $0x98] sm:$0xff] }
 0x3fc   :  { %2884 = vmatpush2.bf16.msra.mxu0 %v7062_v45  ;;  %v7136_v45 = vcombine.low %v1266_v36, %v1270_v59  ;;  %v7000_v52 = vcombine.low %v1130_v40, %v1134_v60  ;;  %v1346_v25 = vld [vmem:[#allocation3 + $0x758] sm:$0xff] }
 0x3fd   :  { %2885 = vmatprep.subr.bf16.mxu0 %v7055_v47  ;;  %v7129_v47 = vcombine.high %v1258_v57, %v1262_v43  ;;  %v1338_v35 = vld [vmem:[#allocation3 + $0x718] sm:$0xff] }
 0x3fe   :  { %2925 = vmatpush2.bf16.msra.mxu1 %v7190_v46  ;;  %v7001_v46 = vcombine.high %v1130_v40, %v1134_v60  ;;  %v1206_v40 = vld [vmem:[#allocation3 + $0x2f8] sm:$0xff] }
 0x3ff   :  { %2926 = vmatprep.subr.bf16.mxu1 %v7183_v48  ;;  %v1122_v48 = vld [vmem:[#allocation3 + $0x58] sm:$0xff] }
 0x400   :  { %2886 = vmatpush2.bf16.msra.mxu0 %v7054_v54  ;;  %v7128_v54 = vcombine.low %v1258_v57, %v1262_v43  ;;  %v6992_v1 = vcombine.low %v1122_v48, %v1126_v49  ;;  %v1330_v60 = vld [vmem:[#allocation3 + $0x6d8] sm:$0xff] }
 0x401   :  { %2887 = vmatprep.subr.bf16.mxu0 %v7047_v56  ;;  %v7121_v56 = vcombine.high %v1250_v50, %v1254_v3  ;;  %v1334_v57 = vld [vmem:[#allocation3 + $0x6f8] sm:$0xff] }
 0x402   :  { %2927 = vmatpush2.bf16.msra.mxu1 %v7182_v55  ;;  %v6993_v55 = vcombine.high %v1122_v48, %v1126_v49  ;;  %v1198_v48 = vld [vmem:[#allocation3 + $0x2b8] sm:$0xff] }
 0x403   :  { %2928 = vmatprep.subr.bf16.mxu1 %v7175_v58  ;;  %v1114_v58 = vld [vmem:[#allocation3 + $0x18] sm:$0xff] }
 0x404   :  { %2888 = vmatpush2.bf16.msra.mxu0 %v7046_v2  ;;  %v7120_v2 = vcombine.low %v1250_v50, %v1254_v3  ;;  %v6984_v11 = vcombine.low %v1114_v58, %v1118_v42  ;;  %v1322_v49 = vld [vmem:[#allocation3 + $0x698] sm:$0xff] }
 0x405   :  { %2939 = vmatprep.subr.bf16.mxu0 %v7041_v6  ;;  %v7113_v6 = vcombine.high %v1242_v61, %v1246_v62  ;;  %v1326_v50 = vld [vmem:[#allocation3 + $0x6b8] sm:$0xff] }
 0x406   :  { %2929 = vmatpush2.bf16.msra.mxu1 %v7174_v5  ;;  %v6985_v5 = vcombine.high %v1114_v58, %v1118_v42  ;;  %v1190_v58 = vld [vmem:[#allocation3 + $0x278] sm:$0xff] }
 0x407   :  { %2980 = vmatprep.subr.bf16.mxu1 %v7169_v7  ;;  %2890 = vmatmul.mubr.bf16.vlgmr.msra.gmra.mxu0 %v8991_v29  ;;  %v1234_v7 = vld [vmem:[#allocation3 + $0x3d8] sm:$0xff] }
 0x408   :  { %2940 = vmatpush1.bf16.msra.mxu0 %v7040_v12  ;;  %2971 = vmatprep.mubr.bf16.mxu0 %v8983_v63  ;;  %v7144_v63 = vcombine.low %v1274_v26, %v1278_v27  ;;  %v7112_v12 = vcombine.low %v1242_v61, %v1246_v62  ;;  %v7104_v19 = vcombine.low %v1234_v7, %v1238_v8  ;;  %v1350_v26 = vld [vmem:[#allocation3 + $0x778] sm:$0xff] }
 0x409   :  { %2931 = vmatmul.mubr.bf16.vlgmr.msra.gmra.mxu1 %v8995_v32  ;;  %2941 = vmatprep.subr.bf16.mxu0 %v7033_v14  ;;  %v7233_v14 = vcombine.high %v1362_v9, %v1366_v10  ;;  %v1314_v42 = vld [vmem:[#allocation3 + $0x658] sm:$0xff] }
 0x40a   :  { %2981 = vmatpush1.bf16.msra.mxu1 %v7168_v13  ;;  %3012 = vmatprep.mubr.bf16.mxu1 %v8985_v0  ;;  %v7137_v0 = vcombine.high %v1266_v36, %v1270_v59  ;;  %v7105_v13 = vcombine.high %v1234_v7, %v1238_v8  ;;  %v1342_v36 = vld [vmem:[#allocation3 + $0x738] sm:$0xff] }
 0x40b   :  { %2982 = vmatprep.subr.bf16.mxu1 %v7161_v15  ;;  %v1226_v15 = vld [vmem:[#allocation3 + $0x398] sm:$0xff] }
 0x40c   :  { %2942 = vmatpush1.bf16.msra.mxu0 %v7032_v20  ;;  %v7232_v20 = vcombine.low %v1362_v9, %v1366_v10  ;;  %v7096_v27 = vcombine.low %v1226_v15, %v1230_v16  ;;  %v1318_v61 = vld [vmem:[#allocation3 + $0x678] sm:$0xff] }
 0x40d   :  { %2943 = vmatprep.subr.bf16.mxu0 %v7025_v22  ;;  %v7225_v22 = vcombine.high %v1354_v17, %v1358_v18  ;;  %v1182_v7 = vld [vmem:[#allocation3 + $0x238] sm:$0xff] }
 0x40e   :  { %2983 = vmatpush1.bf16.msra.mxu1 %v7160_v21  ;;  %v7097_v21 = vcombine.high %v1226_v15, %v1230_v16  ;;  %v1306_v8 = vld [vmem:[#allocation3 + $0x618] sm:$0xff] }
 0x40f   :  { %2984 = vmatprep.subr.bf16.mxu1 %v7153_v23  ;;  %v1218_v23 = vld [vmem:[#allocation3 + $0x358] sm:$0xff] }
 0x410   :  { %2944 = vmatpush1.bf16.msra.mxu0 %v7024_v28  ;;  %v7224_v28 = vcombine.low %v1354_v17, %v1358_v18  ;;  %v7088_v59 = vcombine.low %v1218_v23, %v1222_v24  ;;  %v1310_v9 = vld [vmem:[#allocation3 + $0x638] sm:$0xff] }
 0x411   :  { %2945 = vmatprep.subr.bf16.mxu0 %v7017_v31  ;;  %v7217_v31 = vcombine.high %v1346_v25, %v1350_v26  ;;  %v7176_v15 = vcombine.low %v1306_v8, %v1310_v9  ;;  %v9009_v16 = vld [vmem:[#allocation12 + $0x13] sm:$0xff] }
 0x412   :  { %2985 = vmatpush1.bf16.msra.mxu1 %v7152_v30  ;;  %v7089_v30 = vcombine.high %v1218_v23, %v1222_v24  ;;  %v1376_v17 = vrot.slane %v9009_v16, %v8918_v39  ;;  %v1380_v18 = vrot.slane %v9009_v16, %v8921_v41 }
 0x413   :  { %2986 = vmatprep.subr.bf16.mxu1 %v7145_v33  ;;  %v1210_v33 = vld [vmem:[#allocation3 + $0x318] sm:$0xff] }
 0x414   :  { %2946 = vmatpush1.bf16.msra.mxu0 %v7016_v37  ;;  %v7216_v37 = vcombine.low %v1346_v25, %v1350_v26  ;;  %v7080_v43 = vcombine.low %v1210_v33, %v1214_v34 }
 0x415   :  { %2947 = vmatprep.subr.bf16.mxu0 %v7009_v4  ;;  %v7209_v4 = vcombine.high %v1338_v35, %v1342_v36 }
 0x416   :  { %2987 = vmatpush1.bf16.msra.mxu1 %v7144_v63  ;;  %v7081_v63 = vcombine.high %v1210_v33, %v1214_v34 }
 0x417   :  { %2988 = vmatprep.subr.bf16.mxu1 %v7137_v0  ;;  %v1202_v0 = vld [vmem:[#allocation3 + $0x2d8] sm:$0xff] }
 0x418   :  { %2948 = vmatpush1.bf16.msra.mxu0 %v7008_v44  ;;  %v7208_v44 = vcombine.low %v1338_v35, %v1342_v36  ;;  %v7072_v3 = vcombine.low %v1202_v0, %v1206_v40 }
 0x419   :  { %2949 = vmatprep.subr.bf16.mxu0 %v7001_v46  ;;  %v7201_v46 = vcombine.high %v1330_v60, %v1334_v57 }
 0x41a   :  { %2989 = vmatpush1.bf16.msra.mxu1 %v7136_v45  ;;  %v7073_v45 = vcombine.high %v1202_v0, %v1206_v40 }
 0x41b   :  { %2990 = vmatprep.subr.bf16.mxu1 %v7129_v47  ;;  %v1194_v47 = vld [vmem:[#allocation3 + $0x298] sm:$0xff] }
 0x41c   :  { %2950 = vmatpush1.bf16.msra.mxu0 %v7000_v52  ;;  %v7200_v52 = vcombine.low %v1330_v60, %v1334_v57  ;;  %v7064_v62 = vcombine.low %v1194_v47, %v1198_v48 }
 0x41d   :  { %2951 = vmatprep.subr.bf16.mxu0 %v6993_v55  ;;  %v7193_v55 = vcombine.high %v1322_v49, %v1326_v50 }
 0x41e   :  { %2991 = vmatpush1.bf16.msra.mxu1 %v7128_v54  ;;  %v7065_v54 = vcombine.high %v1194_v47, %v1198_v48 }
 0x41f   :  { %2992 = vmatprep.subr.bf16.mxu1 %v7121_v56  ;;  %v1186_v56 = vld [vmem:[#allocation3 + $0x258] sm:$0xff] }
 0x420   :  { %2952 = vmatpush1.bf16.msra.mxu0 %v6992_v1  ;;  %v7192_v1 = vcombine.low %v1322_v49, %v1326_v50  ;;  %v7056_v10 = vcombine.low %v1186_v56, %v1190_v58 }
 0x421   :  { %2953 = vmatprep.subr.bf16.mxu0 %v6985_v5  ;;  %v7185_v5 = vcombine.high %v1314_v42, %v1318_v61 }
 0x422   :  { %2993 = vmatpush1.bf16.msra.mxu1 %v7120_v2  ;;  %v7057_v2 = vcombine.high %v1186_v56, %v1190_v58 }
 0x423   :  { %2994 = vmatprep.subr.bf16.mxu1 %v7113_v6  ;;  %v1178_v6 = vld [vmem:[#allocation3 + $0x218] sm:$0xff] }
 0x424   :  { %2954 = vmatpush1.bf16.msra.mxu0 %v6984_v11  ;;  %v7184_v11 = vcombine.low %v1314_v42, %v1318_v61 }
 0x425   :  { %2955 = vmatprep.subr.bf16.mxu0 %v7105_v13  ;;  %v7177_v13 = vcombine.high %v1306_v8, %v1310_v9  ;;  %v9017_v8 = vld [vmem:[#allocation12 + $0x1b] sm:$0xff]  ;;  %v9019_v9 = vld [vmem:[#allocation12 + $0x23] sm:$0xff] }
 0x426   :  { %2995 = vmatpush1.bf16.msra.mxu1 %v7112_v12  ;;  %v7049_v12 = vcombine.high %v1178_v6, %v1182_v7 }
 0x427   :  { %2996 = vmatprep.subr.bf16.mxu1 %v7233_v14  ;;  %v7048_v14 = vcombine.low %v1178_v6, %v1182_v7 }
 0x428   :  { %2956 = vmatpush2.bf16.msra.mxu0 %v7104_v19 }
 0x429   :  { %2957 = vmatprep.subr.bf16.mxu0 %v7097_v21 }
 0x42a   :  { %2997 = vmatpush2.bf16.msra.mxu1 %v7232_v20 }
 0x42b   :  { %2998 = vmatprep.subr.bf16.mxu1 %v7225_v22 }
 0x42c   :  { %2958 = vmatpush2.bf16.msra.mxu0 %v7096_v27 }
 0x42d   :  { %2959 = vmatprep.subr.bf16.mxu0 %v7089_v30 }
 0x42e   :  { %2999 = vmatpush2.bf16.msra.mxu1 %v7224_v28 }
 0x42f   :  { %3000 = vmatprep.subr.bf16.mxu1 %v7217_v31 }
 0x430   :  { %2960 = vmatpush2.bf16.msra.mxu0 %v7088_v59 }
 0x431   :  { %2961 = vmatprep.subr.bf16.mxu0 %v7081_v63 }
 0x432   :  { %3001 = vmatpush2.bf16.msra.mxu1 %v7216_v37 }
 0x433   :  { %3002 = vmatprep.subr.bf16.mxu1 %v7209_v4 }
 0x434   :  { %2962 = vmatpush2.bf16.msra.mxu0 %v7080_v43 }
 0x435   :  { %2963 = vmatprep.subr.bf16.mxu0 %v7073_v45 }
 0x436   :  { %3003 = vmatpush2.bf16.msra.mxu1 %v7208_v44 }
 0x437   :  { %3004 = vmatprep.subr.bf16.mxu1 %v7201_v46 }
 0x438   :  { %2964 = vmatpush2.bf16.msra.mxu0 %v7072_v3 }
 0x439   :  { %2965 = vmatprep.subr.bf16.mxu0 %v7065_v54 }
 0x43a   :  { %3005 = vmatpush2.bf16.msra.mxu1 %v7200_v52 }
 0x43b   :  { %3006 = vmatprep.subr.bf16.mxu1 %v7193_v55 }
 0x43c   :  { %2966 = vmatpush2.bf16.msra.mxu0 %v7064_v62 }
 0x43d   :  { %2967 = vmatprep.subr.bf16.mxu0 %v7057_v2 }
 0x43e   :  { %3007 = vmatpush2.bf16.msra.mxu1 %v7192_v1 }
 0x43f   :  { %3008 = vmatprep.subr.bf16.mxu1 %v7185_v5 }
 0x440   :  { %2968 = vmatpush2.bf16.msra.mxu0 %v7056_v10 }
 0x441   :  { %2969 = vmatprep.subr.bf16.mxu0 %v7049_v12 }
 0x442   :  { %3009 = vmatpush2.bf16.msra.mxu1 %v7184_v11  ;;  %v3195_v11 = vrot.slane %v9017_v8, %v8918_v39 }
 0x443   :  { %3010 = vmatprep.subr.bf16.mxu1 %v7177_v13 }
 0x444   :  { %2970 = vmatpush2.bf16.msra.mxu0 %v7048_v14  ;;  %v3244_v14 = vrot.slane %v9019_v9, %v8918_v39 }
 0x446   :  { %3011 = vmatpush2.bf16.msra.mxu1 %v7176_v15 }
 0x447   :  { %v2727_v19 = vpop.f32.mrf.mxu0  ;;  %2972 = vmatmul.mubr.bf16.vlgmr.msra.gmra.mxu0 %v8991_v29 }
 0x448   :  { %v2728_v20 = vadd.f32 %v2727_v19, %v1376_v17  ;;  %v3199_v17 = vrot.slane %v9017_v8, %v8921_v41 }
 0x449   :  { %v2768_v21 = vpop.f32.mrf.mxu1  ;;  %3013 = vmatmul.mubr.bf16.vlgmr.msra.gmra.mxu1 %v8995_v32  ;;  %v2729_v22 = vpop.f32.mrf.mxu0 }
 0x44a   :  { %v2769_v23 = vadd.f32 %v2768_v21, %v2728_v20  ;;  %v2730_v24 = vadd.f32 %v2729_v22, %v1380_v18  ;;  %v3248_v21 = vrot.slane %v9019_v9, %v8921_v41 }
 0x44b   :  { %v2770_v25 = vpop.f32.mrf.mxu1  ;;  %v2731_v26 = vpop.f32.mrf.mxu0 }
 0x44c   :  { %v3023_v27 = vrot.slane %v2769_v23, 4  ;;  %v3079_v28 = vmul.f32 %v2769_v23, %v2769_v23  ;;  %v2771_v30 = vadd.f32 %v2770_v25, %v2730_v24 }
 0x44d   :  { %v2772_v31 = vpop.f32.mrf.mxu1  ;;  %v2732_v33 = vpop.f32.mrf.mxu0 }
 0x44e   :  { %v3024_v34 = vadd.f32 %v3023_v27, %v2769_v23  ;;  %v3087_v35 = vrot.slane %v3079_v28, 4  ;;  %v3029_v36 = vrot.slane %v2771_v30, 4  ;;  %v3080_v59 = vmul.f32 %v2771_v30, %v2771_v30 }
 0x44f   :  { %v2773_v37 = vpop.f32.mrf.mxu1  ;;  %v1388_v31 = vrot.slane %v9009_v16, %v8937_v53 }
 0x450   :  { %v3025_v29 = vrot.slane %v3024_v34, 2  ;;  %v3088_v63 = vadd.f32 %v3087_v35, %v3079_v28  ;;  %v3030_v4 = vadd.f32 %v3029_v36, %v2771_v30  ;;  %v3093_v0 = vrot.slane %v3080_v59, 4 }
 0x452   :  { %v3026_v32 = vadd.f32 %v3025_v29, %v3024_v34  ;;  %v3089_v40 = vrot.slane %v3088_v63, 2  ;;  %v3031_v60 = vrot.slane %v3030_v4, 2  ;;  %v3094_v57 = vadd.f32 %v3093_v0, %v3080_v59 }
 0x454   :  { %v3027_v43 = vrot.slane %v3026_v32, 1  ;;  %v3090_v44 = vadd.f32 %v3089_v40, %v3088_v63  ;;  %v3032_v45 = vadd.f32 %v3031_v60, %v3030_v4  ;;  %v3095_v46 = vrot.slane %v3094_v57, 2 }
 0x456   :  { %v3028_v47 = vadd.f32 %v3027_v43, %v3026_v32  ;;  %v3091_v48 = vrot.slane %v3090_v44, 1  ;;  %v3033_v49 = vrot.slane %v3032_v45, 1  ;;  %v3096_v50 = vadd.f32 %v3095_v46, %v3094_v57 }
 0x458   :  { %v3071_v3 = vmul.f32 0.125, %v3028_v47  ;;  %v3092_v52 = vadd.f32 %v3091_v48, %v3090_v44  ;;  %v3034_v54 = vadd.f32 %v3033_v49, %v3032_v45  ;;  %v3097_v55 = vrot.slane %v3096_v50, 1 }
 0x45a   :  { %v3135_v56 = vmul.f32 0.125, %v3092_v52  ;;  %v3143_v58 = vmul.f32 %v3071_v3, %v3071_v3  ;;  %v3072_v42 = vmul.f32 0.125, %v3034_v54  ;;  %v3098_v61 = vadd.f32 %v3097_v55, %v3096_v50 }
 0x45b   :  { %v3159_v10 = vsub.f32 %v2769_v23, %v3071_v3 }
 0x45c   :  { %v3151_v62 = vsub.f32 %v3135_v56, %v3143_v58  ;;  %v3144_v1 = vmul.f32 %v3072_v42, %v3072_v42  ;;  %v3136_v2 = vmul.f32 0.125, %v3098_v61  ;;  %v3160_v15 = vsub.f32 %v2771_v30, %v3072_v42 }
 0x45d   :  { %v1384_v30 = vrot.slane %v9009_v16, %v8934_v51 }
 0x45e   :  { %v3167_v5 = vadd.f32 0.8, %v3151_v62  ;;  %v3152_v6 = vsub.f32 %v3136_v2, %v3144_v1 }
 0x460   :  { %7959 = vrsqrt.f32 %v3167_v5  ;;  %v3168_v7 = vadd.f32 0.8, %v3152_v6 }
 0x462   :  { %7961 = vrsqrt.f32 %v3168_v7 }
 0x46d   :  { %v7960_v12 = vpop.eup %7959 }
 0x46e   :  { %v3183_v13 = vmul.f32 %v7960_v12, %v3159_v10 }
 0x46f   :  { %v7962_v18 = vpop.eup %7961 }
 0x470   :  { %v3232_v19 = vmul.f32 %v3195_v11, %v3183_v13  ;;  %v3184_v20 = vmul.f32 %v7962_v18, %v3160_v15 }
 0x472   :  { %v3281_v22 = vadd.f32 %v3244_v14, %v3232_v19  ;;  %v3233_v23 = vmul.f32 %v3199_v17, %v3184_v20 }
 0x474   :  { %vm3289_vm8 = vcmp.gt.f32.partialorder %v3281_v22, 0.0  ;;  %v3297_v24 = vmul.f32 0.2, %v3281_v22  ;;  %v3282_v25 = vadd.f32 %v3248_v21, %v3233_v23 }
 0x476   :  { %v9029_v26 = vsel %vm3289_vm8, %v3281_v22, %v3297_v24  ;;  %vm3290_vm9 = vcmp.gt.f32.partialorder %v3282_v25, 0.0  ;;  %v3298_v27 = vmul.f32 0.2, %v3282_v25  ;;  %v3203_v24 = vrot.slane %v9017_v8, %v8934_v51 }
 0x478   :  { %v9031_v28 = vsel %vm3290_vm9, %v3282_v25, %v3298_v27 }
 0x487   :  { %v2809_v33 = vpop.f32.mrf.mxu0 }
 0x488   :  { %v2810_v34 = vadd.f32 %v2809_v33, %v1384_v30  ;;  %v3252_v30 = vrot.slane %v9019_v9, %v8934_v51  ;;  %v3207_v33 = vrot.slane %v9017_v8, %v8937_v53 }
 0x489   :  { %v2850_v35 = vpop.f32.mrf.mxu1  ;;  %v2811_v36 = vpop.f32.mrf.mxu0 }
 0x48a   :  { %v2851_v59 = vadd.f32 %v2850_v35, %v2810_v34  ;;  %v2812_v37 = vadd.f32 %v2811_v36, %v1388_v31 }
 0x48b   :  { %v2852_v29 = vpop.f32.mrf.mxu1  ;;  %v2813_v63 = vpop.f32.mrf.mxu0 }
 0x48c   :  { %v3035_v4 = vrot.slane %v2851_v59, 4  ;;  %v3081_v0 = vmul.f32 %v2851_v59, %v2851_v59  ;;  %v2853_v32 = vadd.f32 %v2852_v29, %v2812_v37  ;;  %v3256_v37 = vrot.slane %v9019_v9, %v8937_v53 }
 0x48d   :  { %v2854_v40 = vpop.f32.mrf.mxu1  ;;  %v2814_v60 = vpop.f32.mrf.mxu0 }
 0x48e   :  { %v3036_v57 = vadd.f32 %v3035_v4, %v2851_v59  ;;  %v3099_v43 = vrot.slane %v3081_v0, 4  ;;  %v3041_v44 = vrot.slane %v2853_v32, 4  ;;  %v3082_v45 = vmul.f32 %v2853_v32, %v2853_v32 }
 0x48f   :  { %v2855_v46 = vpop.f32.mrf.mxu1 }
 0x490   :  { %v3037_v47 = vrot.slane %v3036_v57, 2  ;;  %v3100_v48 = vadd.f32 %v3099_v43, %v3081_v0  ;;  %v3042_v49 = vadd.f32 %v3041_v44, %v2853_v32  ;;  %v3105_v50 = vrot.slane %v3082_v45, 4 }
 0x492   :  { %v3038_v3 = vadd.f32 %v3037_v47, %v3036_v57  ;;  %v3101_v52 = vrot.slane %v3100_v48, 2  ;;  %v3043_v54 = vrot.slane %v3042_v49, 2  ;;  %v3106_v55 = vadd.f32 %v3105_v50, %v3082_v45 }
 0x494   :  { %v3039_v56 = vrot.slane %v3038_v3, 1  ;;  %v3102_v58 = vadd.f32 %v3101_v52, %v3100_v48  ;;  %v3044_v42 = vadd.f32 %v3043_v54, %v3042_v49  ;;  %v3107_v61 = vrot.slane %v3106_v55, 2 }
 0x496   :  { %v3040_v62 = vadd.f32 %v3039_v56, %v3038_v3  ;;  %v3103_v1 = vrot.slane %v3102_v58, 1  ;;  %v3045_v2 = vrot.slane %v3044_v42, 1  ;;  %v3108_v5 = vadd.f32 %v3107_v61, %v3106_v55 }
 0x498   :  { %v3073_v6 = vmul.f32 0.125, %v3040_v62  ;;  %v3104_v7 = vadd.f32 %v3103_v1, %v3102_v58  ;;  %v3046_v10 = vadd.f32 %v3045_v2, %v3044_v42  ;;  %v3109_v11 = vrot.slane %v3108_v5, 1 }
 0x49a   :  { %v3137_v12 = vmul.f32 0.125, %v3104_v7  ;;  %v3145_v13 = vmul.f32 %v3073_v6, %v3073_v6  ;;  %v3074_v14 = vmul.f32 0.125, %v3046_v10  ;;  %v3110_v15 = vadd.f32 %v3109_v11, %v3108_v5 }
 0x49b   :  { %v3161_v23 = vsub.f32 %v2851_v59, %v3073_v6 }
 0x49c   :  { %v3153_v17 = vsub.f32 %v3137_v12, %v3145_v13  ;;  %v3146_v18 = vmul.f32 %v3074_v14, %v3074_v14  ;;  %v3138_v19 = vmul.f32 0.125, %v3110_v15  ;;  %v3162_v31 = vsub.f32 %v2853_v32, %v3074_v14 }
 0x49e   :  { %v3169_v20 = vadd.f32 0.8, %v3153_v17  ;;  %v3154_v21 = vsub.f32 %v3138_v19, %v3146_v18 }
 0x4a0   :  { %7963 = vrsqrt.f32 %v3169_v20  ;;  %v3170_v22 = vadd.f32 0.8, %v3154_v21 }
 0x4a2   :  { %7965 = vrsqrt.f32 %v3170_v22 }
 0x4ad   :  { %v7964_v25 = vpop.eup %7963 }
 0x4ae   :  { %v3185_v27 = vmul.f32 %v7964_v25, %v3161_v23 }
 0x4af   :  { %v7966_v34 = vpop.eup %7965 }
 0x4b0   :  { %v3234_v35 = vmul.f32 %v3203_v24, %v3185_v27  ;;  %v3186_v36 = vmul.f32 %v7966_v34, %v3162_v31 }
 0x4b2   :  { %v3283_v59 = vadd.f32 %v3252_v30, %v3234_v35  ;;  %v3235_v29 = vmul.f32 %v3207_v33, %v3186_v36 }
 0x4b4   :  { %vm3291_vm10 = vcmp.gt.f32.partialorder %v3283_v59, 0.0  ;;  %v3299_v63 = vmul.f32 0.2, %v3283_v59  ;;  %v3284_v4 = vadd.f32 %v3256_v37, %v3235_v29 }
 0x4b6   :  { %v9045_v0 = vsel %vm3291_vm10, %v3283_v59, %v3299_v63  ;;  %vm3292_vm11 = vcmp.gt.f32.partialorder %v3284_v4, 0.0  ;;  %v3300_v32 = vmul.f32 0.2, %v3284_v4 }
 0x4b8   :  { %v9050_v40 = vsel %vm3292_vm11, %v3284_v4, %v3300_v32 }
 0x4b9   :  { %8790 = shalt.err (!%p8787_p11)  }
 0x4ba   :  { %1110 = dma.hbm_to_vmem [thread:$0]  %s1097_s1, 28672, %s1108_s13, [#allocation5 + $0x3]  ;;  %v9056_v60 = vsub.s32 4, %v8915_v38  ;;  %v9059_v57 = vsub.s32 5, %v8915_v38 }
 0x4bc   :  { %v1392_v43 = vrot.slane %v9009_v16, %v9056_v60  ;;  %v1396_v44 = vrot.slane %v9009_v16, %v9059_v57 }
 0x4c7   :  { %v2891_v45 = vpop.f32.mrf.mxu0 }
 0x4c8   :  { %v2892_v46 = vadd.f32 %v2891_v45, %v1392_v43  ;;  %v3211_v43 = vrot.slane %v9017_v8, %v9056_v60 }
 0x4c9   :  { %v2932_v47 = vpop.f32.mrf.mxu1  ;;  %v2893_v48 = vpop.f32.mrf.mxu0 }
 0x4ca   :  { %v2933_v49 = vadd.f32 %v2932_v47, %v2892_v46  ;;  %v2894_v50 = vadd.f32 %v2893_v48, %v1396_v44  ;;  %v3260_v46 = vrot.slane %v9019_v9, %v9056_v60  ;;  %v3215_v48 = vrot.slane %v9017_v8, %v9059_v57 }
 0x4cb   :  { %v2934_v3 = vpop.f32.mrf.mxu1  ;;  %v2895_v52 = vpop.f32.mrf.mxu0 }
 0x4cc   :  { %v3047_v54 = vrot.slane %v2933_v49, 4  ;;  %v3083_v55 = vmul.f32 %v2933_v49, %v2933_v49  ;;  %v2935_v56 = vadd.f32 %v2934_v3, %v2894_v50 }
 0x4cd   :  { %v2936_v58 = vpop.f32.mrf.mxu1  ;;  %v2896_v42 = vpop.f32.mrf.mxu0 }
 0x4ce   :  { %v3048_v61 = vadd.f32 %v3047_v54, %v2933_v49  ;;  %v3111_v62 = vrot.slane %v3083_v55, 4  ;;  %v3053_v1 = vrot.slane %v2935_v56, 4  ;;  %v3084_v2 = vmul.f32 %v2935_v56, %v2935_v56 }
 0x4cf   :  { %v2937_v5 = vpop.f32.mrf.mxu1  ;;  %v3264_v54 = vrot.slane %v9019_v9, %v9059_v57 }
 0x4d0   :  { %v3049_v6 = vrot.slane %v3048_v61, 2  ;;  %v3112_v7 = vadd.f32 %v3111_v62, %v3083_v55  ;;  %v3054_v10 = vadd.f32 %v3053_v1, %v2935_v56  ;;  %v3117_v11 = vrot.slane %v3084_v2, 4 }
 0x4d1   :  { %v9078_v5 = vsub.s32 6, %v8915_v38 }
 0x4d2   :  { %v3050_v12 = vadd.f32 %v3049_v6, %v3048_v61  ;;  %v3113_v13 = vrot.slane %v3112_v7, 2  ;;  %v3055_v14 = vrot.slane %v3054_v10, 2  ;;  %v3118_v15 = vadd.f32 %v3117_v11, %v3084_v2 }
 0x4d3   :  { %v1400_v6 = vrot.slane %v9009_v16, %v9078_v5 }
 0x4d4   :  { %v3051_v17 = vrot.slane %v3050_v12, 1  ;;  %v3114_v18 = vadd.f32 %v3113_v13, %v3112_v7  ;;  %v3056_v19 = vadd.f32 %v3055_v14, %v3054_v10  ;;  %v3119_v20 = vrot.slane %v3118_v15, 2 }
 0x4d6   :  { %v3052_v21 = vadd.f32 %v3051_v17, %v3050_v12  ;;  %v3115_v22 = vrot.slane %v3114_v18, 1  ;;  %v3057_v23 = vrot.slane %v3056_v19, 1  ;;  %v3120_v24 = vadd.f32 %v3119_v20, %v3118_v15 }
 0x4d8   :  { %v3075_v25 = vmul.f32 0.125, %v3052_v21  ;;  %v3116_v27 = vadd.f32 %v3115_v22, %v3114_v18  ;;  %v3058_v30 = vadd.f32 %v3057_v23, %v3056_v19  ;;  %v3121_v31 = vrot.slane %v3120_v24, 1 }
 0x4da   :  { %v3139_v33 = vmul.f32 0.125, %v3116_v27  ;;  %v3147_v34 = vmul.f32 %v3075_v25, %v3075_v25  ;;  %v3076_v35 = vmul.f32 0.125, %v3058_v30  ;;  %v3122_v36 = vadd.f32 %v3121_v31, %v3120_v24 }
 0x4db   :  { %v3163_v44 = vsub.f32 %v2933_v49, %v3075_v25 }
 0x4dc   :  { %v3155_v37 = vsub.f32 %v3139_v33, %v3147_v34  ;;  %v3148_v59 = vmul.f32 %v3076_v35, %v3076_v35  ;;  %v3140_v29 = vmul.f32 0.125, %v3122_v36  ;;  %v3164_v50 = vsub.f32 %v2935_v56, %v3076_v35 }
 0x4dd   :  { %v9081_v56 = vsub.s32 7, %v8915_v38 }
 0x4de   :  { %v3171_v63 = vadd.f32 0.8, %v3155_v37  ;;  %v3156_v4 = vsub.f32 %v3140_v29, %v3148_v59 }
 0x4df   :  { %v1404_v7 = vrot.slane %v9009_v16, %v9081_v56 }
 0x4e0   :  { %7967 = vrsqrt.f32 %v3171_v63  ;;  %v3172_v32 = vadd.f32 0.8, %v3156_v4 }
 0x4e2   :  { %7969 = vrsqrt.f32 %v3172_v32 }
 0x4ed   :  { %v7968_v45 = vpop.eup %7967 }
 0x4ee   :  { %v3187_v47 = vmul.f32 %v7968_v45, %v3163_v44 }
 0x4ef   :  { %v7970_v3 = vpop.eup %7969 }
 0x4f0   :  { %v3236_v52 = vmul.f32 %v3211_v43, %v3187_v47  ;;  %v3188_v55 = vmul.f32 %v7970_v3, %v3164_v50 }
 0x4f2   :  { %v3285_v58 = vadd.f32 %v3260_v46, %v3236_v52  ;;  %v3237_v42 = vmul.f32 %v3215_v48, %v3188_v55 }
 0x4f4   :  { %vm3293_vm12 = vcmp.gt.f32.partialorder %v3285_v58, 0.0  ;;  %v3301_v61 = vmul.f32 0.2, %v3285_v58  ;;  %v3286_v49 = vadd.f32 %v3264_v54, %v3237_v42 }
 0x4f6   :  { %v9073_v62 = vsel %vm3293_vm12, %v3285_v58, %v3301_v61  ;;  %vm3294_vm13 = vcmp.gt.f32.partialorder %v3286_v49, 0.0  ;;  %v3302_v1 = vmul.f32 0.2, %v3286_v49 }
 0x4f8   :  { %v9075_v2 = vsel %vm3294_vm13, %v3286_v49, %v3302_v1 }
 0x507   :  { %v2973_v10 = vpop.f32.mrf.mxu0 }
 0x508   :  { %v2974_v11 = vadd.f32 %v2973_v10, %v1400_v6  ;;  %v3219_v10 = vrot.slane %v9017_v8, %v9078_v5 }
 0x509   :  { %v3014_v12 = vpop.f32.mrf.mxu1  ;;  %v2975_v13 = vpop.f32.mrf.mxu0 }
 0x50a   :  { %v3015_v14 = vadd.f32 %v3014_v12, %v2974_v11  ;;  %v2976_v15 = vadd.f32 %v2975_v13, %v1404_v7  ;;  %v3268_v13 = vrot.slane %v9019_v9, %v9078_v5 }
 0x50b   :  { %v3016_v17 = vpop.f32.mrf.mxu1  ;;  %v2977_v18 = vpop.f32.mrf.mxu0 }
 0x50c   :  { %v3059_v19 = vrot.slane %v3015_v14, 4  ;;  %v3085_v20 = vmul.f32 %v3015_v14, %v3015_v14  ;;  %v3017_v21 = vadd.f32 %v3016_v17, %v2976_v15  ;;  %v3223_v17 = vrot.slane %v9017_v8, %v9081_v56 }
 0x50d   :  { %v3018_v22 = vpop.f32.mrf.mxu1  ;;  %v2978_v38 = vpop.f32.mrf.mxu0 }
 0x50e   :  { %v3060_v23 = vadd.f32 %v3059_v19, %v3015_v14  ;;  %v3123_v24 = vrot.slane %v3085_v20, 4  ;;  %v3065_v25 = vrot.slane %v3017_v21, 4  ;;  %v3086_v27 = vmul.f32 %v3017_v21, %v3017_v21 }
 0x50f   :  { %v3019_v30 = vpop.f32.mrf.mxu1  ;;  %v3272_v22 = vrot.slane %v9019_v9, %v9081_v56 }
 0x510   :  { %v3061_v31 = vrot.slane %v3060_v23, 2  ;;  %v3124_v16 = vadd.f32 %v3123_v24, %v3085_v20  ;;  %v3066_v33 = vadd.f32 %v3065_v25, %v3017_v21  ;;  %v3129_v34 = vrot.slane %v3086_v27, 4 }
 0x512   :  { %v3062_v35 = vadd.f32 %v3061_v31, %v3060_v23  ;;  %v3125_v36 = vrot.slane %v3124_v16, 2  ;;  %v3067_v37 = vrot.slane %v3066_v33, 2  ;;  %v3130_v59 = vadd.f32 %v3129_v34, %v3086_v27 }
 0x514   :  { %v3063_v29 = vrot.slane %v3062_v35, 1  ;;  %v3126_v63 = vadd.f32 %v3125_v36, %v3124_v16  ;;  %v3068_v4 = vadd.f32 %v3067_v37, %v3066_v33  ;;  %v3131_v32 = vrot.slane %v3130_v59, 2 }
 0x516   :  { %v3064_v43 = vadd.f32 %v3063_v29, %v3062_v35  ;;  %v3127_v44 = vrot.slane %v3126_v63, 1  ;;  %v3069_v45 = vrot.slane %v3068_v4, 1  ;;  %v3132_v46 = vadd.f32 %v3131_v32, %v3130_v59 }
 0x518   :  { %v3077_v47 = vmul.f32 0.125, %v3064_v43  ;;  %v3128_v48 = vadd.f32 %v3127_v44, %v3126_v63  ;;  %v3070_v50 = vadd.f32 %v3069_v45, %v3068_v4  ;;  %v3133_v3 = vrot.slane %v3132_v46, 1 }
 0x51a   :  { %v3141_v52 = vmul.f32 0.125, %v3128_v48  ;;  %v3149_v54 = vmul.f32 %v3077_v47, %v3077_v47  ;;  %v3078_v55 = vmul.f32 0.125, %v3070_v50  ;;  %v3134_v58 = vadd.f32 %v3133_v3, %v3132_v46 }
 0x51b   :  { %v3165_v11 = vsub.f32 %v3015_v14, %v3077_v47 }
 0x51c   :  { %v3157_v42 = vsub.f32 %v3141_v52, %v3149_v54  ;;  %v3150_v61 = vmul.f32 %v3078_v55, %v3078_v55  ;;  %v3142_v49 = vmul.f32 0.125, %v3134_v58  ;;  %v3166_v18 = vsub.f32 %v3017_v21, %v3078_v55 }
 0x51e   :  { %v3173_v1 = vadd.f32 0.8, %v3157_v42  ;;  %v3158_v6 = vsub.f32 %v3142_v49, %v3150_v61 }
 0x520   :  { %7971 = vrsqrt.f32 %v3173_v1  ;;  %v3174_v7 = vadd.f32 0.8, %v3158_v6 }
 0x522   :  { %7973 = vrsqrt.f32 %v3174_v7 }
 0x52d   :  { %v7972_v12 = vpop.eup %7971 }
 0x52e   :  { %v3189_v15 = vmul.f32 %v7972_v12, %v3165_v11 }
 0x52f   :  { %v7974_v19 = vpop.eup %7973 }
 0x530   :  { %v3238_v20 = vmul.f32 %v3219_v10, %v3189_v15  ;;  %v3190_v38 = vmul.f32 %v7974_v19, %v3166_v18 }
 0x532   :  { %v3287_v23 = vadd.f32 %v3268_v13, %v3238_v20  ;;  %v3239_v24 = vmul.f32 %v3223_v17, %v3190_v38 }
 0x534   :  { %vm3295_vm14 = vcmp.gt.f32.partialorder %v3287_v23, 0.0  ;;  %v3303_v25 = vmul.f32 0.2, %v3287_v23  ;;  %v3288_v14 = vadd.f32 %v3272_v22, %v3239_v24 }
 0x536   :  { %v9095_v27 = vsel %vm3295_vm14, %v3287_v23, %v3303_v25  ;;  %vm3296_vm15 = vcmp.gt.f32.partialorder %v3288_v14, 0.0  ;;  %v3304_v30 = vmul.f32 0.2, %v3288_v14 }
 0x538   :  { %v9097_v31 = vsel %vm3296_vm15, %v3288_v14, %v3304_v30 }
 0x539   :  { %8822 = dma.done.wait [#allocation5 + $0x2], 28672 }
 0x53a   :  { %8823 = vsyncadd [#allocation5 + $0x2], 4294938624 }
 0x53b   :  { %8824 = dma.done.wait [#allocation5 + $0x3], 28672 }
 0x53c   :  { %8825 = vsyncadd [#allocation5 + $0x3], 4294938624  ;;  %v9101_v8 = vpack.c.bf16 %v9031_v28, %v9031_v28  ;;  %v9105_v9 = vpack.c.bf16 %v9050_v40, %v9050_v40  ;;  %v7975_v56 = vld [vmem:[#allocation4 + $0x18c] ss:$28 sps:$4 sm:$0xff]   ;;  %v7981_v34 = vld [vmem:[#allocation4 + $0x154] ss:$28 sps:$4 sm:$0xff]  }
 0x53d   :  { %v7977_v21 = vld [vmem:[#allocation4 + $0x50c] ss:$28 sps:$4 sm:$0xff]   ;;  %6179 = vmatprep.subr.bf16.mxu0 %v7975_v56  ;;  %v7983_v35 = vld [vmem:[#allocation4 + $0x4d4] ss:$28 sps:$4 sm:$0xff]   ;;  %v7987_v40 = vld [vmem:[#allocation4 + $0x11c] ss:$28 sps:$4 sm:$0xff]  }
 0x53e   :  { %6211 = vmatprep.mubr.bf16.mxu0 %v9101_v8  ;;  %6252 = vmatprep.mubr.bf16.mxu1 %v9105_v9  ;;  %v7979_v16 = vld [vmem:[#allocation4 + $0x188] ss:$28 sps:$4 sm:$0xff]   ;;  %v7985_v28 = vld [vmem:[#allocation4 + $0x150] ss:$28 sps:$4 sm:$0xff]   ;;  %v7989_v37 = vld [vmem:[#allocation4 + $0x49c] ss:$28 sps:$4 sm:$0xff]  }
 0x53f   :  { %v7980_v33 = vld [vmem:[#allocation4 + $0x508] ss:$28 sps:$4 sm:$0xff]   ;;  %6220 = vmatprep.subr.bf16.mxu1 %v7977_v21  ;;  %6180 = vmatpush1.bf16.msra.mxu0 %v7979_v16  ;;  %v7986_v36 = vld [vmem:[#allocation4 + $0x4d0] ss:$28 sps:$4 sm:$0xff]   ;;  %v7991_v59 = vld [vmem:[#allocation4 + $0x118] ss:$28 sps:$4 sm:$0xff]  }
 0x540   :  { %6221 = vmatpush1.bf16.msra.mxu1 %v7980_v33  ;;  %6181 = vmatprep.subr.bf16.mxu0 %v7981_v34  ;;  %v7992_v29 = vld [vmem:[#allocation4 + $0x498] ss:$28 sps:$4 sm:$0xff]   ;;  %v7993_v63 = vld [vmem:[#allocation4 + $0xe4] ss:$28 sps:$4 sm:$0xff]   ;;  %v7999_v44 = vld [vmem:[#allocation4 + $0xac] ss:$28 sps:$4 sm:$0xff]  }
 0x541   :  { %6222 = vmatprep.subr.bf16.mxu1 %v7983_v35  ;;  %v7995_v4 = vld [vmem:[#allocation4 + $0x464] ss:$28 sps:$4 sm:$0xff]   ;;  %v8001_v45 = vld [vmem:[#allocation4 + $0x42c] ss:$28 sps:$4 sm:$0xff]   ;;  %v8005_v48 = vld [vmem:[#allocation4 + $0x74] ss:$28 sps:$4 sm:$0xff]  }
 0x542   :  { %v7997_v32 = vld [vmem:[#allocation4 + $0xe0] ss:$28 sps:$4 sm:$0xff]   ;;  %v8003_v46 = vld [vmem:[#allocation4 + $0xa8] ss:$28 sps:$4 sm:$0xff]   ;;  %v8007_v50 = vld [vmem:[#allocation4 + $0x3f4] ss:$28 sps:$4 sm:$0xff]  }
 0x543   :  { %6182 = vmatpush1.bf16.msra.mxu0 %v7985_v28  ;;  %v7998_v43 = vld [vmem:[#allocation4 + $0x460] ss:$28 sps:$4 sm:$0xff]   ;;  %v8004_v47 = vld [vmem:[#allocation4 + $0x428] ss:$28 sps:$4 sm:$0xff]   ;;  %v8009_v3 = vld [vmem:[#allocation4 + $0x70] ss:$28 sps:$4 sm:$0xff]  }
 0x544   :  { %6223 = vmatpush1.bf16.msra.mxu1 %v7986_v36  ;;  %6183 = vmatprep.subr.bf16.mxu0 %v7987_v40  ;;  %v8010_v52 = vld [vmem:[#allocation4 + $0x3f0] ss:$28 sps:$4 sm:$0xff]   ;;  %v8011_v54 = vld [vmem:[#allocation4 + $0x3c] ss:$28 sps:$4 sm:$0xff]   ;;  %v8017_v61 = vld [vmem:[#allocation4 + $0x4] ss:$28 sps:$4 sm:$0xff]  }
 0x545   :  { %6224 = vmatprep.subr.bf16.mxu1 %v7989_v37  ;;  %v8013_v55 = vld [vmem:[#allocation4 + $0x3bc] ss:$28 sps:$4 sm:$0xff]   ;;  %v8019_v49 = vld [vmem:[#allocation4 + $0x384] ss:$28 sps:$4 sm:$0xff]   ;;  %v8023_v7 = vld [vmem:[#allocation4 + $0x34c] ss:$28 sps:$4 sm:$0xff]  }
 0x546   :  { %v8015_v58 = vld [vmem:[#allocation4 + $0x38] ss:$28 sps:$4 sm:$0xff]   ;;  %v8021_v1 = vld [vmem:[#allocation4] ss:$28 sps:$4 sm:$0xff]   ;;  %v8025_v10 = vld [vmem:[#allocation4 + $0x6cc] ss:$28 sps:$4 sm:$0xff]  }
 0x547   :  { %6184 = vmatpush1.bf16.msra.mxu0 %v7991_v59  ;;  %v8016_v42 = vld [vmem:[#allocation4 + $0x3b8] ss:$28 sps:$4 sm:$0xff]   ;;  %v8022_v6 = vld [vmem:[#allocation4 + $0x380] ss:$28 sps:$4 sm:$0xff]   ;;  %v8027_v11 = vld [vmem:[#allocation4 + $0x348] ss:$28 sps:$4 sm:$0xff]  }
 0x548   :  { %6225 = vmatpush1.bf16.msra.mxu1 %v7992_v29  ;;  %6185 = vmatprep.subr.bf16.mxu0 %v7993_v63  ;;  %v8028_v12 = vld [vmem:[#allocation4 + $0x6c8] ss:$28 sps:$4 sm:$0xff]   ;;  %v8029_v13 = vld [vmem:[#allocation4 + $0x314] ss:$28 sps:$4 sm:$0xff]   ;;  %v8035_v19 = vld [vmem:[#allocation4 + $0x2dc] ss:$28 sps:$4 sm:$0xff]  }
 0x549   :  { %6226 = vmatprep.subr.bf16.mxu1 %v7995_v4  ;;  %v8031_v15 = vld [vmem:[#allocation4 + $0x694] ss:$28 sps:$4 sm:$0xff]   ;;  %v8037_v20 = vld [vmem:[#allocation4 + $0x65c] ss:$28 sps:$4 sm:$0xff]   ;;  %v8041_v23 = vld [vmem:[#allocation4 + $0x2a4] ss:$28 sps:$4 sm:$0xff]  }
 0x54a   :  { %v8033_v17 = vld [vmem:[#allocation4 + $0x310] ss:$28 sps:$4 sm:$0xff]   ;;  %v8039_v22 = vld [vmem:[#allocation4 + $0x2d8] ss:$28 sps:$4 sm:$0xff]   ;;  %v8043_v24 = vld [vmem:[#allocation4 + $0x624] ss:$28 sps:$4 sm:$0xff]  }
 0x54b   :  { %6186 = vmatpush1.bf16.msra.mxu0 %v7997_v32  ;;  %v8034_v18 = vld [vmem:[#allocation4 + $0x690] ss:$28 sps:$4 sm:$0xff]   ;;  %v8040_v38 = vld [vmem:[#allocation4 + $0x658] ss:$28 sps:$4 sm:$0xff]   ;;  %v8045_v25 = vld [vmem:[#allocation4 + $0x2a0] ss:$28 sps:$4 sm:$0xff]  }
 0x54c   :  { %6227 = vmatpush1.bf16.msra.mxu1 %v7998_v43  ;;  %6187 = vmatprep.subr.bf16.mxu0 %v7999_v44  ;;  %v8046_v14 = vld [vmem:[#allocation4 + $0x620] ss:$28 sps:$4 sm:$0xff]   ;;  %v8047_v30 = vld [vmem:[#allocation4 + $0x26c] ss:$28 sps:$4 sm:$0xff]   ;;  %v8053_v33 = vld [vmem:[#allocation4 + $0x234] ss:$28 sps:$4 sm:$0xff]  }
 0x54d   :  { %6228 = vmatprep.subr.bf16.mxu1 %v8001_v45  ;;  %v8049_v56 = vld [vmem:[#allocation4 + $0x5ec] ss:$28 sps:$4 sm:$0xff]   ;;  %v8055_v34 = vld [vmem:[#allocation4 + $0x5b4] ss:$28 sps:$4 sm:$0xff]   ;;  %v8059_v36 = vld [vmem:[#allocation4 + $0x1fc] ss:$28 sps:$4 sm:$0xff]   ;;  %v9111_v45 = vpack.c.bf16 %v9029_v26, %v9029_v26  ;;  %v9123_v26 = vpack.c.bf16 %v9097_v31, %v9097_v31 }
 0x54e   :  { %v8051_v21 = vld [vmem:[#allocation4 + $0x268] ss:$28 sps:$4 sm:$0xff]   ;;  %v8057_v35 = vld [vmem:[#allocation4 + $0x230] ss:$28 sps:$4 sm:$0xff]   ;;  %v8061_v40 = vld [vmem:[#allocation4 + $0x57c] ss:$28 sps:$4 sm:$0xff]  }
 0x54f   :  { %6188 = vmatpush1.bf16.msra.mxu0 %v8003_v46  ;;  %v8052_v16 = vld [vmem:[#allocation4 + $0x5e8] ss:$28 sps:$4 sm:$0xff]   ;;  %v8058_v28 = vld [vmem:[#allocation4 + $0x5b0] ss:$28 sps:$4 sm:$0xff]   ;;  %v8063_v37 = vld [vmem:[#allocation4 + $0x1f8] ss:$28 sps:$4 sm:$0xff]   ;;  %v9115_v46 = vpack.c.bf16 %v9045_v0, %v9045_v0 }
 0x550   :  { %6229 = vmatpush1.bf16.msra.mxu1 %v8004_v47  ;;  %6189 = vmatprep.subr.bf16.mxu0 %v8005_v48  ;;  %v8064_v59 = vld [vmem:[#allocation4 + $0x578] ss:$28 sps:$4 sm:$0xff]   ;;  %v8065_v29 = vld [vmem:[#allocation4 + $0x1c4] ss:$28 sps:$4 sm:$0xff]   ;;  %v8073_v43 = vld [vmem:[#allocation4 + $0x88c] ss:$28 sps:$4 sm:$0xff]  }
 0x551   :  { %6230 = vmatprep.subr.bf16.mxu1 %v8007_v50  ;;  %v8067_v63 = vld [vmem:[#allocation4 + $0x544] ss:$28 sps:$4 sm:$0xff]   ;;  %v8076_v44 = vld [vmem:[#allocation4 + $0xc0c] ss:$28 sps:$4 sm:$0xff]   ;;  %v8079_v50 = vld [vmem:[#allocation4 + $0x854] ss:$28 sps:$4 sm:$0xff]  }
 0x552   :  { %v8069_v4 = vld [vmem:[#allocation4 + $0x1c0] ss:$28 sps:$4 sm:$0xff]   ;;  %v8071_v47 = vld [vmem:[#allocation4 + $0x888] ss:$28 sps:$4 sm:$0xff]   ;;  %v8077_v0 = vld [vmem:[#allocation4 + $0x850] ss:$28 sps:$4 sm:$0xff]  }
 0x553   :  { %6190 = vmatpush1.bf16.msra.mxu0 %v8009_v3  ;;  %v8070_v32 = vld [vmem:[#allocation4 + $0x540] ss:$28 sps:$4 sm:$0xff]   ;;  %v8074_v48 = vld [vmem:[#allocation4 + $0xc08] ss:$28 sps:$4 sm:$0xff]   ;;  %v8082_v3 = vld [vmem:[#allocation4 + $0xbd4] ss:$28 sps:$4 sm:$0xff]  }
 0x554   :  { %6231 = vmatpush1.bf16.msra.mxu1 %v8010_v52  ;;  %6191 = vmatprep.subr.bf16.mxu0 %v8011_v54  ;;  %v9119_v52 = vpack.c.bf16 %v9075_v2, %v9075_v2  ;;  %v8080_v54 = vld [vmem:[#allocation4 + $0xbd0] ss:$28 sps:$4 sm:$0xff]   ;;  %v8083_v2 = vld [vmem:[#allocation4 + $0x818] ss:$28 sps:$4 sm:$0xff]   ;;  %v8091_v31 = vld [vmem:[#allocation4 + $0x7e4] ss:$28 sps:$4 sm:$0xff]  }
 0x555   :  { %6232 = vmatprep.subr.bf16.mxu1 %v8013_v55  ;;  %v8085_v55 = vld [vmem:[#allocation4 + $0x81c] ss:$28 sps:$4 sm:$0xff]   ;;  %s8843_s6 = smov [#allocation14]  }
 0x556   :  { %s6851_s17 = sshll.u32 %s8843_s6, 4  ;;  %s6852_s17 = int_to_ptr.vmem [resolvable:$true] %s6851_s17 }
 0x557   :  { %6192 = vmatpush1.bf16.msra.mxu0 %v8015_v58  ;;  %v8088_v58 = vld [vmem:[#allocation4 + $0xb9c] ss:$28 sps:$4 sm:$0xff]   ;;  %s8792_s18 = scalar_lea.vmem %s6852_s17, 896  ;;  %p8797_p13 = scmp.lt.s32.totalorder %s6852_s17, %s6852_s17 }
 0x558   :  { %6233 = vmatpush1.bf16.msra.mxu1 %v8016_v42  ;;  %6193 = vmatprep.subr.bf16.mxu0 %v8017_v61  ;;  %v8086_v42 = vld [vmem:[#allocation4 + $0xb98] ss:$28 sps:$4 sm:$0xff]   ;;  %v8094_v61 = vld [vmem:[#allocation4 + $0xb64] ss:$28 sps:$4 sm:$0xff]   ;;  %p8793_p12 = scmp.ne.s32.totalorder %s6852_s17, %s8792_s18  ;;  %p8798_p0 = scmp.lt.s32.totalorder %s8792_s18, %s8792_s18 }
 0x559   :  { %6234 = vmatprep.subr.bf16.mxu1 %v8019_v49  ;;  %v8089_v49 = vld [vmem:[#allocation4 + $0x7e0] ss:$28 sps:$4 sm:$0xff]  }
 0x55a   :  { %p8799_p1 = por %p8798_p0, %p8797_p13 }
 0x55b   :  { %6194 = vmatpush1.bf16.msra.mxu0 %v8021_v1  ;;  %v8092_v1 = vld [vmem:[#allocation4 + $0xb60] ss:$28 sps:$4 sm:$0xff]  }
 0x55c   :  { %6235 = vmatpush1.bf16.msra.mxu1 %v8022_v6  ;;  %6195 = vmatprep.subr.bf16.mxu0 %v8023_v7  ;;  %v8097_v6 = vld [vmem:[#allocation4 + $0x7ac] ss:$28 sps:$4 sm:$0xff]   ;;  %p8800_p2 = pnand %p8799_p1, %p8793_p12 }
 0x55d   :  { %6236 = vmatprep.subr.bf16.mxu1 %v8025_v10  ;;  %v8100_v7 = vld [vmem:[#allocation4 + $0xb2c] ss:$28 sps:$4 sm:$0xff]  }
 0x55e   :  { %v8095_v10 = vld [vmem:[#allocation4 + $0x7a8] ss:$28 sps:$4 sm:$0xff]  }
 0x55f   :  { %6196 = vmatpush2.bf16.msra.mxu0 %v8027_v11  ;;  %v8098_v11 = vld [vmem:[#allocation4 + $0xb28] ss:$28 sps:$4 sm:$0xff]  }
 0x560   :  { %6237 = vmatpush2.bf16.msra.mxu1 %v8028_v12  ;;  %6197 = vmatprep.subr.bf16.mxu0 %v8029_v13  ;;  %v8103_v12 = vld [vmem:[#allocation4 + $0x774] ss:$28 sps:$4 sm:$0xff]  }
 0x561   :  { %6238 = vmatprep.subr.bf16.mxu1 %v8031_v15  ;;  %v8106_v13 = vld [vmem:[#allocation4 + $0xaf4] ss:$28 sps:$4 sm:$0xff]  }
 0x562   :  { %v8101_v15 = vld [vmem:[#allocation4 + $0x770] ss:$28 sps:$4 sm:$0xff]  }
 0x563   :  { %6198 = vmatpush2.bf16.msra.mxu0 %v8033_v17  ;;  %v8104_v17 = vld [vmem:[#allocation4 + $0xaf0] ss:$28 sps:$4 sm:$0xff]  }
 0x564   :  { %6239 = vmatpush2.bf16.msra.mxu1 %v8034_v18  ;;  %6199 = vmatprep.subr.bf16.mxu0 %v8035_v19  ;;  %v8109_v18 = vld [vmem:[#allocation4 + $0x73c] ss:$28 sps:$4 sm:$0xff]  }
 0x565   :  { %6240 = vmatprep.subr.bf16.mxu1 %v8037_v20  ;;  %v8112_v19 = vld [vmem:[#allocation4 + $0xabc] ss:$28 sps:$4 sm:$0xff]  }
 0x566   :  { %v8107_v20 = vld [vmem:[#allocation4 + $0x738] ss:$28 sps:$4 sm:$0xff]  }
 0x567   :  { %6200 = vmatpush2.bf16.msra.mxu0 %v8039_v22  ;;  %v8110_v22 = vld [vmem:[#allocation4 + $0xab8] ss:$28 sps:$4 sm:$0xff]  }
 0x568   :  { %6241 = vmatpush2.bf16.msra.mxu1 %v8040_v38  ;;  %6201 = vmatprep.subr.bf16.mxu0 %v8041_v23  ;;  %v8115_v38 = vld [vmem:[#allocation4 + $0x704] ss:$28 sps:$4 sm:$0xff]  }
 0x569   :  { %6242 = vmatprep.subr.bf16.mxu1 %v8043_v24  ;;  %v8118_v23 = vld [vmem:[#allocation4 + $0xa84] ss:$28 sps:$4 sm:$0xff]  }
 0x56a   :  { %v8113_v24 = vld [vmem:[#allocation4 + $0x700] ss:$28 sps:$4 sm:$0xff]  }
 0x56b   :  { %6202 = vmatpush2.bf16.msra.mxu0 %v8045_v25  ;;  %v8116_v25 = vld [vmem:[#allocation4 + $0xa80] ss:$28 sps:$4 sm:$0xff]  }
 0x56c   :  { %6243 = vmatpush2.bf16.msra.mxu1 %v8046_v14  ;;  %6203 = vmatprep.subr.bf16.mxu0 %v8047_v30  ;;  %v8121_v14 = vld [vmem:[#allocation4 + $0xa4c] ss:$28 sps:$4 sm:$0xff]  }
 0x56d   :  { %6244 = vmatprep.subr.bf16.mxu1 %v8049_v56  ;;  %v8124_v30 = vld [vmem:[#allocation4 + $0xdcc] ss:$28 sps:$4 sm:$0xff]  }
 0x56e   :  { %v8119_v56 = vld [vmem:[#allocation4 + $0xa48] ss:$28 sps:$4 sm:$0xff]  }
 0x56f   :  { %6204 = vmatpush2.bf16.msra.mxu0 %v8051_v21  ;;  %v8122_v21 = vld [vmem:[#allocation4 + $0xdc8] ss:$28 sps:$4 sm:$0xff]  }
 0x570   :  { %6245 = vmatpush2.bf16.msra.mxu1 %v8052_v16  ;;  %6205 = vmatprep.subr.bf16.mxu0 %v8053_v33  ;;  %v8127_v16 = vld [vmem:[#allocation4 + $0xa14] ss:$28 sps:$4 sm:$0xff]  }
 0x571   :  { %6246 = vmatprep.subr.bf16.mxu1 %v8055_v34  ;;  %v8130_v33 = vld [vmem:[#allocation4 + $0xd94] ss:$28 sps:$4 sm:$0xff]  }
 0x572   :  { %v8125_v34 = vld [vmem:[#allocation4 + $0xa10] ss:$28 sps:$4 sm:$0xff]  }
 0x573   :  { %6206 = vmatpush2.bf16.msra.mxu0 %v8057_v35  ;;  %v8128_v35 = vld [vmem:[#allocation4 + $0xd90] ss:$28 sps:$4 sm:$0xff]  }
 0x574   :  { %6247 = vmatpush2.bf16.msra.mxu1 %v8058_v28  ;;  %6207 = vmatprep.subr.bf16.mxu0 %v8059_v36  ;;  %v8133_v28 = vld [vmem:[#allocation4 + $0x9dc] ss:$28 sps:$4 sm:$0xff]  }
 0x575   :  { %6248 = vmatprep.subr.bf16.mxu1 %v8061_v40  ;;  %v8136_v36 = vld [vmem:[#allocation4 + $0xd5c] ss:$28 sps:$4 sm:$0xff]  }
 0x576   :  { %v8131_v40 = vld [vmem:[#allocation4 + $0x9d8] ss:$28 sps:$4 sm:$0xff]  }
 0x577   :  { %6208 = vmatpush2.bf16.msra.mxu0 %v8063_v37  ;;  %v8134_v37 = vld [vmem:[#allocation4 + $0xd58] ss:$28 sps:$4 sm:$0xff]  }
 0x578   :  { %6249 = vmatpush2.bf16.msra.mxu1 %v8064_v59  ;;  %6209 = vmatprep.subr.bf16.mxu0 %v8065_v29  ;;  %v8139_v59 = vld [vmem:[#allocation4 + $0x9a4] ss:$28 sps:$4 sm:$0xff]  }
 0x579   :  { %6250 = vmatprep.subr.bf16.mxu1 %v8067_v63  ;;  %v8142_v29 = vld [vmem:[#allocation4 + $0xd24] ss:$28 sps:$4 sm:$0xff]  }
 0x57a   :  { %v8137_v63 = vld [vmem:[#allocation4 + $0x9a0] ss:$28 sps:$4 sm:$0xff]  }
 0x57b   :  { %6210 = vmatpush2.bf16.msra.mxu0 %v8069_v4  ;;  %v8140_v4 = vld [vmem:[#allocation4 + $0xd20] ss:$28 sps:$4 sm:$0xff]  }
 0x57c   :  { %6251 = vmatpush2.bf16.msra.mxu1 %v8070_v32  ;;  %6261 = vmatprep.subr.bf16.mxu0 %v8073_v43  ;;  %v8145_v32 = vld [vmem:[#allocation4 + $0x96c] ss:$28 sps:$4 sm:$0xff]  }
 0x57d   :  { %6302 = vmatprep.subr.bf16.mxu1 %v8076_v44  ;;  %v8148_v43 = vld [vmem:[#allocation4 + $0xcec] ss:$28 sps:$4 sm:$0xff]  }
 0x57e   :  { %6212 = vmatmul.mubr.bf16.vlgmr.msra.gmra.mxu0 %v9111_v45  ;;  %v8143_v44 = vld [vmem:[#allocation4 + $0x968] ss:$28 sps:$4 sm:$0xff]  }
 0x57f   :  { %6253 = vmatmul.mubr.bf16.vlgmr.msra.gmra.mxu1 %v9115_v46  ;;  %6262 = vmatpush1.bf16.msra.mxu0 %v8071_v47  ;;  %v8146_v47 = vld [vmem:[#allocation4 + $0xce8] ss:$28 sps:$4 sm:$0xff]  }
 0x580   :  { %6303 = vmatpush1.bf16.msra.mxu1 %v8074_v48  ;;  %6263 = vmatprep.subr.bf16.mxu0 %v8079_v50  ;;  %v8151_v48 = vld [vmem:[#allocation4 + $0x934] ss:$28 sps:$4 sm:$0xff]  }
 0x581   :  { %6304 = vmatprep.subr.bf16.mxu1 %v8082_v3  ;;  %6293 = vmatprep.mubr.bf16.mxu0 %v9119_v52  ;;  %v8154_v50 = vld [vmem:[#allocation4 + $0xcb4] ss:$28 sps:$4 sm:$0xff]  }
 0x582   :  { %6334 = vmatprep.mubr.bf16.mxu1 %v9123_v26  ;;  %v8149_v3 = vld [vmem:[#allocation4 + $0x930] ss:$28 sps:$4 sm:$0xff]  }
 0x583   :  { %6264 = vmatpush1.bf16.msra.mxu0 %v8077_v0  ;;  %v8152_v0 = vld [vmem:[#allocation4 + $0xcb0] ss:$28 sps:$4 sm:$0xff]  }
 0x584   :  { %6305 = vmatpush1.bf16.msra.mxu1 %v8080_v54  ;;  %6265 = vmatprep.subr.bf16.mxu0 %v8085_v55  ;;  %v8157_v54 = vld [vmem:[#allocation4 + $0x8fc] ss:$28 sps:$4 sm:$0xff]  }
 0x585   :  { %6306 = vmatprep.subr.bf16.mxu1 %v8088_v58  ;;  %v8160_v55 = vld [vmem:[#allocation4 + $0xc7c] ss:$28 sps:$4 sm:$0xff]  }
 0x586   :  { %v8155_v58 = vld [vmem:[#allocation4 + $0x8f8] ss:$28 sps:$4 sm:$0xff]  }
 0x587   :  { %6266 = vmatpush1.bf16.msra.mxu0 %v8083_v2  ;;  %v8158_v2 = vld [vmem:[#allocation4 + $0xc78] ss:$28 sps:$4 sm:$0xff]  }
 0x588   :  { %6307 = vmatpush1.bf16.msra.mxu1 %v8086_v42  ;;  %6267 = vmatprep.subr.bf16.mxu0 %v8091_v31  ;;  %v8163_v42 = vld [vmem:[#allocation4 + $0x8c4] ss:$28 sps:$4 sm:$0xff]  }
 0x589   :  { %6308 = vmatprep.subr.bf16.mxu1 %v8094_v61  ;;  %v8166_v31 = vld [vmem:[#allocation4 + $0xc44] ss:$28 sps:$4 sm:$0xff]  }
 0x58a   :  { %v8161_v61 = vld [vmem:[#allocation4 + $0x8c0] ss:$28 sps:$4 sm:$0xff]  }
 0x58b   :  { %6268 = vmatpush1.bf16.msra.mxu0 %v8089_v49  ;;  %v8164_v49 = vld [vmem:[#allocation4 + $0xc40] ss:$28 sps:$4 sm:$0xff]  }
 0x58c   :  { %6309 = vmatpush1.bf16.msra.mxu1 %v8092_v1  ;;  %6269 = vmatprep.subr.bf16.mxu0 %v8097_v6  ;;  %v8169_v1 = vld [vmem:[#allocation4 + $0x194] ss:$28 sps:$4 sm:$0xff]  }
 0x58d   :  { %6310 = vmatprep.subr.bf16.mxu1 %v8100_v7  ;;  %v8172_v6 = vld [vmem:[#allocation4 + $0x514] ss:$28 sps:$4 sm:$0xff]   ;;  %v9131_v7 = vpack.c.bf16 %v9073_v62, %v9073_v62  ;;  %v8181_v62 = vld [vmem:[#allocation4 + $0x124] ss:$28 sps:$4 sm:$0xff]  }
 0x58f   :  { %6270 = vmatpush1.bf16.msra.mxu0 %v8095_v10  ;;  %v9135_v10 = vpack.c.bf16 %v9095_v27, %v9095_v27  ;;  %v8184_v27 = vld [vmem:[#allocation4 + $0x4a4] ss:$28 sps:$4 sm:$0xff]  }
 0x590   :  { %6311 = vmatpush1.bf16.msra.mxu1 %v8098_v11  ;;  %6271 = vmatprep.subr.bf16.mxu0 %v8103_v12  ;;  %v8167_v11 = vld [vmem:[#allocation4 + $0x190] ss:$28 sps:$4 sm:$0xff]  }
 0x591   :  { %6312 = vmatprep.subr.bf16.mxu1 %v8106_v13  ;;  %v8170_v12 = vld [vmem:[#allocation4 + $0x510] ss:$28 sps:$4 sm:$0xff]   ;;  %v8175_v13 = vld [vmem:[#allocation4 + $0x15c] ss:$28 sps:$4 sm:$0xff]  }
 0x593   :  { %6272 = vmatpush1.bf16.msra.mxu0 %v8101_v15  ;;  %v8178_v15 = vld [vmem:[#allocation4 + $0x4dc] ss:$28 sps:$4 sm:$0xff]  }
 0x594   :  { %6313 = vmatpush1.bf16.msra.mxu1 %v8104_v17  ;;  %6273 = vmatprep.subr.bf16.mxu0 %v8109_v18  ;;  %v8173_v17 = vld [vmem:[#allocation4 + $0x158] ss:$28 sps:$4 sm:$0xff]  }
 0x595   :  { %6314 = vmatprep.subr.bf16.mxu1 %v8112_v19  ;;  %v8176_v18 = vld [vmem:[#allocation4 + $0x4d8] ss:$28 sps:$4 sm:$0xff]   ;;  %v8179_v19 = vld [vmem:[#allocation4 + $0x120] ss:$28 sps:$4 sm:$0xff]  }
 0x597   :  { %6274 = vmatpush1.bf16.msra.mxu0 %v8107_v20  ;;  %v8182_v20 = vld [vmem:[#allocation4 + $0x4a0] ss:$28 sps:$4 sm:$0xff]  }
 0x598   :  { %6315 = vmatpush1.bf16.msra.mxu1 %v8110_v22  ;;  %6275 = vmatprep.subr.bf16.mxu0 %v8115_v38  ;;  %v8187_v22 = vld [vmem:[#allocation4 + $0xec] ss:$28 sps:$4 sm:$0xff]  }
 0x599   :  { %6316 = vmatprep.subr.bf16.mxu1 %v8118_v23  ;;  %v8190_v38 = vld [vmem:[#allocation4 + $0x46c] ss:$28 sps:$4 sm:$0xff]  }
 0x59a   :  { %v8185_v23 = vld [vmem:[#allocation4 + $0xe8] ss:$28 sps:$4 sm:$0xff]  }
 0x59b   :  { %6276 = vmatpush1.bf16.msra.mxu0 %v8113_v24  ;;  %v8188_v24 = vld [vmem:[#allocation4 + $0x468] ss:$28 sps:$4 sm:$0xff]  }
 0x59c   :  { %6317 = vmatpush1.bf16.msra.mxu1 %v8116_v25  ;;  %6277 = vmatprep.subr.bf16.mxu0 %v8121_v14  ;;  %v8193_v25 = vld [vmem:[#allocation4 + $0xb4] ss:$28 sps:$4 sm:$0xff]  }
 0x59d   :  { %6318 = vmatprep.subr.bf16.mxu1 %v8124_v30  ;;  %v8196_v14 = vld [vmem:[#allocation4 + $0x434] ss:$28 sps:$4 sm:$0xff]  }
 0x59e   :  { %v8191_v30 = vld [vmem:[#allocation4 + $0xb0] ss:$28 sps:$4 sm:$0xff]  }
 0x59f   :  { %6278 = vmatpush2.bf16.msra.mxu0 %v8119_v56  ;;  %v8194_v56 = vld [vmem:[#allocation4 + $0x430] ss:$28 sps:$4 sm:$0xff]  }
 0x5a0   :  { %6319 = vmatpush2.bf16.msra.mxu1 %v8122_v21  ;;  %6279 = vmatprep.subr.bf16.mxu0 %v8127_v16  ;;  %v8199_v21 = vld [vmem:[#allocation4 + $0x7c] ss:$28 sps:$4 sm:$0xff]  }
 0x5a1   :  { %6320 = vmatprep.subr.bf16.mxu1 %v8130_v33  ;;  %v8202_v16 = vld [vmem:[#allocation4 + $0x3fc] ss:$28 sps:$4 sm:$0xff]  }
 0x5a2   :  { %v8197_v33 = vld [vmem:[#allocation4 + $0x78] ss:$28 sps:$4 sm:$0xff]  }
 0x5a3   :  { %6280 = vmatpush2.bf16.msra.mxu0 %v8125_v34  ;;  %v8200_v34 = vld [vmem:[#allocation4 + $0x3f8] ss:$28 sps:$4 sm:$0xff]  }
 0x5a4   :  { %6321 = vmatpush2.bf16.msra.mxu1 %v8128_v35  ;;  %6281 = vmatprep.subr.bf16.mxu0 %v8133_v28  ;;  %v8205_v35 = vld [vmem:[#allocation4 + $0x44] ss:$28 sps:$4 sm:$0xff]  }
 0x5a5   :  { %6322 = vmatprep.subr.bf16.mxu1 %v8136_v36  ;;  %v8208_v28 = vld [vmem:[#allocation4 + $0x3c4] ss:$28 sps:$4 sm:$0xff]  }
 0x5a6   :  { %v8203_v36 = vld [vmem:[#allocation4 + $0x40] ss:$28 sps:$4 sm:$0xff]  }
 0x5a7   :  { %6282 = vmatpush2.bf16.msra.mxu0 %v8131_v40  ;;  %v8206_v40 = vld [vmem:[#allocation4 + $0x3c0] ss:$28 sps:$4 sm:$0xff]  }
 0x5a8   :  { %6323 = vmatpush2.bf16.msra.mxu1 %v8134_v37  ;;  %6283 = vmatprep.subr.bf16.mxu0 %v8139_v59  ;;  %v8211_v37 = vld [vmem:[#allocation4 + $0xc] ss:$28 sps:$4 sm:$0xff]  }
 0x5a9   :  { %6324 = vmatprep.subr.bf16.mxu1 %v8142_v29  ;;  %v8214_v59 = vld [vmem:[#allocation4 + $0x38c] ss:$28 sps:$4 sm:$0xff]  }
 0x5aa   :  { %v8209_v29 = vld [vmem:[#allocation4 + $0x8] ss:$28 sps:$4 sm:$0xff]  }
 0x5ab   :  { %6284 = vmatpush2.bf16.msra.mxu0 %v8137_v63  ;;  %v8212_v63 = vld [vmem:[#allocation4 + $0x388] ss:$28 sps:$4 sm:$0xff]  }
 0x5ac   :  { %6325 = vmatpush2.bf16.msra.mxu1 %v8140_v4  ;;  %6285 = vmatprep.subr.bf16.mxu0 %v8145_v32  ;;  %v8217_v4 = vld [vmem:[#allocation4 + $0x354] ss:$28 sps:$4 sm:$0xff]  }
 0x5ad   :  { %6326 = vmatprep.subr.bf16.mxu1 %v8148_v43  ;;  %v8220_v32 = vld [vmem:[#allocation4 + $0x6d4] ss:$28 sps:$4 sm:$0xff]  }
 0x5ae   :  { %v8215_v43 = vld [vmem:[#allocation4 + $0x350] ss:$28 sps:$4 sm:$0xff]  }
 0x5af   :  { %6286 = vmatpush2.bf16.msra.mxu0 %v8143_v44  ;;  %v8218_v44 = vld [vmem:[#allocation4 + $0x6d0] ss:$28 sps:$4 sm:$0xff]  }
 0x5b0   :  { %6327 = vmatpush2.bf16.msra.mxu1 %v8146_v47  ;;  %6287 = vmatprep.subr.bf16.mxu0 %v8151_v48  ;;  %v8223_v47 = vld [vmem:[#allocation4 + $0x31c] ss:$28 sps:$4 sm:$0xff]  }
 0x5b1   :  { %6328 = vmatprep.subr.bf16.mxu1 %v8154_v50  ;;  %v8226_v48 = vld [vmem:[#allocation4 + $0x69c] ss:$28 sps:$4 sm:$0xff]  }
 0x5b2   :  { %v8221_v50 = vld [vmem:[#allocation4 + $0x318] ss:$28 sps:$4 sm:$0xff]  }
 0x5b3   :  { %6288 = vmatpush2.bf16.msra.mxu0 %v8149_v3  ;;  %v8224_v3 = vld [vmem:[#allocation4 + $0x698] ss:$28 sps:$4 sm:$0xff]  }
 0x5b4   :  { %6329 = vmatpush2.bf16.msra.mxu1 %v8152_v0  ;;  %6289 = vmatprep.subr.bf16.mxu0 %v8157_v54  ;;  %v8229_v0 = vld [vmem:[#allocation4 + $0x2e4] ss:$28 sps:$4 sm:$0xff]  }
 0x5b5   :  { %6330 = vmatprep.subr.bf16.mxu1 %v8160_v55  ;;  %v8232_v54 = vld [vmem:[#allocation4 + $0x664] ss:$28 sps:$4 sm:$0xff]  }
 0x5b6   :  { %v8227_v55 = vld [vmem:[#allocation4 + $0x2e0] ss:$28 sps:$4 sm:$0xff]  }
 0x5b7   :  { %6290 = vmatpush2.bf16.msra.mxu0 %v8155_v58  ;;  %v8230_v58 = vld [vmem:[#allocation4 + $0x660] ss:$28 sps:$4 sm:$0xff]  }
 0x5b8   :  { %6331 = vmatpush2.bf16.msra.mxu1 %v8158_v2  ;;  %6291 = vmatprep.subr.bf16.mxu0 %v8163_v42  ;;  %v8235_v2 = vld [vmem:[#allocation4 + $0x2ac] ss:$28 sps:$4 sm:$0xff]  }
 0x5b9   :  { %6332 = vmatprep.subr.bf16.mxu1 %v8166_v31  ;;  %v8238_v42 = vld [vmem:[#allocation4 + $0x62c] ss:$28 sps:$4 sm:$0xff]  }
 0x5ba   :  { %v8233_v31 = vld [vmem:[#allocation4 + $0x2a8] ss:$28 sps:$4 sm:$0xff]  }
 0x5bb   :  { %6292 = vmatpush2.bf16.msra.mxu0 %v8161_v61  ;;  %v8236_v61 = vld [vmem:[#allocation4 + $0x628] ss:$28 sps:$4 sm:$0xff]  }
 0x5bc   :  { %6333 = vmatpush2.bf16.msra.mxu1 %v8164_v49  ;;  %6343 = vmatprep.subr.bf16.mxu0 %v8169_v1  ;;  %v8241_v49 = vld [vmem:[#allocation4 + $0x274] ss:$28 sps:$4 sm:$0xff]  }
 0x5bd   :  { %6384 = vmatprep.subr.bf16.mxu1 %v8172_v6  ;;  %v8244_v1 = vld [vmem:[#allocation4 + $0x5f4] ss:$28 sps:$4 sm:$0xff]  }
 0x5be   :  { %6294 = vmatmul.mubr.bf16.vlgmr.msra.gmra.mxu0 %v9131_v7  ;;  %v8239_v6 = vld [vmem:[#allocation4 + $0x270] ss:$28 sps:$4 sm:$0xff]  }
 0x5bf   :  { %6335 = vmatmul.mubr.bf16.vlgmr.msra.gmra.mxu1 %v9135_v10  ;;  %6344 = vmatpush1.bf16.msra.mxu0 %v8167_v11  ;;  %v8242_v11 = vld [vmem:[#allocation4 + $0x5f0] ss:$28 sps:$4 sm:$0xff]  }
 0x5c0   :  { %6385 = vmatpush1.bf16.msra.mxu1 %v8170_v12  ;;  %6345 = vmatprep.subr.bf16.mxu0 %v8175_v13  ;;  %v8247_v12 = vld [vmem:[#allocation4 + $0x23c] ss:$28 sps:$4 sm:$0xff]  }
 0x5c1   :  { %6386 = vmatprep.subr.bf16.mxu1 %v8178_v15  ;;  %6375 = vmatprep.mubr.bf16.mxu0 %v9101_v8  ;;  %v8250_v13 = vld [vmem:[#allocation4 + $0x5bc] ss:$28 sps:$4 sm:$0xff]  }
 0x5c2   :  { %6416 = vmatprep.mubr.bf16.mxu1 %v9105_v9  ;;  %v8245_v15 = vld [vmem:[#allocation4 + $0x238] ss:$28 sps:$4 sm:$0xff]  }
 0x5c3   :  { %6346 = vmatpush1.bf16.msra.mxu0 %v8173_v17  ;;  %v8248_v17 = vld [vmem:[#allocation4 + $0x5b8] ss:$28 sps:$4 sm:$0xff]  }
 0x5c4   :  { %6387 = vmatpush1.bf16.msra.mxu1 %v8176_v18  ;;  %6347 = vmatprep.subr.bf16.mxu0 %v8181_v62  ;;  %v8253_v18 = vld [vmem:[#allocation4 + $0x204] ss:$28 sps:$4 sm:$0xff]  }
 0x5c5   :  { %6388 = vmatprep.subr.bf16.mxu1 %v8184_v27  ;;  %v8256_v62 = vld [vmem:[#allocation4 + $0x584] ss:$28 sps:$4 sm:$0xff]  }
 0x5c6   :  { %v8251_v27 = vld [vmem:[#allocation4 + $0x200] ss:$28 sps:$4 sm:$0xff]  }
 0x5c7   :  { %6348 = vmatpush1.bf16.msra.mxu0 %v8179_v19  ;;  %v8254_v19 = vld [vmem:[#allocation4 + $0x580] ss:$28 sps:$4 sm:$0xff]  }
 0x5c8   :  { %6389 = vmatpush1.bf16.msra.mxu1 %v8182_v20  ;;  %6349 = vmatprep.subr.bf16.mxu0 %v8187_v22  ;;  %v8259_v20 = vld [vmem:[#allocation4 + $0x1cc] ss:$28 sps:$4 sm:$0xff]  }
 0x5c9   :  { %6390 = vmatprep.subr.bf16.mxu1 %v8190_v38  ;;  %v8262_v22 = vld [vmem:[#allocation4 + $0x54c] ss:$28 sps:$4 sm:$0xff]  }
 0x5ca   :  { %v8257_v38 = vld [vmem:[#allocation4 + $0x1c8] ss:$28 sps:$4 sm:$0xff]  }
 0x5cb   :  { %6350 = vmatpush1.bf16.msra.mxu0 %v8185_v23  ;;  %v8260_v23 = vld [vmem:[#allocation4 + $0x548] ss:$28 sps:$4 sm:$0xff]  }
 0x5cc   :  { %6391 = vmatpush1.bf16.msra.mxu1 %v8188_v24  ;;  %6351 = vmatprep.subr.bf16.mxu0 %v8193_v25  ;;  %v8265_v24 = vld [vmem:[#allocation4 + $0x894] ss:$28 sps:$4 sm:$0xff]  }
 0x5cd   :  { %6392 = vmatprep.subr.bf16.mxu1 %v8196_v14  ;;  %v8268_v25 = vld [vmem:[#allocation4 + $0xc14] ss:$28 sps:$4 sm:$0xff]  }
 0x5ce   :  { %v8263_v14 = vld [vmem:[#allocation4 + $0x890] ss:$28 sps:$4 sm:$0xff]  }
 0x5cf   :  { %6352 = vmatpush1.bf16.msra.mxu0 %v8191_v30  ;;  %v8266_v30 = vld [vmem:[#allocation4 + $0xc10] ss:$28 sps:$4 sm:$0xff]  }
 0x5d0   :  { %6393 = vmatpush1.bf16.msra.mxu1 %v8194_v56  ;;  %6353 = vmatprep.subr.bf16.mxu0 %v8199_v21  ;;  %v8271_v56 = vld [vmem:[#allocation4 + $0x85c] ss:$28 sps:$4 sm:$0xff]  }
 0x5d1   :  { %6394 = vmatprep.subr.bf16.mxu1 %v8202_v16  ;;  %v8274_v21 = vld [vmem:[#allocation4 + $0xbdc] ss:$28 sps:$4 sm:$0xff]  }
 0x5d2   :  { %v8269_v16 = vld [vmem:[#allocation4 + $0x858] ss:$28 sps:$4 sm:$0xff]  }
 0x5d3   :  { %6354 = vmatpush1.bf16.msra.mxu0 %v8197_v33  ;;  %v8272_v33 = vld [vmem:[#allocation4 + $0xbd8] ss:$28 sps:$4 sm:$0xff]  }
 0x5d4   :  { %6395 = vmatpush1.bf16.msra.mxu1 %v8200_v34  ;;  %6355 = vmatprep.subr.bf16.mxu0 %v8205_v35  ;;  %v8277_v34 = vld [vmem:[#allocation4 + $0x824] ss:$28 sps:$4 sm:$0xff]  }
 0x5d5   :  { %6396 = vmatprep.subr.bf16.mxu1 %v8208_v28  ;;  %v8280_v35 = vld [vmem:[#allocation4 + $0xba4] ss:$28 sps:$4 sm:$0xff]  }
 0x5d6   :  { %v8275_v28 = vld [vmem:[#allocation4 + $0x820] ss:$28 sps:$4 sm:$0xff]  }
 0x5d7   :  { %6356 = vmatpush1.bf16.msra.mxu0 %v8203_v36  ;;  %v8278_v36 = vld [vmem:[#allocation4 + $0xba0] ss:$28 sps:$4 sm:$0xff]  }
 0x5d8   :  { %6397 = vmatpush1.bf16.msra.mxu1 %v8206_v40  ;;  %6357 = vmatprep.subr.bf16.mxu0 %v8211_v37  ;;  %v8283_v40 = vld [vmem:[#allocation4 + $0x7ec] ss:$28 sps:$4 sm:$0xff]  }
 0x5d9   :  { %6398 = vmatprep.subr.bf16.mxu1 %v8214_v59  ;;  %v8286_v37 = vld [vmem:[#allocation4 + $0xb6c] ss:$28 sps:$4 sm:$0xff]  }
 0x5da   :  { %v8281_v59 = vld [vmem:[#allocation4 + $0x7e8] ss:$28 sps:$4 sm:$0xff]  }
 0x5db   :  { %6358 = vmatpush1.bf16.msra.mxu0 %v8209_v29  ;;  %v8284_v29 = vld [vmem:[#allocation4 + $0xb68] ss:$28 sps:$4 sm:$0xff]  }
 0x5dc   :  { %6399 = vmatpush1.bf16.msra.mxu1 %v8212_v63  ;;  %6359 = vmatprep.subr.bf16.mxu0 %v8217_v4  ;;  %v8289_v63 = vld [vmem:[#allocation4 + $0x7b4] ss:$28 sps:$4 sm:$0xff]  }
 0x5dd   :  { %6400 = vmatprep.subr.bf16.mxu1 %v8220_v32  ;;  %v8292_v4 = vld [vmem:[#allocation4 + $0xb34] ss:$28 sps:$4 sm:$0xff]  }
 0x5de   :  { %v8287_v32 = vld [vmem:[#allocation4 + $0x7b0] ss:$28 sps:$4 sm:$0xff]  }
 0x5df   :  { %6360 = vmatpush2.bf16.msra.mxu0 %v8215_v43  ;;  %v8290_v43 = vld [vmem:[#allocation4 + $0xb30] ss:$28 sps:$4 sm:$0xff]  }
 0x5e0   :  { %6401 = vmatpush2.bf16.msra.mxu1 %v8218_v44  ;;  %6361 = vmatprep.subr.bf16.mxu0 %v8223_v47  ;;  %v8295_v44 = vld [vmem:[#allocation4 + $0x77c] ss:$28 sps:$4 sm:$0xff]  }
 0x5e1   :  { %6402 = vmatprep.subr.bf16.mxu1 %v8226_v48  ;;  %v8298_v47 = vld [vmem:[#allocation4 + $0xafc] ss:$28 sps:$4 sm:$0xff]  }
 0x5e2   :  { %v8293_v48 = vld [vmem:[#allocation4 + $0x778] ss:$28 sps:$4 sm:$0xff]  }
 0x5e3   :  { %6362 = vmatpush2.bf16.msra.mxu0 %v8221_v50  ;;  %v8296_v50 = vld [vmem:[#allocation4 + $0xaf8] ss:$28 sps:$4 sm:$0xff]  }
 0x5e4   :  { %6403 = vmatpush2.bf16.msra.mxu1 %v8224_v3  ;;  %6363 = vmatprep.subr.bf16.mxu0 %v8229_v0  ;;  %v8301_v3 = vld [vmem:[#allocation4 + $0x744] ss:$28 sps:$4 sm:$0xff]  }
 0x5e5   :  { %6404 = vmatprep.subr.bf16.mxu1 %v8232_v54  ;;  %v8304_v0 = vld [vmem:[#allocation4 + $0xac4] ss:$28 sps:$4 sm:$0xff]  }
 0x5e6   :  { %v8299_v54 = vld [vmem:[#allocation4 + $0x740] ss:$28 sps:$4 sm:$0xff]  }
 0x5e7   :  { %6364 = vmatpush2.bf16.msra.mxu0 %v8227_v55  ;;  %v8302_v55 = vld [vmem:[#allocation4 + $0xac0] ss:$28 sps:$4 sm:$0xff]  }
 0x5e8   :  { %6405 = vmatpush2.bf16.msra.mxu1 %v8230_v58  ;;  %6365 = vmatprep.subr.bf16.mxu0 %v8235_v2  ;;  %v8307_v58 = vld [vmem:[#allocation4 + $0x70c] ss:$28 sps:$4 sm:$0xff]  }
 0x5e9   :  { %6406 = vmatprep.subr.bf16.mxu1 %v8238_v42  ;;  %v8310_v2 = vld [vmem:[#allocation4 + $0xa8c] ss:$28 sps:$4 sm:$0xff]  }
 0x5ea   :  { %v8305_v42 = vld [vmem:[#allocation4 + $0x708] ss:$28 sps:$4 sm:$0xff]  }
 0x5eb   :  { %6366 = vmatpush2.bf16.msra.mxu0 %v8233_v31  ;;  %v8308_v31 = vld [vmem:[#allocation4 + $0xa88] ss:$28 sps:$4 sm:$0xff]  }
 0x5ec   :  { %6407 = vmatpush2.bf16.msra.mxu1 %v8236_v61  ;;  %6367 = vmatprep.subr.bf16.mxu0 %v8241_v49  ;;  %v8313_v61 = vld [vmem:[#allocation4 + $0xa54] ss:$28 sps:$4 sm:$0xff]  }
 0x5ed   :  { %6408 = vmatprep.subr.bf16.mxu1 %v8244_v1  ;;  %v8316_v49 = vld [vmem:[#allocation4 + $0xdd4] ss:$28 sps:$4 sm:$0xff]  }
 0x5ee   :  { %v8311_v1 = vld [vmem:[#allocation4 + $0xa50] ss:$28 sps:$4 sm:$0xff]  }
 0x5ef   :  { %6368 = vmatpush2.bf16.msra.mxu0 %v8239_v6  ;;  %v8314_v6 = vld [vmem:[#allocation4 + $0xdd0] ss:$28 sps:$4 sm:$0xff]  }
 0x5f0   :  { %6409 = vmatpush2.bf16.msra.mxu1 %v8242_v11  ;;  %6369 = vmatprep.subr.bf16.mxu0 %v8247_v12  ;;  %v8319_v11 = vld [vmem:[#allocation4 + $0xa1c] ss:$28 sps:$4 sm:$0xff]  }
 0x5f1   :  { %6410 = vmatprep.subr.bf16.mxu1 %v8250_v13  ;;  %v8322_v12 = vld [vmem:[#allocation4 + $0xd9c] ss:$28 sps:$4 sm:$0xff]  }
 0x5f2   :  { %v8317_v13 = vld [vmem:[#allocation4 + $0xa18] ss:$28 sps:$4 sm:$0xff]  }
 0x5f3   :  { %6370 = vmatpush2.bf16.msra.mxu0 %v8245_v15  ;;  %v8320_v15 = vld [vmem:[#allocation4 + $0xd98] ss:$28 sps:$4 sm:$0xff]  }
 0x5f4   :  { %6411 = vmatpush2.bf16.msra.mxu1 %v8248_v17  ;;  %6371 = vmatprep.subr.bf16.mxu0 %v8253_v18  ;;  %v8325_v17 = vld [vmem:[#allocation4 + $0x9e4] ss:$28 sps:$4 sm:$0xff]  }
 0x5f5   :  { %6412 = vmatprep.subr.bf16.mxu1 %v8256_v62  ;;  %v8328_v18 = vld [vmem:[#allocation4 + $0xd64] ss:$28 sps:$4 sm:$0xff]  }
 0x5f6   :  { %v8323_v62 = vld [vmem:[#allocation4 + $0x9e0] ss:$28 sps:$4 sm:$0xff]  }
 0x5f7   :  { %6372 = vmatpush2.bf16.msra.mxu0 %v8251_v27  ;;  %v8326_v27 = vld [vmem:[#allocation4 + $0xd60] ss:$28 sps:$4 sm:$0xff]  }
 0x5f8   :  { %6413 = vmatpush2.bf16.msra.mxu1 %v8254_v19  ;;  %6373 = vmatprep.subr.bf16.mxu0 %v8259_v20  ;;  %v8331_v19 = vld [vmem:[#allocation4 + $0x9ac] ss:$28 sps:$4 sm:$0xff]  }
 0x5f9   :  { %6414 = vmatprep.subr.bf16.mxu1 %v8262_v22  ;;  %v8334_v20 = vld [vmem:[#allocation4 + $0xd2c] ss:$28 sps:$4 sm:$0xff]  }
 0x5fa   :  { %v8329_v22 = vld [vmem:[#allocation4 + $0x9a8] ss:$28 sps:$4 sm:$0xff]  }
 0x5fb   :  { %6374 = vmatpush2.bf16.msra.mxu0 %v8257_v38  ;;  %v8332_v38 = vld [vmem:[#allocation4 + $0xd28] ss:$28 sps:$4 sm:$0xff]  }
 0x5fc   :  { %6415 = vmatpush2.bf16.msra.mxu1 %v8260_v23  ;;  %6425 = vmatprep.subr.bf16.mxu0 %v8265_v24  ;;  %v8337_v23 = vld [vmem:[#allocation4 + $0x974] ss:$28 sps:$4 sm:$0xff]  }
 0x5fd   :  { %6466 = vmatprep.subr.bf16.mxu1 %v8268_v25  ;;  %v8340_v24 = vld [vmem:[#allocation4 + $0xcf4] ss:$28 sps:$4 sm:$0xff]  }
 0x5fe   :  { %6376 = vmatmul.mubr.bf16.vlgmr.msra.gmra.mxu0 %v9111_v45  ;;  %v8335_v25 = vld [vmem:[#allocation4 + $0x970] ss:$28 sps:$4 sm:$0xff]  }
 0x5ff   :  { %6417 = vmatmul.mubr.bf16.vlgmr.msra.gmra.mxu1 %v9115_v46  ;;  %6426 = vmatpush1.bf16.msra.mxu0 %v8263_v14  ;;  %v8338_v14 = vld [vmem:[#allocation4 + $0xcf0] ss:$28 sps:$4 sm:$0xff]  }
 0x600   :  { %6467 = vmatpush1.bf16.msra.mxu1 %v8266_v30  ;;  %6427 = vmatprep.subr.bf16.mxu0 %v8271_v56  ;;  %v8343_v30 = vld [vmem:[#allocation4 + $0x93c] ss:$28 sps:$4 sm:$0xff]  }
 0x601   :  { %6468 = vmatprep.subr.bf16.mxu1 %v8274_v21  ;;  %6457 = vmatprep.mubr.bf16.mxu0 %v9119_v52  ;;  %v8346_v56 = vld [vmem:[#allocation4 + $0xcbc] ss:$28 sps:$4 sm:$0xff]  }
 0x602   :  { %6498 = vmatprep.mubr.bf16.mxu1 %v9123_v26  ;;  %v8341_v21 = vld [vmem:[#allocation4 + $0x938] ss:$28 sps:$4 sm:$0xff]  }
 0x603   :  { %6428 = vmatpush1.bf16.msra.mxu0 %v8269_v16  ;;  %v8344_v16 = vld [vmem:[#allocation4 + $0xcb8] ss:$28 sps:$4 sm:$0xff]  }
 0x604   :  { %6469 = vmatpush1.bf16.msra.mxu1 %v8272_v33  ;;  %6429 = vmatprep.subr.bf16.mxu0 %v8277_v34  ;;  %v8349_v33 = vld [vmem:[#allocation4 + $0x904] ss:$28 sps:$4 sm:$0xff]  }
 0x605   :  { %6470 = vmatprep.subr.bf16.mxu1 %v8280_v35  ;;  %v8352_v34 = vld [vmem:[#allocation4 + $0xc84] ss:$28 sps:$4 sm:$0xff]  }
 0x606   :  { %v8347_v35 = vld [vmem:[#allocation4 + $0x900] ss:$28 sps:$4 sm:$0xff]  }
 0x607   :  { %6430 = vmatpush1.bf16.msra.mxu0 %v8275_v28  ;;  %v8350_v28 = vld [vmem:[#allocation4 + $0xc80] ss:$28 sps:$4 sm:$0xff]  }
 0x608   :  { %6471 = vmatpush1.bf16.msra.mxu1 %v8278_v36  ;;  %6431 = vmatprep.subr.bf16.mxu0 %v8283_v40  ;;  %v8355_v36 = vld [vmem:[#allocation4 + $0x8cc] ss:$28 sps:$4 sm:$0xff]  }
 0x609   :  { %6472 = vmatprep.subr.bf16.mxu1 %v8286_v37  ;;  %v8358_v40 = vld [vmem:[#allocation4 + $0xc4c] ss:$28 sps:$4 sm:$0xff]  }
 0x60a   :  { %v8353_v37 = vld [vmem:[#allocation4 + $0x8c8] ss:$28 sps:$4 sm:$0xff]  }
 0x60b   :  { %6432 = vmatpush1.bf16.msra.mxu0 %v8281_v59  ;;  %v8356_v59 = vld [vmem:[#allocation4 + $0xc48] ss:$28 sps:$4 sm:$0xff]  }
 0x60c   :  { %6473 = vmatpush1.bf16.msra.mxu1 %v8284_v29  ;;  %6433 = vmatprep.subr.bf16.mxu0 %v8289_v63  ;;  %v8361_v29 = vld [vmem:[#allocation4 + $0x19c] ss:$28 sps:$4 sm:$0xff]  }
 0x60d   :  { %6474 = vmatprep.subr.bf16.mxu1 %v8292_v4  ;;  %v8364_v63 = vld [vmem:[#allocation4 + $0x51c] ss:$28 sps:$4 sm:$0xff]  }
 0x60e   :  { %v8359_v4 = vld [vmem:[#allocation4 + $0x198] ss:$28 sps:$4 sm:$0xff]  }
 0x60f   :  { %6434 = vmatpush1.bf16.msra.mxu0 %v8287_v32  ;;  %v8362_v32 = vld [vmem:[#allocation4 + $0x518] ss:$28 sps:$4 sm:$0xff]  }
 0x610   :  { %6475 = vmatpush1.bf16.msra.mxu1 %v8290_v43  ;;  %6435 = vmatprep.subr.bf16.mxu0 %v8295_v44  ;;  %v8367_v43 = vld [vmem:[#allocation4 + $0x164] ss:$28 sps:$4 sm:$0xff]  }
 0x611   :  { %6476 = vmatprep.subr.bf16.mxu1 %v8298_v47  ;;  %v8370_v44 = vld [vmem:[#allocation4 + $0x4e4] ss:$28 sps:$4 sm:$0xff]  }
 0x612   :  { %v8365_v47 = vld [vmem:[#allocation4 + $0x160] ss:$28 sps:$4 sm:$0xff]  }
 0x613   :  { %6436 = vmatpush1.bf16.msra.mxu0 %v8293_v48 }
 0x614   :  { %6477 = vmatpush1.bf16.msra.mxu1 %v8296_v50  ;;  %6437 = vmatprep.subr.bf16.mxu0 %v8301_v3  ;;  %v8368_v3 = vld [vmem:[#allocation4 + $0x4e0] ss:$28 sps:$4 sm:$0xff]  }
 0x615   :  { %6478 = vmatprep.subr.bf16.mxu1 %v8304_v0  ;;  %v8373_v0 = vld [vmem:[#allocation4 + $0x12c] ss:$28 sps:$4 sm:$0xff]  }
 0x617   :  { %6438 = vmatpush1.bf16.msra.mxu0 %v8299_v54 }
 0x618   :  { %6479 = vmatpush1.bf16.msra.mxu1 %v8302_v55  ;;  %6439 = vmatprep.subr.bf16.mxu0 %v8307_v58  ;;  %v8376_v58 = vld [vmem:[#allocation4 + $0x4ac] ss:$28 sps:$4 sm:$0xff]  }
 0x619   :  { %6480 = vmatprep.subr.bf16.mxu1 %v8310_v2  ;;  %v8371_v2 = vld [vmem:[#allocation4 + $0x128] ss:$28 sps:$4 sm:$0xff]  }
 0x61b   :  { %6440 = vmatpush1.bf16.msra.mxu0 %v8305_v42 }
 0x61c   :  { %6481 = vmatpush1.bf16.msra.mxu1 %v8308_v31  ;;  %6441 = vmatprep.subr.bf16.mxu0 %v8313_v61  ;;  %v8374_v61 = vld [vmem:[#allocation4 + $0x4a8] ss:$28 sps:$4 sm:$0xff]  }
 0x61d   :  { %6482 = vmatprep.subr.bf16.mxu1 %v8316_v49  ;;  %v8379_v49 = vld [vmem:[#allocation4 + $0xf4] ss:$28 sps:$4 sm:$0xff]  }
 0x61f   :  { %6442 = vmatpush2.bf16.msra.mxu0 %v8311_v1 }
 0x620   :  { %6483 = vmatpush2.bf16.msra.mxu1 %v8314_v6  ;;  %6443 = vmatprep.subr.bf16.mxu0 %v8319_v11  ;;  %v8382_v11 = vld [vmem:[#allocation4 + $0x474] ss:$28 sps:$4 sm:$0xff]  }
 0x621   :  { %6484 = vmatprep.subr.bf16.mxu1 %v8322_v12  ;;  %v8377_v12 = vld [vmem:[#allocation4 + $0xf0] ss:$28 sps:$4 sm:$0xff]  }
 0x623   :  { %6444 = vmatpush2.bf16.msra.mxu0 %v8317_v13  ;;  %v8380_v13 = vld [vmem:[#allocation4 + $0x470] ss:$28 sps:$4 sm:$0xff]  }
 0x624   :  { %6485 = vmatpush2.bf16.msra.mxu1 %v8320_v15  ;;  %6445 = vmatprep.subr.bf16.mxu0 %v8325_v17  ;;  %v8385_v15 = vld [vmem:[#allocation4 + $0xbc] ss:$28 sps:$4 sm:$0xff]  }
 0x625   :  { %6486 = vmatprep.subr.bf16.mxu1 %v8328_v18  ;;  %v8388_v17 = vld [vmem:[#allocation4 + $0x43c] ss:$28 sps:$4 sm:$0xff]  }
 0x626   :  { %v8383_v18 = vld [vmem:[#allocation4 + $0xb8] ss:$28 sps:$4 sm:$0xff]  }
 0x627   :  { %6446 = vmatpush2.bf16.msra.mxu0 %v8323_v62  ;;  %v8386_v62 = vld [vmem:[#allocation4 + $0x438] ss:$28 sps:$4 sm:$0xff]  }
 0x628   :  { %6487 = vmatpush2.bf16.msra.mxu1 %v8326_v27  ;;  %6447 = vmatprep.subr.bf16.mxu0 %v8331_v19  ;;  %v8391_v27 = vld [vmem:[#allocation4 + $0x84] ss:$28 sps:$4 sm:$0xff]  }
 0x629   :  { %6488 = vmatprep.subr.bf16.mxu1 %v8334_v20  ;;  %v8394_v19 = vld [vmem:[#allocation4 + $0x404] ss:$28 sps:$4 sm:$0xff]  }
 0x62a   :  { %v8389_v20 = vld [vmem:[#allocation4 + $0x80] ss:$28 sps:$4 sm:$0xff]  }
 0x62b   :  { %6448 = vmatpush2.bf16.msra.mxu0 %v8329_v22  ;;  %v8392_v22 = vld [vmem:[#allocation4 + $0x400] ss:$28 sps:$4 sm:$0xff]  }
 0x62c   :  { %6489 = vmatpush2.bf16.msra.mxu1 %v8332_v38  ;;  %6449 = vmatprep.subr.bf16.mxu0 %v8337_v23  ;;  %v8397_v38 = vld [vmem:[#allocation4 + $0x4c] ss:$28 sps:$4 sm:$0xff]  }
 0x62d   :  { %6490 = vmatprep.subr.bf16.mxu1 %v8340_v24  ;;  %v8400_v23 = vld [vmem:[#allocation4 + $0x3cc] ss:$28 sps:$4 sm:$0xff]  }
 0x62e   :  { %v8395_v24 = vld [vmem:[#allocation4 + $0x48] ss:$28 sps:$4 sm:$0xff]  }
 0x62f   :  { %6450 = vmatpush2.bf16.msra.mxu0 %v8335_v25  ;;  %v8398_v25 = vld [vmem:[#allocation4 + $0x3c8] ss:$28 sps:$4 sm:$0xff]  }
 0x630   :  { %6491 = vmatpush2.bf16.msra.mxu1 %v8338_v14  ;;  %6451 = vmatprep.subr.bf16.mxu0 %v8343_v30  ;;  %v8403_v14 = vld [vmem:[#allocation4 + $0x14] ss:$28 sps:$4 sm:$0xff]  }
 0x631   :  { %6492 = vmatprep.subr.bf16.mxu1 %v8346_v56  ;;  %v8406_v30 = vld [vmem:[#allocation4 + $0x394] ss:$28 sps:$4 sm:$0xff]  }
 0x632   :  { %v8401_v56 = vld [vmem:[#allocation4 + $0x10] ss:$28 sps:$4 sm:$0xff]  }
 0x633   :  { %6452 = vmatpush2.bf16.msra.mxu0 %v8341_v21  ;;  %v8404_v21 = vld [vmem:[#allocation4 + $0x390] ss:$28 sps:$4 sm:$0xff]  }
 0x634   :  { %6493 = vmatpush2.bf16.msra.mxu1 %v8344_v16  ;;  %6453 = vmatprep.subr.bf16.mxu0 %v8349_v33  ;;  %v8409_v16 = vld [vmem:[#allocation4 + $0x35c] ss:$28 sps:$4 sm:$0xff]  }
 0x635   :  { %6494 = vmatprep.subr.bf16.mxu1 %v8352_v34  ;;  %v8412_v33 = vld [vmem:[#allocation4 + $0x6dc] ss:$28 sps:$4 sm:$0xff]  }
 0x636   :  { %v8407_v34 = vld [vmem:[#allocation4 + $0x358] ss:$28 sps:$4 sm:$0xff]  }
 0x637   :  { %6454 = vmatpush2.bf16.msra.mxu0 %v8347_v35  ;;  %v8410_v35 = vld [vmem:[#allocation4 + $0x6d8] ss:$28 sps:$4 sm:$0xff]  }
 0x638   :  { %6495 = vmatpush2.bf16.msra.mxu1 %v8350_v28  ;;  %6455 = vmatprep.subr.bf16.mxu0 %v8355_v36  ;;  %v8415_v28 = vld [vmem:[#allocation4 + $0x324] ss:$28 sps:$4 sm:$0xff]  }
 0x639   :  { %6496 = vmatprep.subr.bf16.mxu1 %v8358_v40  ;;  %v8418_v36 = vld [vmem:[#allocation4 + $0x6a4] ss:$28 sps:$4 sm:$0xff]  }
 0x63a   :  { %v8413_v40 = vld [vmem:[#allocation4 + $0x320] ss:$28 sps:$4 sm:$0xff]  }
 0x63b   :  { %6456 = vmatpush2.bf16.msra.mxu0 %v8353_v37  ;;  %v8416_v37 = vld [vmem:[#allocation4 + $0x6a0] ss:$28 sps:$4 sm:$0xff]  }
 0x63c   :  { %6497 = vmatpush2.bf16.msra.mxu1 %v8356_v59  ;;  %6507 = vmatprep.subr.bf16.mxu0 %v8361_v29  ;;  %v8421_v59 = vld [vmem:[#allocation4 + $0x2ec] ss:$28 sps:$4 sm:$0xff]  }
 0x63d   :  { %6548 = vmatprep.subr.bf16.mxu1 %v8364_v63  ;;  %v8424_v29 = vld [vmem:[#allocation4 + $0x66c] ss:$28 sps:$4 sm:$0xff]  }
 0x63e   :  { %v9145_v48 = vpop.f32.mrf.mxu0  ;;  %6458 = vmatmul.mubr.bf16.vlgmr.msra.gmra.mxu0 %v9131_v7  ;;  %v8419_v63 = vld [vmem:[#allocation4 + $0x2e8] ss:$28 sps:$4 sm:$0xff]  }
 0x63f   :  { %v9147_v50 = vpop.f32.mrf.mxu1  ;;  %6499 = vmatmul.mubr.bf16.vlgmr.msra.gmra.mxu1 %v9135_v10  ;;  %6508 = vmatpush1.bf16.msra.mxu0 %v8359_v4  ;;  %v8422_v4 = vld [vmem:[#allocation4 + $0x668] ss:$28 sps:$4 sm:$0xff]  }
 0x640   :  { %6549 = vmatpush1.bf16.msra.mxu1 %v8362_v32  ;;  %v9151_v54 = vpop.f32.mrf.mxu0  ;;  %6509 = vmatprep.subr.bf16.mxu0 %v8367_v43  ;;  %v8427_v32 = vld [vmem:[#allocation4 + $0x2b4] ss:$28 sps:$4 sm:$0xff]  }
 0x641   :  { %v9153_v55 = vpop.f32.mrf.mxu1  ;;  %6550 = vmatprep.subr.bf16.mxu1 %v8370_v44  ;;  %6539 = vmatprep.mubr.bf16.mxu0 %v9101_v8  ;;  %v8430_v43 = vld [vmem:[#allocation4 + $0x634] ss:$28 sps:$4 sm:$0xff]  }
 0x642   :  { %6580 = vmatprep.mubr.bf16.mxu1 %v9105_v9  ;;  %v6217_v42 = vpop.f32.mrf.mxu0  ;;  %v8425_v44 = vld [vmem:[#allocation4 + $0x2b0] ss:$28 sps:$4 sm:$0xff]  }
 0x643   :  { %v6258_v31 = vpop.f32.mrf.mxu1  ;;  %6510 = vmatpush1.bf16.msra.mxu0 %v8365_v47  ;;  %v8428_v47 = vld [vmem:[#allocation4 + $0x630] ss:$28 sps:$4 sm:$0xff]   ;;  %v8439_v42 = vld [vmem:[#allocation4 + $0x244] ss:$28 sps:$4 sm:$0xff]  }
 0x644   :  { %6551 = vmatpush1.bf16.msra.mxu1 %v8368_v3  ;;  %v6218_v1 = vpop.f32.mrf.mxu0  ;;  %6511 = vmatprep.subr.bf16.mxu0 %v8373_v0  ;;  %v8433_v3 = vld [vmem:[#allocation4 + $0x27c] ss:$28 sps:$4 sm:$0xff]   ;;  %v8442_v31 = vld [vmem:[#allocation4 + $0x5c4] ss:$28 sps:$4 sm:$0xff]  }
 0x645   :  { %v6259_v6 = vpop.f32.mrf.mxu1  ;;  %6552 = vmatprep.subr.bf16.mxu1 %v8376_v58  ;;  %v8436_v0 = vld [vmem:[#allocation4 + $0x5fc] ss:$28 sps:$4 sm:$0xff]   ;;  %v8445_v1 = vld [vmem:[#allocation4 + $0x20c] ss:$28 sps:$4 sm:$0xff]  }
 0x646   :  { %v8431_v58 = vld [vmem:[#allocation4 + $0x278] ss:$28 sps:$4 sm:$0xff]  }
 0x647   :  { %6512 = vmatpush1.bf16.msra.mxu0 %v8371_v2  ;;  %v8434_v2 = vld [vmem:[#allocation4 + $0x5f8] ss:$28 sps:$4 sm:$0xff]  }
 0x648   :  { %6553 = vmatpush1.bf16.msra.mxu1 %v8374_v61  ;;  %6513 = vmatprep.subr.bf16.mxu0 %v8379_v49  ;;  %v8437_v61 = vld [vmem:[#allocation4 + $0x240] ss:$28 sps:$4 sm:$0xff]   ;;  %v9157_v6 = vld [vmem:[#allocation12 + $0x2b] sm:$0xff] }
 0x649   :  { %6554 = vmatprep.subr.bf16.mxu1 %v8382_v11  ;;  %v8440_v49 = vld [vmem:[#allocation4 + $0x5c0] ss:$28 sps:$4 sm:$0xff]   ;;  %v8448_v11 = vld [vmem:[#allocation4 + $0x58c] ss:$28 sps:$4 sm:$0xff]  }
 0x64b   :  { %6514 = vmatpush1.bf16.msra.mxu0 %v8377_v12  ;;  %v8443_v12 = vld [vmem:[#allocation4 + $0x208] ss:$28 sps:$4 sm:$0xff]  }
 0x64c   :  { %6555 = vmatpush1.bf16.msra.mxu1 %v8380_v13  ;;  %6515 = vmatprep.subr.bf16.mxu0 %v8385_v15  ;;  %v8446_v13 = vld [vmem:[#allocation4 + $0x588] ss:$28 sps:$4 sm:$0xff]   ;;  %v8451_v15 = vld [vmem:[#allocation4 + $0x1d4] ss:$28 sps:$4 sm:$0xff]  }
 0x64d   :  { %6556 = vmatprep.subr.bf16.mxu1 %v8388_v17  ;;  %v8454_v17 = vld [vmem:[#allocation4 + $0x554] ss:$28 sps:$4 sm:$0xff]  }
 0x64f   :  { %6516 = vmatpush1.bf16.msra.mxu0 %v8383_v18  ;;  %v3843_v18 = vrot.slane %v9157_v6, %v8918_v39  ;;  %v8463_v39 = vld [vmem:[#allocation4 + $0x864] ss:$28 sps:$4 sm:$0xff]  }
 0x650   :  { %6557 = vmatpush1.bf16.msra.mxu1 %v8386_v62  ;;  %6517 = vmatprep.subr.bf16.mxu0 %v8391_v27  ;;  %v8449_v62 = vld [vmem:[#allocation4 + $0x1d0] ss:$28 sps:$4 sm:$0xff]  }
 0x651   :  { %6558 = vmatprep.subr.bf16.mxu1 %v8394_v19  ;;  %v8452_v27 = vld [vmem:[#allocation4 + $0x550] ss:$28 sps:$4 sm:$0xff]   ;;  %v3847_v19 = vrot.slane %v9157_v6, %v8921_v41 }
 0x653   :  { %6518 = vmatpush1.bf16.msra.mxu0 %v8389_v20  ;;  %v8457_v20 = vld [vmem:[#allocation4 + $0x89c] ss:$28 sps:$4 sm:$0xff]  }
 0x654   :  { %6559 = vmatpush1.bf16.msra.mxu1 %v8392_v22  ;;  %6519 = vmatprep.subr.bf16.mxu0 %v8397_v38  ;;  %v8460_v22 = vld [vmem:[#allocation4 + $0xc1c] ss:$28 sps:$4 sm:$0xff]   ;;  %v6214_v38 = vadd.f32 %v9145_v48, %v3843_v18  ;;  %v8499_v18 = vld [vmem:[#allocation4 + $0x714] ss:$28 sps:$4 sm:$0xff]  }
 0x655   :  { %6560 = vmatprep.subr.bf16.mxu1 %v8400_v23  ;;  %v6216_v23 = vadd.f32 %v9151_v54, %v3847_v19  ;;  %v8461_v54 = vld [vmem:[#allocation4 + $0x860] ss:$28 sps:$4 sm:$0xff]   ;;  %v8500_v19 = vld [vmem:[#allocation4 + $0xa90] ss:$28 sps:$4 sm:$0xff]  }
 0x656   :  { %v6255_v41 = vadd.f32 %v9147_v50, %v6214_v38  ;;  %v8503_v38 = vld [vmem:[#allocation4 + $0xa58] ss:$28 sps:$4 sm:$0xff]  }
 0x657   :  { %6520 = vmatpush1.bf16.msra.mxu0 %v8395_v24  ;;  %v8455_v24 = vld [vmem:[#allocation4 + $0x898] ss:$28 sps:$4 sm:$0xff]   ;;  %v6257_v48 = vadd.f32 %v9153_v55, %v6216_v23 }
 0x658   :  { %6561 = vmatpush1.bf16.msra.mxu1 %v8398_v25  ;;  %6521 = vmatprep.subr.bf16.mxu0 %v8403_v14  ;;  %v8458_v25 = vld [vmem:[#allocation4 + $0xc18] ss:$28 sps:$4 sm:$0xff]   ;;  %v8466_v14 = vld [vmem:[#allocation4 + $0xbe4] ss:$28 sps:$4 sm:$0xff]  }
 0x659   :  { %6562 = vmatprep.subr.bf16.mxu1 %v8406_v30  ;;  %v8506_v23 = vld [vmem:[#allocation4 + $0xdd8] ss:$28 sps:$4 sm:$0xff]  }
 0x65b   :  { %6522 = vmatpush1.bf16.msra.mxu0 %v8401_v56 }
 0x65c   :  { %6563 = vmatpush1.bf16.msra.mxu1 %v8404_v21  ;;  %6523 = vmatprep.subr.bf16.mxu0 %v8409_v16  ;;  %v8464_v16 = vld [vmem:[#allocation4 + $0xbe0] ss:$28 sps:$4 sm:$0xff]  }
 0x65d   :  { %6564 = vmatprep.subr.bf16.mxu1 %v8412_v33 }
 0x65f   :  { %6524 = vmatpush2.bf16.msra.mxu0 %v8407_v34 }
 0x660   :  { %6565 = vmatpush2.bf16.msra.mxu1 %v8410_v35  ;;  %6525 = vmatprep.subr.bf16.mxu0 %v8415_v28  ;;  %v8469_v35 = vld [vmem:[#allocation4 + $0x82c] ss:$28 sps:$4 sm:$0xff]  }
 0x661   :  { %6566 = vmatprep.subr.bf16.mxu1 %v8418_v36  ;;  %v8472_v28 = vld [vmem:[#allocation4 + $0xbac] ss:$28 sps:$4 sm:$0xff]  }
 0x663   :  { %6526 = vmatpush2.bf16.msra.mxu0 %v8413_v40 }
 0x664   :  { %6567 = vmatpush2.bf16.msra.mxu1 %v8416_v37  ;;  %6527 = vmatprep.subr.bf16.mxu0 %v8421_v59  ;;  %v8467_v59 = vld [vmem:[#allocation4 + $0x828] ss:$28 sps:$4 sm:$0xff]  }
 0x665   :  { %6568 = vmatprep.subr.bf16.mxu1 %v8424_v29  ;;  %v8470_v29 = vld [vmem:[#allocation4 + $0xba8] ss:$28 sps:$4 sm:$0xff]  }
 0x667   :  { %6528 = vmatpush2.bf16.msra.mxu0 %v8419_v63 }
 0x668   :  { %6569 = vmatpush2.bf16.msra.mxu1 %v8422_v4  ;;  %6529 = vmatprep.subr.bf16.mxu0 %v8427_v32  ;;  %v8475_v32 = vld [vmem:[#allocation4 + $0x7f4] ss:$28 sps:$4 sm:$0xff]  }
 0x669   :  { %6570 = vmatprep.subr.bf16.mxu1 %v8430_v43  ;;  %v8478_v43 = vld [vmem:[#allocation4 + $0xb74] ss:$28 sps:$4 sm:$0xff]  }
 0x66b   :  { %6530 = vmatpush2.bf16.msra.mxu0 %v8425_v44  ;;  %v8473_v44 = vld [vmem:[#allocation4 + $0x7f0] ss:$28 sps:$4 sm:$0xff]  }
 0x66c   :  { %6571 = vmatpush2.bf16.msra.mxu1 %v8428_v47  ;;  %6531 = vmatprep.subr.bf16.mxu0 %v8433_v3  ;;  %v8476_v47 = vld [vmem:[#allocation4 + $0xb70] ss:$28 sps:$4 sm:$0xff]   ;;  %v8481_v3 = vld [vmem:[#allocation4 + $0x7bc] ss:$28 sps:$4 sm:$0xff]  }
 0x66d   :  { %6572 = vmatprep.subr.bf16.mxu1 %v8436_v0  ;;  %v8484_v0 = vld [vmem:[#allocation4 + $0xb3c] ss:$28 sps:$4 sm:$0xff]  }
 0x66f   :  { %6532 = vmatpush2.bf16.msra.mxu0 %v8431_v58  ;;  %v8479_v58 = vld [vmem:[#allocation4 + $0x7b8] ss:$28 sps:$4 sm:$0xff]  }
 0x670   :  { %6573 = vmatpush2.bf16.msra.mxu1 %v8434_v2  ;;  %6533 = vmatprep.subr.bf16.mxu0 %v8439_v42  ;;  %v8482_v2 = vld [vmem:[#allocation4 + $0xb38] ss:$28 sps:$4 sm:$0xff]   ;;  %v8487_v42 = vld [vmem:[#allocation4 + $0x784] ss:$28 sps:$4 sm:$0xff]  }
 0x671   :  { %6574 = vmatprep.subr.bf16.mxu1 %v8442_v31  ;;  %v8490_v31 = vld [vmem:[#allocation4 + $0xb04] ss:$28 sps:$4 sm:$0xff]  }
 0x673   :  { %6534 = vmatpush2.bf16.msra.mxu0 %v8437_v61  ;;  %v8485_v61 = vld [vmem:[#allocation4 + $0x780] ss:$28 sps:$4 sm:$0xff]  }
 0x674   :  { %6575 = vmatpush2.bf16.msra.mxu1 %v8440_v49  ;;  %6535 = vmatprep.subr.bf16.mxu0 %v8445_v1  ;;  %v8488_v49 = vld [vmem:[#allocation4 + $0xb00] ss:$28 sps:$4 sm:$0xff]  }
 0x675   :  { %6576 = vmatprep.subr.bf16.mxu1 %v8448_v11  ;;  %v8493_v11 = vld [vmem:[#allocation4 + $0x74c] ss:$28 sps:$4 sm:$0xff]  }
 0x677   :  { %6536 = vmatpush2.bf16.msra.mxu0 %v8443_v12  ;;  %v8496_v12 = vld [vmem:[#allocation4 + $0xacc] ss:$28 sps:$4 sm:$0xff]  }
 0x678   :  { %6577 = vmatpush2.bf16.msra.mxu1 %v8446_v13  ;;  %6537 = vmatprep.subr.bf16.mxu0 %v8451_v15  ;;  %v8491_v15 = vld [vmem:[#allocation4 + $0x748] ss:$28 sps:$4 sm:$0xff]  }
 0x679   :  { %6578 = vmatprep.subr.bf16.mxu1 %v8454_v17  ;;  %v8494_v17 = vld [vmem:[#allocation4 + $0xac8] ss:$28 sps:$4 sm:$0xff]  }
 0x67b   :  { %6538 = vmatpush2.bf16.msra.mxu0 %v8449_v62  ;;  %v8502_v62 = vld [vmem:[#allocation4 + $0xa94] ss:$28 sps:$4 sm:$0xff]  }
 0x67c   :  { %6579 = vmatpush2.bf16.msra.mxu1 %v8452_v27  ;;  %6589 = vmatprep.subr.bf16.mxu0 %v8457_v20  ;;  %v8497_v27 = vld [vmem:[#allocation4 + $0x710] ss:$28 sps:$4 sm:$0xff]   ;;  %v8505_v20 = vld [vmem:[#allocation4 + $0xa5c] ss:$28 sps:$4 sm:$0xff]  }
 0x67d   :  { %6630 = vmatprep.subr.bf16.mxu1 %v8460_v22  ;;  %v8508_v22 = vld [vmem:[#allocation4 + $0xddc] ss:$28 sps:$4 sm:$0xff]  }
 0x67e   :  { %v6295_v30 = vpop.f32.mrf.mxu0  ;;  %6540 = vmatmul.mubr.bf16.vlgmr.msra.gmra.mxu0 %v9111_v45 }
 0x67f   :  { %v6336_v56 = vpop.f32.mrf.mxu1  ;;  %6581 = vmatmul.mubr.bf16.vlgmr.msra.gmra.mxu1 %v9115_v46  ;;  %v6296_v21 = vadd.f32 %v6295_v30, %v6255_v41  ;;  %6590 = vmatpush1.bf16.msra.mxu0 %v8455_v24  ;;  %v8511_v24 = vld [vmem:[#allocation4 + $0xa24] ss:$28 sps:$4 sm:$0xff]   ;;  %v8517_v41 = vld [vmem:[#allocation4 + $0x9ec] ss:$28 sps:$4 sm:$0xff]  }
 0x680   :  { %6631 = vmatpush1.bf16.msra.mxu1 %v8458_v25  ;;  %v6297_v33 = vpop.f32.mrf.mxu0  ;;  %6591 = vmatprep.subr.bf16.mxu0 %v8463_v39  ;;  %v8514_v25 = vld [vmem:[#allocation4 + $0xda4] ss:$28 sps:$4 sm:$0xff]   ;;  %v8520_v30 = vld [vmem:[#allocation4 + $0xd6c] ss:$28 sps:$4 sm:$0xff]  }
 0x681   :  { %v6338_v34 = vpop.f32.mrf.mxu1  ;;  %6632 = vmatprep.subr.bf16.mxu1 %v8466_v14  ;;  %v6337_v50 = vadd.f32 %v6336_v56, %v6296_v21  ;;  %v6298_v36 = vadd.f32 %v6297_v33, %v6257_v48  ;;  %6621 = vmatprep.mubr.bf16.mxu0 %v9119_v52  ;;  %v8509_v39 = vld [vmem:[#allocation4 + $0xa20] ss:$28 sps:$4 sm:$0xff]   ;;  %v8515_v56 = vld [vmem:[#allocation4 + $0x9e8] ss:$28 sps:$4 sm:$0xff]   ;;  %v8523_v21 = vld [vmem:[#allocation4 + $0x9b4] ss:$28 sps:$4 sm:$0xff]  }
 0x682   :  { %6662 = vmatprep.mubr.bf16.mxu1 %v9123_v26  ;;  %v6299_v40 = vpop.f32.mrf.mxu0  ;;  %v8512_v14 = vld [vmem:[#allocation4 + $0xda0] ss:$28 sps:$4 sm:$0xff]   ;;  %v8518_v48 = vld [vmem:[#allocation4 + $0xd68] ss:$28 sps:$4 sm:$0xff]   ;;  %v8524_v33 = vld [vmem:[#allocation4 + $0xd30] ss:$28 sps:$4 sm:$0xff]  }
 0x683   :  { %v6340_v37 = vpop.f32.mrf.mxu1  ;;  %8615 = vtanh.f32 %v6337_v50  ;;  %v6339_v55 = vadd.f32 %v6338_v34, %v6298_v36  ;;  %6592 = vmatpush1.bf16.msra.mxu0 %v8461_v54  ;;  %v8526_v54 = vld [vmem:[#allocation4 + $0xd34] ss:$28 sps:$4 sm:$0xff]   ;;  %v8529_v34 = vld [vmem:[#allocation4 + $0x97c] ss:$28 sps:$4 sm:$0xff]   ;;  %v8535_v36 = vld [vmem:[#allocation4 + $0x944] ss:$28 sps:$4 sm:$0xff]  }
 0x684   :  { %6633 = vmatpush1.bf16.msra.mxu1 %v8464_v16  ;;  %v6300_v63 = vpop.f32.mrf.mxu0  ;;  %6593 = vmatprep.subr.bf16.mxu0 %v8469_v35  ;;  %v8521_v16 = vld [vmem:[#allocation4 + $0x9b0] ss:$28 sps:$4 sm:$0xff]   ;;  %v8532_v35 = vld [vmem:[#allocation4 + $0xcfc] ss:$28 sps:$4 sm:$0xff]   ;;  %v8538_v40 = vld [vmem:[#allocation4 + $0xcc4] ss:$28 sps:$4 sm:$0xff]  }
 0x685   :  { %v6341_v4 = vpop.f32.mrf.mxu1  ;;  %6634 = vmatprep.subr.bf16.mxu1 %v8472_v28  ;;  %8617 = vtanh.f32 %v6339_v55  ;;  %v8527_v28 = vld [vmem:[#allocation4 + $0x978] ss:$28 sps:$4 sm:$0xff]   ;;  %v8533_v37 = vld [vmem:[#allocation4 + $0x940] ss:$28 sps:$4 sm:$0xff]   ;;  %v8539_v63 = vld [vmem:[#allocation4 + $0x908] ss:$28 sps:$4 sm:$0xff]  }
 0x686   :  { %v8530_v50 = vld [vmem:[#allocation4 + $0xcf8] ss:$28 sps:$4 sm:$0xff]   ;;  %v8536_v55 = vld [vmem:[#allocation4 + $0xcc0] ss:$28 sps:$4 sm:$0xff]   ;;  %v8542_v4 = vld [vmem:[#allocation4 + $0xc88] ss:$28 sps:$4 sm:$0xff]  }
 0x687   :  { %6594 = vmatpush1.bf16.msra.mxu0 %v8467_v59  ;;  %v8541_v59 = vld [vmem:[#allocation4 + $0x90c] ss:$28 sps:$4 sm:$0xff]  }
 0x688   :  { %6635 = vmatpush1.bf16.msra.mxu1 %v8470_v29  ;;  %6595 = vmatprep.subr.bf16.mxu0 %v8475_v32  ;;  %v8544_v29 = vld [vmem:[#allocation4 + $0xc8c] ss:$28 sps:$4 sm:$0xff]   ;;  %v8547_v32 = vld [vmem:[#allocation4 + $0x8d4] ss:$28 sps:$4 sm:$0xff]  }
 0x689   :  { %6636 = vmatprep.subr.bf16.mxu1 %v8478_v43  ;;  %v8550_v43 = vld [vmem:[#allocation4 + $0xc54] ss:$28 sps:$4 sm:$0xff]  }
 0x68b   :  { %6596 = vmatpush1.bf16.msra.mxu0 %v8473_v44  ;;  %v8545_v44 = vld [vmem:[#allocation4 + $0x8d0] ss:$28 sps:$4 sm:$0xff]  }
 0x68c   :  { %6637 = vmatpush1.bf16.msra.mxu1 %v8476_v47  ;;  %6597 = vmatprep.subr.bf16.mxu0 %v8481_v3  ;;  %v8548_v47 = vld [vmem:[#allocation4 + $0xc50] ss:$28 sps:$4 sm:$0xff]   ;;  %v8551_v3 = vld [vmem:[#allocation4 + $0x360] ss:$28 sps:$4 sm:$0xff]  }
 0x68d   :  { %6638 = vmatprep.subr.bf16.mxu1 %v8484_v0  ;;  %v8552_v0 = vld [vmem:[#allocation4 + $0x6e0] ss:$28 sps:$4 sm:$0xff]  }
 0x68f   :  { %6598 = vmatpush1.bf16.msra.mxu0 %v8479_v58  ;;  %v8553_v58 = vld [vmem:[#allocation4 + $0x1a0] ss:$28 sps:$4 sm:$0xff]  }
 0x690   :  { %6639 = vmatpush1.bf16.msra.mxu1 %v8482_v2  ;;  %v8616_v1 = vpop.eup %8615  ;;  %6599 = vmatprep.subr.bf16.mxu0 %v8487_v42  ;;  %v8554_v2 = vld [vmem:[#allocation4 + $0x520] ss:$28 sps:$4 sm:$0xff]   ;;  %v8555_v42 = vld [vmem:[#allocation4 + $0x328] ss:$28 sps:$4 sm:$0xff]  }
 0x691   :  { %6640 = vmatprep.subr.bf16.mxu1 %v8490_v31  ;;  %6838 = vst [vmem:[#allocation14] sm:$0xff] %v8616_v1  ;;  %v8556_v31 = vld [vmem:[#allocation4 + $0x6a8] ss:$28 sps:$4 sm:$0xff]  }
 0x692   :  { %v8618_v13 = vpop.eup %8617  ;;  %v8557_v1 = vld [vmem:[#allocation4 + $0x168] ss:$28 sps:$4 sm:$0xff]  }
 0x693   :  { %6839 = vst [vmem:[#allocation14 + $0x8] sm:$0xff] %v8618_v13  ;;  %6600 = vmatpush1.bf16.msra.mxu0 %v8485_v61 }
 0x694   :  { %6641 = vmatpush1.bf16.msra.mxu1 %v8488_v49  ;;  %6601 = vmatprep.subr.bf16.mxu0 %v8493_v11  ;;  %v8558_v11 = vld [vmem:[#allocation4 + $0x4e8] ss:$28 sps:$4 sm:$0xff]  }
 0x695   :  { %6642 = vmatprep.subr.bf16.mxu1 %v8496_v12 }
 0x697   :  { %6602 = vmatpush1.bf16.msra.mxu0 %v8491_v15  ;;  %v8559_v15 = vld [vmem:[#allocation4 + $0x2f0] ss:$28 sps:$4 sm:$0xff]  }
 0x698   :  { %6643 = vmatpush1.bf16.msra.mxu1 %v8494_v17  ;;  %6603 = vmatprep.subr.bf16.mxu0 %v8499_v18  ;;  %v8560_v17 = vld [vmem:[#allocation4 + $0x670] ss:$28 sps:$4 sm:$0xff]  }
 0x699   :  { %6644 = vmatprep.subr.bf16.mxu1 %v8502_v62 }
 0x69b   :  { %6604 = vmatpush1.bf16.msra.mxu0 %v8497_v27  ;;  %v8561_v27 = vld [vmem:[#allocation4 + $0x130] ss:$28 sps:$4 sm:$0xff]  }
 0x69c   :  { %6645 = vmatpush1.bf16.msra.mxu1 %v8500_v19  ;;  %6605 = vmatprep.subr.bf16.mxu0 %v8505_v20  ;;  %v8562_v19 = vld [vmem:[#allocation4 + $0x4b0] ss:$28 sps:$4 sm:$0xff]  }
 0x69d   :  { %6646 = vmatprep.subr.bf16.mxu1 %v8508_v22 }
 0x69f   :  { %6606 = vmatpush2.bf16.msra.mxu0 %v8503_v38  ;;  %v8563_v38 = vld [vmem:[#allocation4 + $0x2b8] ss:$28 sps:$4 sm:$0xff]  }
 0x6a0   :  { %6647 = vmatpush2.bf16.msra.mxu1 %v8506_v23  ;;  %6607 = vmatprep.subr.bf16.mxu0 %v8511_v24  ;;  %v8564_v23 = vld [vmem:[#allocation4 + $0x638] ss:$28 sps:$4 sm:$0xff]  }
 0x6a1   :  { %6648 = vmatprep.subr.bf16.mxu1 %v8514_v25  ;;  %v8565_v24 = vld [vmem:[#allocation4 + $0xf8] ss:$28 sps:$4 sm:$0xff]  }
 0x6a2   :  { %v8566_v25 = vld [vmem:[#allocation4 + $0x478] ss:$28 sps:$4 sm:$0xff]  }
 0x6a3   :  { %6608 = vmatpush2.bf16.msra.mxu0 %v8509_v39  ;;  %v8569_v39 = vld [vmem:[#allocation4 + $0xc0] ss:$28 sps:$4 sm:$0xff]  }
 0x6a4   :  { %6649 = vmatpush2.bf16.msra.mxu1 %v8512_v14  ;;  %6609 = vmatprep.subr.bf16.mxu0 %v8517_v41  ;;  %v8570_v14 = vld [vmem:[#allocation4 + $0x440] ss:$28 sps:$4 sm:$0xff]   ;;  %v8571_v41 = vld [vmem:[#allocation4 + $0x248] ss:$28 sps:$4 sm:$0xff]  }
 0x6a5   :  { %6650 = vmatprep.subr.bf16.mxu1 %v8520_v30  ;;  %v8572_v30 = vld [vmem:[#allocation4 + $0x5c8] ss:$28 sps:$4 sm:$0xff]  }
 0x6a7   :  { %6610 = vmatpush2.bf16.msra.mxu0 %v8515_v56  ;;  %v8573_v56 = vld [vmem:[#allocation4 + $0x88] ss:$28 sps:$4 sm:$0xff]  }
 0x6a8   :  { %6651 = vmatpush2.bf16.msra.mxu1 %v8518_v48  ;;  %6611 = vmatprep.subr.bf16.mxu0 %v8523_v21  ;;  %v8574_v48 = vld [vmem:[#allocation4 + $0x408] ss:$28 sps:$4 sm:$0xff]   ;;  %v8575_v21 = vld [vmem:[#allocation4 + $0x210] ss:$28 sps:$4 sm:$0xff]  }
 0x6a9   :  { %6652 = vmatprep.subr.bf16.mxu1 %v8526_v54  ;;  %v8576_v54 = vld [vmem:[#allocation4 + $0x590] ss:$28 sps:$4 sm:$0xff]  }
 0x6ab   :  { %6612 = vmatpush2.bf16.msra.mxu0 %v8521_v16  ;;  %v8577_v16 = vld [vmem:[#allocation4 + $0x50] ss:$28 sps:$4 sm:$0xff]  }
 0x6ac   :  { %6653 = vmatpush2.bf16.msra.mxu1 %v8524_v33  ;;  %6613 = vmatprep.subr.bf16.mxu0 %v8529_v34  ;;  %v8578_v33 = vld [vmem:[#allocation4 + $0x3d0] ss:$28 sps:$4 sm:$0xff]   ;;  %v8579_v34 = vld [vmem:[#allocation4 + $0x1d8] ss:$28 sps:$4 sm:$0xff]  }
 0x6ad   :  { %6654 = vmatprep.subr.bf16.mxu1 %v8532_v35  ;;  %v8580_v35 = vld [vmem:[#allocation4 + $0x558] ss:$28 sps:$4 sm:$0xff]  }
 0x6af   :  { %6614 = vmatpush2.bf16.msra.mxu0 %v8527_v28  ;;  %v8581_v28 = vld [vmem:[#allocation4 + $0x18] ss:$28 sps:$4 sm:$0xff]  }
 0x6b0   :  { %6655 = vmatpush2.bf16.msra.mxu1 %v8530_v50  ;;  %6615 = vmatprep.subr.bf16.mxu0 %v8535_v36  ;;  %v8582_v50 = vld [vmem:[#allocation4 + $0x398] ss:$28 sps:$4 sm:$0xff]   ;;  %v8583_v36 = vld [vmem:[#allocation4 + $0xa60] ss:$28 sps:$4 sm:$0xff]  }
 0x6b1   :  { %6656 = vmatprep.subr.bf16.mxu1 %v8538_v40  ;;  %v8584_v40 = vld [vmem:[#allocation4 + $0xde0] ss:$28 sps:$4 sm:$0xff]  }
 0x6b3   :  { %6616 = vmatpush2.bf16.msra.mxu0 %v8533_v37  ;;  %v8585_v37 = vld [vmem:[#allocation4 + $0x8a0] ss:$28 sps:$4 sm:$0xff]  }
 0x6b4   :  { %6657 = vmatpush2.bf16.msra.mxu1 %v8536_v55  ;;  %6617 = vmatprep.subr.bf16.mxu0 %v8541_v59  ;;  %v8586_v55 = vld [vmem:[#allocation4 + $0xc20] ss:$28 sps:$4 sm:$0xff]   ;;  %v8587_v59 = vld [vmem:[#allocation4 + $0xa28] ss:$28 sps:$4 sm:$0xff]  }
 0x6b5   :  { %6658 = vmatprep.subr.bf16.mxu1 %v8544_v29  ;;  %v8588_v29 = vld [vmem:[#allocation4 + $0xda8] ss:$28 sps:$4 sm:$0xff]  }
 0x6b7   :  { %6618 = vmatpush2.bf16.msra.mxu0 %v8539_v63  ;;  %v8589_v63 = vld [vmem:[#allocation4 + $0x868] ss:$28 sps:$4 sm:$0xff]  }
 0x6b8   :  { %6659 = vmatpush2.bf16.msra.mxu1 %v8542_v4  ;;  %6619 = vmatprep.subr.bf16.mxu0 %v8547_v32  ;;  %v8590_v4 = vld [vmem:[#allocation4 + $0xbe8] ss:$28 sps:$4 sm:$0xff]   ;;  %v8591_v32 = vld [vmem:[#allocation4 + $0x9f0] ss:$28 sps:$4 sm:$0xff]  }
 0x6b9   :  { %6660 = vmatprep.subr.bf16.mxu1 %v8550_v43  ;;  %v8592_v43 = vld [vmem:[#allocation4 + $0xd70] ss:$28 sps:$4 sm:$0xff]  }
 0x6bb   :  { %6620 = vmatpush2.bf16.msra.mxu0 %v8545_v44  ;;  %v8593_v44 = vld [vmem:[#allocation4 + $0x830] ss:$28 sps:$4 sm:$0xff]  }
 0x6bc   :  { %6661 = vmatpush2.bf16.msra.mxu1 %v8548_v47  ;;  %7695 = vmatprep.subr.bf16.mxu0 %v8551_v3  ;;  %v8594_v47 = vld [vmem:[#allocation4 + $0xbb0] ss:$28 sps:$4 sm:$0xff]   ;;  %v8597_v3 = vld [vmem:[#allocation4 + $0x7f8] ss:$28 sps:$4 sm:$0xff]  }
 0x6bd   :  { %7717 = vmatprep.subr.bf16.mxu1 %v8552_v0  ;;  %v8598_v0 = vld [vmem:[#allocation4 + $0xb78] ss:$28 sps:$4 sm:$0xff]  }
 0x6be   :  { %v9171_v61 = vpop.f32.mrf.mxu0  ;;  %6622 = vmatmul.mubr.bf16.vlgmr.msra.gmra.mxu0 %v9131_v7 }
 0x6bf   :  { %v9173_v49 = vpop.f32.mrf.mxu1  ;;  %6663 = vmatmul.mubr.bf16.vlgmr.msra.gmra.mxu1 %v9135_v10  ;;  %7696 = vmatpush3.bf16.msra.mxu0 %v8553_v58  ;;  %v8599_v58 = vld [vmem:[#allocation4 + $0x980] ss:$28 sps:$4 sm:$0xff]  }
 0x6c0   :  { %7718 = vmatpush3.bf16.msra.mxu1 %v8554_v2  ;;  %v9177_v12 = vpop.f32.mrf.mxu0  ;;  %7697 = vmatprep.subr.bf16.mxu0 %v8555_v42  ;;  %v8600_v2 = vld [vmem:[#allocation4 + $0xd00] ss:$28 sps:$4 sm:$0xff]   ;;  %v8603_v42 = vld [vmem:[#allocation4 + $0x948] ss:$28 sps:$4 sm:$0xff]  }
 0x6c1   :  { %v9179_v13 = vpop.f32.mrf.mxu1  ;;  %7719 = vmatprep.subr.bf16.mxu1 %v8556_v31  ;;  %6703 = vmatprep.mubr.bf16.mxu0 %v9101_v8  ;;  %v8567_v8 = vld [vmem:[#allocation4 + $0x280] ss:$28 sps:$4 sm:$0xff]   ;;  %v8604_v31 = vld [vmem:[#allocation4 + $0xcc8] ss:$28 sps:$4 sm:$0xff]  }
 0x6c2   :  { %6743 = vmatprep.mubr.bf16.mxu1 %v9105_v9  ;;  %v6381_v18 = vpop.f32.mrf.mxu0  ;;  %v8568_v9 = vld [vmem:[#allocation4 + $0x600] ss:$28 sps:$4 sm:$0xff]  }
 0x6c3   :  { %v6422_v62 = vpop.f32.mrf.mxu1  ;;  %7698 = vmatpush3.bf16.msra.mxu0 %v8557_v1  ;;  %v8605_v1 = vld [vmem:[#allocation4 + $0x788] ss:$28 sps:$4 sm:$0xff]   ;;  %v8609_v18 = vld [vmem:[#allocation4 + $0x750] ss:$28 sps:$4 sm:$0xff]  }
 0x6c4   :  { %7720 = vmatpush3.bf16.msra.mxu1 %v8558_v11  ;;  %v6382_v20 = vpop.f32.mrf.mxu0  ;;  %7699 = vmatprep.subr.bf16.mxu0 %v8559_v15  ;;  %v8606_v11 = vld [vmem:[#allocation4 + $0xb08] ss:$28 sps:$4 sm:$0xff]   ;;  %v8607_v15 = vld [vmem:[#allocation4 + $0x910] ss:$28 sps:$4 sm:$0xff]  }
 0x6c5   :  { %v6423_v22 = vpop.f32.mrf.mxu1  ;;  %7721 = vmatprep.subr.bf16.mxu1 %v8560_v17  ;;  %v8608_v17 = vld [vmem:[#allocation4 + $0xc90] ss:$28 sps:$4 sm:$0xff]   ;;  %v3851_v20 = vrot.slane %v9157_v6, %v8934_v51 }
 0x6c6   :  { %v8610_v62 = vld [vmem:[#allocation4 + $0xad0] ss:$28 sps:$4 sm:$0xff]   ;;  %v3855_v22 = vrot.slane %v9157_v6, %v8937_v53 }
 0x6c7   :  { %7700 = vmatpush3.bf16.msra.mxu0 %v8561_v27  ;;  %v8611_v27 = vld [vmem:[#allocation4 + $0x8d8] ss:$28 sps:$4 sm:$0xff]  }
 0x6c8   :  { %7722 = vmatpush3.bf16.msra.mxu1 %v8562_v19  ;;  %7701 = vmatprep.subr.bf16.mxu0 %v8563_v38  ;;  %v8612_v19 = vld [vmem:[#allocation4 + $0xc58] ss:$28 sps:$4 sm:$0xff]  }
 0x6c9   :  { %7723 = vmatprep.subr.bf16.mxu1 %v8564_v23  ;;  %v8613_v38 = vld [vmem:[#allocation4 + $0x718] ss:$28 sps:$4 sm:$0xff]  }
 0x6ca   :  { %v8614_v23 = vld [vmem:[#allocation4 + $0xa98] ss:$28 sps:$4 sm:$0xff]  }
 0x6cb   :  { %7702 = vmatpush3.bf16.msra.mxu0 %v8565_v24  ;;  %v6378_v24 = vadd.f32 %v9171_v61, %v3851_v20 }
 0x6cc   :  { %7724 = vmatpush3.bf16.msra.mxu1 %v8566_v25  ;;  %7703 = vmatprep.subr.bf16.mxu0 %v8567_v8  ;;  %v6380_v25 = vadd.f32 %v9177_v12, %v3855_v22 }
 0x6cd   :  { %7725 = vmatprep.subr.bf16.mxu1 %v8568_v9  ;;  %v6419_v8 = vadd.f32 %v9173_v49, %v6378_v24 }
 0x6ce   :  { %v6421_v51 = vadd.f32 %v9179_v13, %v6380_v25 }
 0x6cf   :  { %7704 = vmatpush3.bf16.msra.mxu0 %v8569_v39 }
 0x6d0   :  { %7726 = vmatpush3.bf16.msra.mxu1 %v8570_v14  ;;  %7705 = vmatprep.subr.bf16.mxu0 %v8571_v41 }
 0x6d1   :  { %7727 = vmatprep.subr.bf16.mxu1 %v8572_v30 }
 0x6d3   :  { %7706 = vmatpush3.bf16.msra.mxu0 %v8573_v56 }
 0x6d4   :  { %7728 = vmatpush3.bf16.msra.mxu1 %v8574_v48  ;;  %7707 = vmatprep.subr.bf16.mxu0 %v8575_v21 }
 0x6d5   :  { %7729 = vmatprep.subr.bf16.mxu1 %v8576_v54 }
 0x6d7   :  { %7708 = vmatpush3.bf16.msra.mxu0 %v8577_v16 }
 0x6d8   :  { %7730 = vmatpush3.bf16.msra.mxu1 %v8578_v33  ;;  %7709 = vmatprep.subr.bf16.mxu0 %v8579_v34 }
 0x6d9   :  { %7731 = vmatprep.subr.bf16.mxu1 %v8580_v35 }
 0x6db   :  { %7710 = vmatpush3.bf16.msra.mxu0 %v8581_v28 }
 0x6dc   :  { %7732 = vmatpush3.bf16.msra.mxu1 %v8582_v50  ;;  %7739 = vmatprep.subr.bf16.mxu0 %v8583_v36  ;;  %v3859_v36 = vrot.slane %v9157_v6, %v9056_v60 }
 0x6dd   :  { %7761 = vmatprep.subr.bf16.mxu1 %v8584_v40  ;;  %v3863_v40 = vrot.slane %v9157_v6, %v9059_v57 }
 0x6de   :  { %6704 = vmatmul.mubr.bf16.vlgmr.msra.gmra.mxu0 %v9111_v45  ;;  %v8595_v45 = vld [vmem:[#allocation4 + $0x9b8] ss:$28 sps:$4 sm:$0xff]  }
 0x6df   :  { %6744 = vmatmul.mubr.bf16.vlgmr.msra.gmra.mxu1 %v9115_v46  ;;  %7740 = vmatpush3.bf16.msra.mxu0 %v8585_v37  ;;  %v8596_v46 = vld [vmem:[#allocation4 + $0xd38] ss:$28 sps:$4 sm:$0xff]  }
 0x6e0   :  { %7762 = vmatpush3.bf16.msra.mxu1 %v8586_v55  ;;  %7741 = vmatprep.subr.bf16.mxu0 %v8587_v59 }
 0x6e1   :  { %7763 = vmatprep.subr.bf16.mxu1 %v8588_v29  ;;  %6783 = vmatprep.mubr.bf16.mxu0 %v9119_v52  ;;  %v8601_v52 = vld [vmem:[#allocation4 + $0x7c0] ss:$28 sps:$4 sm:$0xff]  }
 0x6e2   :  { %6823 = vmatprep.mubr.bf16.mxu1 %v9123_v26  ;;  %v8602_v26 = vld [vmem:[#allocation4 + $0xb40] ss:$28 sps:$4 sm:$0xff]  }
 0x6e3   :  { %7742 = vmatpush3.bf16.msra.mxu0 %v8589_v63 }
 0x6e4   :  { %7764 = vmatpush3.bf16.msra.mxu1 %v8590_v4  ;;  %7743 = vmatprep.subr.bf16.mxu0 %v8591_v32 }
 0x6e5   :  { %7765 = vmatprep.subr.bf16.mxu1 %v8592_v43 }
 0x6e7   :  { %7744 = vmatpush3.bf16.msra.mxu0 %v8593_v44 }
 0x6e8   :  { %7766 = vmatpush3.bf16.msra.mxu1 %v8594_v47  ;;  %7745 = vmatprep.subr.bf16.mxu0 %v8595_v45 }
 0x6e9   :  { %7767 = vmatprep.subr.bf16.mxu1 %v8596_v46 }
 0x6eb   :  { %7746 = vmatpush3.bf16.msra.mxu0 %v8597_v3 }
 0x6ec   :  { %7768 = vmatpush3.bf16.msra.mxu1 %v8598_v0  ;;  %7747 = vmatprep.subr.bf16.mxu0 %v8599_v58 }
 0x6ed   :  { %7769 = vmatprep.subr.bf16.mxu1 %v8600_v2 }
 0x6ef   :  { %7748 = vmatpush3.bf16.msra.mxu0 %v8601_v52 }
 0x6f0   :  { %7770 = vmatpush3.bf16.msra.mxu1 %v8602_v26  ;;  %7749 = vmatprep.subr.bf16.mxu0 %v8603_v42 }
 0x6f1   :  { %7771 = vmatprep.subr.bf16.mxu1 %v8604_v31 }
 0x6f3   :  { %7750 = vmatpush3.bf16.msra.mxu0 %v8605_v1 }
 0x6f4   :  { %7772 = vmatpush3.bf16.msra.mxu1 %v8606_v11  ;;  %7751 = vmatprep.subr.bf16.mxu0 %v8607_v15 }
 0x6f5   :  { %7773 = vmatprep.subr.bf16.mxu1 %v8608_v17 }
 0x6f7   :  { %7752 = vmatpush3.bf16.msra.mxu0 %v8609_v18  ;;  %v3867_v18 = vrot.slane %v9157_v6, %v9078_v5 }
 0x6f8   :  { %7774 = vmatpush3.bf16.msra.mxu1 %v8610_v62  ;;  %7753 = vmatprep.subr.bf16.mxu0 %v8611_v27 }
 0x6f9   :  { %7775 = vmatprep.subr.bf16.mxu1 %v8612_v19 }
 0x6fb   :  { %7754 = vmatpush3.bf16.msra.mxu0 %v8613_v38 }
 0x6fc   :  { %7776 = vmatpush3.bf16.msra.mxu1 %v8614_v23 }
 0x6fe   :  { %v6459_v9 = vpop.f32.mrf.mxu0  ;;  %6784 = vmatmul.mubr.bf16.vlgmr.msra.gmra.mxu0 %v9131_v7 }
 0x6ff   :  { %v6500_v39 = vpop.f32.mrf.mxu1  ;;  %6824 = vmatmul.mubr.bf16.vlgmr.msra.gmra.mxu1 %v9135_v10  ;;  %v6460_v53 = vadd.f32 %v6459_v9, %v6419_v8 }
 0x700   :  { %v6461_v14 = vpop.f32.mrf.mxu0 }
 0x701   :  { %v6502_v41 = vpop.f32.mrf.mxu1  ;;  %v6501_v30 = vadd.f32 %v6500_v39, %v6460_v53  ;;  %v6462_v56 = vadd.f32 %v6461_v14, %v6421_v51 }
 0x702   :  { %v6463_v61 = vpop.f32.mrf.mxu0 }
 0x703   :  { %v6504_v48 = vpop.f32.mrf.mxu1  ;;  %8619 = vtanh.f32 %v6501_v30  ;;  %v6503_v12 = vadd.f32 %v6502_v41, %v6462_v56 }
 0x704   :  { %v6464_v21 = vpop.f32.mrf.mxu0 }
 0x705   :  { %v6505_v54 = vpop.f32.mrf.mxu1  ;;  %8621 = vtanh.f32 %v6503_v12 }
 0x710   :  { %v8620_v49 = vpop.eup %8619 }
 0x711   :  { %6840 = vst [vmem:[#allocation14 + $0x10] sm:$0xff] %v8620_v49 }
 0x712   :  { %v8622_v16 = vpop.eup %8621 }
 0x713   :  { %6841 = vst [vmem:[#allocation14 + $0x18] sm:$0xff] %v8622_v16 }
 0x73e   :  { %v6541_v7 = vpop.f32.mrf.mxu0 }
 0x73f   :  { %v6582_v10 = vpop.f32.mrf.mxu1  ;;  %v6542_v37 = vadd.f32 %v6541_v7, %v3859_v36 }
 0x740   :  { %v6543_v33 = vpop.f32.mrf.mxu0 }
 0x741   :  { %v6584_v13 = vpop.f32.mrf.mxu1  ;;  %v6544_v55 = vadd.f32 %v6543_v33, %v3863_v40  ;;  %v6583_v59 = vadd.f32 %v6582_v10, %v6542_v37 }
 0x742   :  { %v6545_v34 = vpop.f32.mrf.mxu0 }
 0x743   :  { %v6586_v35 = vpop.f32.mrf.mxu1  ;;  %v6585_v4 = vadd.f32 %v6584_v13, %v6544_v55 }
 0x744   :  { %v6546_v28 = vpop.f32.mrf.mxu0 }
 0x745   :  { %v6587_v50 = vpop.f32.mrf.mxu1 }
 0x77e   :  { %v6623_v29 = vpop.f32.mrf.mxu0 }
 0x77f   :  { %v6664_v63 = vpop.f32.mrf.mxu1  ;;  %v6624_v32 = vadd.f32 %v6623_v29, %v6583_v59 }
 0x780   :  { %v6625_v43 = vpop.f32.mrf.mxu0 }
 0x781   :  { %v6666_v44 = vpop.f32.mrf.mxu1  ;;  %v6665_v47 = vadd.f32 %v6664_v63, %v6624_v32  ;;  %v6626_v45 = vadd.f32 %v6625_v43, %v6585_v4 }
 0x782   :  { %v6627_v46 = vpop.f32.mrf.mxu0 }
 0x783   :  { %v6668_v3 = vpop.f32.mrf.mxu1  ;;  %8623 = vtanh.f32 %v6665_v47  ;;  %v6667_v0 = vadd.f32 %v6666_v44, %v6626_v45 }
 0x784   :  { %v6628_v58 = vpop.f32.mrf.mxu0 }
 0x785   :  { %v6669_v60 = vpop.f32.mrf.mxu1  ;;  %8625 = vtanh.f32 %v6667_v0 }
 0x790   :  { %v8624_v2 = vpop.eup %8623 }
 0x791   :  { %6842 = vst [vmem:[#allocation14 + $0x20] sm:$0xff] %v8624_v2 }
 0x792   :  { %v8626_v57 = vpop.eup %8625 }
 0x793   :  { %6843 = vst [vmem:[#allocation14 + $0x28] sm:$0xff] %v8626_v57 }
 0x79e   :  { %v7711_v52 = vpop.f32.mrf.mxu0 }
 0x79f   :  { %v7733_v26 = vpop.f32.mrf.mxu1 }
 0x7a0   :  { %v7712_v42 = vpop.f32.mrf.mxu0 }
 0x7a1   :  { %v7734_v31 = vpop.f32.mrf.mxu1  ;;  %v7713_v62 = vadd.f32 %v7712_v42, %v7711_v52 }
 0x7a2   :  { %v7714_v1 = vpop.f32.mrf.mxu0  ;;  %v7735_v19 = vadd.f32 %v7734_v31, %v7733_v26 }
 0x7a3   :  { %v7736_v11 = vpop.f32.mrf.mxu1  ;;  %v6706_v27 = vadd.f32 %v7713_v62, %v3867_v18 }
 0x7a4   :  { %v7715_v15 = vpop.f32.mrf.mxu0 }
 0x7a5   :  { %v7737_v17 = vpop.f32.mrf.mxu1  ;;  %v6746_v24 = vadd.f32 %v7735_v19, %v6706_v27 }
 0x7be   :  { %v7755_v20 = vpop.f32.mrf.mxu0 }
 0x7bf   :  { %v7777_v22 = vpop.f32.mrf.mxu1 }
 0x7c0   :  { %v7756_v38 = vpop.f32.mrf.mxu0 }
 0x7c1   :  { %v7778_v23 = vpop.f32.mrf.mxu1  ;;  %v7757_v25 = vadd.f32 %v7756_v38, %v7755_v20 }
 0x7c2   :  { %v7758_v8 = vpop.f32.mrf.mxu0  ;;  %v7779_v51 = vadd.f32 %v7778_v23, %v7777_v22 }
 0x7c3   :  { %v7780_v9 = vpop.f32.mrf.mxu1  ;;  %v6786_v39 = vadd.f32 %v7757_v25, %v6746_v24 }
 0x7c4   :  { %v7759_v53 = vpop.f32.mrf.mxu0 }
 0x7c5   :  { %v7781_v14 = vpop.f32.mrf.mxu1  ;;  %v6826_v41 = vadd.f32 %v7779_v51, %v6786_v39 }
 0x7c7   :  { %8627 = vtanh.f32 %v6826_v41 }
 0x7d4   :  { %v8628_v5 = vpop.eup %8627 }
 0x7d5   :  { %6844 = vst [vmem:[#allocation14 + $0x30] sm:$0xff] %v8628_v5 }
 0x7d6   :  { %8803 = shalt.err (!%p8800_p2)
}
 0x7d7   :  { %6854 = dma.vmem_to_hbm [thread:$0]  %s6852_s17, 896, %s9213_s7, [#allocation8]  }
 0x7d8   :  { %8826 = dma.done.wait [#allocation8], 896  }
 0x7d9   :  { %8827 = vsyncadd [#allocation8], 4294966400 }
 0x7da   :  { %6858 = vsyncpa [#allocation7], 1 }
 0x7db   :  { %6859 = vsyncpa [#allocation10], 1 }
 0x7dc   :  { %6860 = vsyncpa [#allocation13], 1 }
 0x7dd   :  { %6861 = vsyncpa [#allocation8], 1 }
 0x7de   :  { %6862 = vsyncmov [#allocation5] }
 0x7e1   :  { %s6863_s21 = vpop.sfrf %6862 }
 0x7e2   :  { %p7682_p3 = scmp.ne.s32.totalorder %s6863_s21, 0 }
 0x7e4   :  { %6867 = shalt.err (%p7682_p3)  }
 0x7e5   :  { %6869 = vsyncmov [#allocation5 + $0x1] }
 0x7e8   :  { %s6870_s0 = vpop.sfrf %6869 }
 0x7e9   :  { %p7683_p4 = scmp.ne.s32.totalorder %s6870_s0, 0 }
 0x7eb   :  { %6874 = shalt.err (%p7683_p4)  }
 0x7ec   :  { %6876 = vsyncmov [#allocation5 + $0x2] }
 0x7ef   :  { %s6877_s22 = vpop.sfrf %6876 }
 0x7f0   :  { %p7684_p5 = scmp.ne.s32.totalorder %s6877_s22, 0 }
 0x7f2   :  { %6881 = shalt.err (%p7684_p5)  }
 0x7f3   :  { %6883 = vsyncmov [#allocation5 + $0x3] }
 0x7f6   :  { %s6884_s7 = vpop.sfrf %6883 }
 0x7f7   :  { %p7685_p6 = scmp.ne.s32.totalorder %s6884_s7, 0 }
 0x7f9   :  { %6888 = shalt.err (%p7685_p6)  }

</bundles_post_ra>
